<compile_context>
chip_gen: v7x
topology: tpu7x:2x2x1
jax: 0.10.0
libtpu: 0.0.40
codegen_flags: <defaults>
</compile_context>

<pallas_src>
import functools

import numpy as np

import jax
import jax.numpy as jnp
from jax.experimental import pallas as pl
from jax.experimental.pallas import tpu as pltpu

EPS = 1e-5
K, STRIDE, PAD = 4, 2, 1  # conv kernel / stride / padding for every layer


def _vmem():
    return pl.BlockSpec(memory_space=pltpu.MemorySpace.VMEM)


# ---------------------------------------------------------------------------
# Fused Pallas kernel: 4x (conv -> [BN] -> ReLU) -> Linear
# ---------------------------------------------------------------------------
def encoder_kernel(p1_ref, w1_ref,
                   s2_ref, w2_ref, g2_ref, b2_ref,
                   s3_ref, w3_ref, g3_ref, b3_ref,
                   s4_ref, w4_ref, g4_ref, b4_ref,
                   fcw_ref, fcb_ref,
                   out_ref):
    def conv_bn_relu(a_f32, s_ref, w_ref, g_ref, b_ref):
        # a_f32 : (R_in, C_in) activations (rows = N*H*W, cols = channels)
        # s_ref : (16, R_out, R_in) 0/1 patch-gather matrices (bf16, exact)
        # w_ref : (16, C_in, C_out) conv weight per kernel tap (bf16)
        a_bf = a_f32.astype(jnp.bfloat16)
        r_out = s_ref.shape[1]

        def tap(t):
            gathered = jnp.dot(s_ref[t], a_bf,
                               preferred_element_type=jnp.float32)
            return jnp.dot(gathered.astype(jnp.bfloat16), w_ref[t],
                           preferred_element_type=jnp.float32)

        acc = tap(0)
        for t in range(1, K * K):
            acc = acc + tap(t)

        # Training-mode BatchNorm2d (biased variance), fused single-pass stats.
        inv_r = jnp.float32(1.0 / r_out)
        mean = jnp.sum(acc, axis=0, keepdims=True) * inv_r
        ex2 = jnp.sum(acc * acc, axis=0, keepdims=True) * inv_r
        var = jnp.maximum(ex2 - mean * mean, 0.0)
        y = (acc - mean) * jax.lax.rsqrt(var + EPS)
        y = y * g_ref[...] + b_ref[...]
        return jnp.maximum(y, 0.0)

    # Layer 1: conv (im2col patches precomputed, C_in = 1) + ReLU, no BN.
    a = jnp.dot(p1_ref[...], w1_ref[...], preferred_element_type=jnp.float32)
    a = jnp.maximum(a, 0.0)

    a = conv_bn_relu(a, s2_ref, w2_ref, g2_ref, b2_ref)
    a = conv_bn_relu(a, s3_ref, w3_ref, g3_ref, b3_ref)
    a = conv_bn_relu(a, s4_ref, w4_ref, g4_ref, b4_ref)

    # squeeze (spatial is 1x1) -> Linear(8*dim_h, n_z)
    out_ref[...] = (
        jnp.dot(a.astype(jnp.bfloat16), fcw_ref[...],
                preferred_element_type=jnp.float32)
        + fcb_ref[...]
    )


# ---------------------------------------------------------------------------
# Host-side glue: geometry constants, layer-1 im2col, params
# ---------------------------------------------------------------------------
def _conv_out(sz):
    return (sz + 2 * PAD - K) // STRIDE + 1


def _build_gather(n, h, w):
    """0/1 matrices S[t] of shape (N*Ho*Wo, N*H*W): row-gather + zero padding."""
    ho, wo = _conv_out(h), _conv_out(w)
    g = np.zeros((K * K, n * ho * wo, n * h * w), np.float32)
    for kh in range(K):
        for kw in range(K):
            t = kh * K + kw
            for b in range(n):
                for oh in range(ho):
                    ih = oh * STRIDE + kh - PAD
                    if not 0 <= ih < h:
                        continue
                    for ow in range(wo):
                        iw = ow * STRIDE + kw - PAD
                        if 0 <= iw < w:
                            g[t, b * ho * wo + oh * wo + ow,
                              b * h * w + ih * w + iw] = 1.0
    return g


def build_gathers(batch, h, w):
    """Gather matrices for conv layers 2..4 (layer-1 im2col is in the wrapper)."""
    gathers = []
    hh, ww = _conv_out(h), _conv_out(w)       # spatial after layer 1
    for _ in range(3):
        gathers.append(jnp.asarray(_build_gather(batch, hh, ww), jnp.bfloat16))
        hh, ww = _conv_out(hh), _conv_out(ww)
    return gathers


def im2col_l1(x_nhwc):
    """Tiny layer-1 im2col (input only): (N,H,W,1) -> (N*Ho*Wo, 16)."""
    n, h, w, c = x_nhwc.shape
    xp = jnp.pad(x_nhwc, ((0, 0), (PAD, PAD), (PAD, PAD), (0, 0)))
    ho, wo = _conv_out(h), _conv_out(w)
    pieces = []
    for i in range(K):
        for j in range(K):
            pieces.append(xp[:, i:i + STRIDE * ho:STRIDE,
                             j:j + STRIDE * wo:STRIDE, :])
    pat = jnp.stack(pieces, axis=3)           # (N, Ho, Wo, 16, C)
    return pat.reshape(n * ho * wo, K * K * c)


def init_params(key, dim_h, n_z):
    ks = jax.random.split(key, 6)
    chans = [1, dim_h, 2 * dim_h, 4 * dim_h, 8 * dim_h]
    conv_w, bn_g, bn_b = [], [], []
    for li in range(4):
        cin, cout = chans[li], chans[li + 1]
        fan_in = K * K * cin
        wmat = jax.random.normal(ks[li], (K * K, cin, cout), jnp.float32)
        wmat = (wmat / jnp.sqrt(jnp.float32(fan_in))).astype(jnp.bfloat16)
        conv_w.append(wmat)                   # (16, C_in, C_out), tap = kh*4+kw
        if li > 0:                            # fresh BatchNorm2d: gamma=1, beta=0
            bn_g.append(jnp.ones((1, cout), jnp.float32))
            bn_b.append(jnp.zeros((1, cout), jnp.float32))
    fc_in = 8 * dim_h
    fc_w = (jax.random.normal(ks[4], (fc_in, n_z), jnp.float32)
            / jnp.sqrt(jnp.float32(fc_in))).astype(jnp.bfloat16)
    fc_b = jax.random.normal(ks[5], (1, n_z), jnp.float32) * 0.01
    return {"conv_w": conv_w, "bn_g": bn_g, "bn_b": bn_b,
            "fc_w": fc_w, "fc_b": fc_b}


def encoder_forward(params, gathers, x_nchw):
    n = x_nchw.shape[0]
    n_z = params["fc_w"].shape[1]
    x = jnp.transpose(x_nchw, (0, 2, 3, 1)).astype(jnp.float32)   # NHWC
    patches = im2col_l1(x).astype(jnp.bfloat16)                   # (N*64, 16)
    w1 = params["conv_w"][0].reshape(K * K, -1)                   # (16, dim_h)

    args = [patches, w1]
    for li in range(1, 4):
        args += [gathers[li - 1], params["conv_w"][li],
                 params["bn_g"][li - 1], params["bn_b"][li - 1]]
    args += [params["fc_w"], params["fc_b"]]

    return pl.pallas_call(
        encoder_kernel,
        out_shape=jax.ShapeDtypeStruct((n, n_z), jnp.float32),
        in_specs=[_vmem() for _ in args],
        out_specs=_vmem(),
    )(*args)


if __name__ == "__main__":
    dim_h = 8
    n_z = 10
    batch = 2
    h = w = 16   # 16x16 -> 1x1 after four stride-2 convs (matches squeeze->fc)

    key = jax.random.PRNGKey(0)
    k_in, k_par = jax.random.split(key)
    x = jax.random.normal(k_in, (batch, 1, h, w), jnp.float32)
    params = init_params(k_par, dim_h, n_z)
    gathers = build_gathers(batch, h, w)      # static geometry constants

    fwd = jax.jit(encoder_forward)
    out = fwd(params, gathers, x)
    jax.block_until_ready(out)

    assert out.shape == (batch, n_z), out.shape
    assert bool(jnp.all(jnp.isfinite(out)))
    print("KERNEL_OK")
</pallas_src>

<mosaic_0001>
module attributes {stable_mosaic.version = 11 : i64} {
  func.func @encoder_kernel(%arg0: memref<128x16xbf16, #tpu.memory_space<vmem>>, %arg1: memref<16x8xbf16, #tpu.memory_space<vmem>>, %arg2: memref<16x32x128xbf16, #tpu.memory_space<vmem>>, %arg3: memref<16x8x16xbf16, #tpu.memory_space<vmem>>, %arg4: memref<1x16xf32, #tpu.memory_space<vmem>>, %arg5: memref<1x16xf32, #tpu.memory_space<vmem>>, %arg6: memref<16x8x32xbf16, #tpu.memory_space<vmem>>, %arg7: memref<16x16x32xbf16, #tpu.memory_space<vmem>>, %arg8: memref<1x32xf32, #tpu.memory_space<vmem>>, %arg9: memref<1x32xf32, #tpu.memory_space<vmem>>, %arg10: memref<16x2x8xbf16, #tpu.memory_space<vmem>>, %arg11: memref<16x32x64xbf16, #tpu.memory_space<vmem>>, %arg12: memref<1x64xf32, #tpu.memory_space<vmem>>, %arg13: memref<1x64xf32, #tpu.memory_space<vmem>>, %arg14: memref<64x10xbf16, #tpu.memory_space<vmem>>, %arg15: memref<1x10xf32, #tpu.memory_space<vmem>>, %arg16: memref<2x10xf32, #tpu.memory_space<vmem>>) attributes {dimension_semantics = [], scalar_prefetch = 0 : i64, scratch_operands = 0 : i64, tpu.core_type = #tpu.core_type<tc>} {
    %c0 = arith.constant 0 : index
    %c0_0 = arith.constant 0 : index
    %0 = vector.load %arg0[%c0, %c0_0] : memref<128x16xbf16, #tpu.memory_space<vmem>>, vector<128x16xbf16>
    %c0_1 = arith.constant 0 : index
    %c0_2 = arith.constant 0 : index
    %1 = vector.load %arg1[%c0_1, %c0_2] : memref<16x8xbf16, #tpu.memory_space<vmem>>, vector<16x8xbf16>
    %cst = arith.constant dense<0.000000e+00> : vector<128x8xf32>
    %2 = tpu.matmul %0, %1, %cst {dimension_numbers = #tpu.dot_dimension_numbers<[1], [0], [0], [1], [0, 0, 1, 1], [], []>} : vector<128x16xbf16>, vector<16x8xbf16>, vector<128x8xf32> -> vector<128x8xf32>
    %cst_3 = arith.constant 0.000000e+00 : f32
    %3 = vector.broadcast %cst_3 : f32 to vector<128x8xf32>
    %4 = arith.maximumf %2, %3 : vector<128x8xf32>
    %5 = arith.truncf %4 : vector<128x8xf32> to vector<128x8xbf16>
    %c0_4 = arith.constant 0 : index
    %c0_5 = arith.constant 0 : index
    %c0_6 = arith.constant 0 : index
    %6 = vector.load %arg2[%c0_4, %c0_5, %c0_6] : memref<16x32x128xbf16, #tpu.memory_space<vmem>>, vector<1x32x128xbf16>
    %7 = vector.shape_cast %6 : vector<1x32x128xbf16> to vector<32x128xbf16>
    %cst_7 = arith.constant dense<0.000000e+00> : vector<32x8xf32>
    %8 = tpu.matmul %7, %5, %cst_7 {dimension_numbers = #tpu.dot_dimension_numbers<[1], [0], [0], [1], [0, 0, 1, 1], [], []>} : vector<32x128xbf16>, vector<128x8xbf16>, vector<32x8xf32> -> vector<32x8xf32>
    %9 = arith.truncf %8 : vector<32x8xf32> to vector<32x8xbf16>
    %c0_8 = arith.constant 0 : index
    %c0_9 = arith.constant 0 : index
    %c0_10 = arith.constant 0 : index
    %10 = vector.load %arg3[%c0_8, %c0_9, %c0_10] : memref<16x8x16xbf16, #tpu.memory_space<vmem>>, vector<1x8x16xbf16>
    %11 = vector.shape_cast %10 : vector<1x8x16xbf16> to vector<8x16xbf16>
    %cst_11 = arith.constant dense<0.000000e+00> : vector<32x16xf32>
    %12 = tpu.matmul %9, %11, %cst_11 {dimension_numbers = #tpu.dot_dimension_numbers<[1], [0], [0], [1], [0, 0, 1, 1], [], []>} : vector<32x8xbf16>, vector<8x16xbf16>, vector<32x16xf32> -> vector<32x16xf32>
    %c1 = arith.constant 1 : index
    %c0_12 = arith.constant 0 : index
    %c0_13 = arith.constant 0 : index
    %13 = vector.load %arg2[%c1, %c0_12, %c0_13] : memref<16x32x128xbf16, #tpu.memory_space<vmem>>, vector<1x32x128xbf16>
    %14 = vector.shape_cast %13 : vector<1x32x128xbf16> to vector<32x128xbf16>
    %cst_14 = arith.constant dense<0.000000e+00> : vector<32x8xf32>
    %15 = tpu.matmul %14, %5, %cst_14 {dimension_numbers = #tpu.dot_dimension_numbers<[1], [0], [0], [1], [0, 0, 1, 1], [], []>} : vector<32x128xbf16>, vector<128x8xbf16>, vector<32x8xf32> -> vector<32x8xf32>
    %16 = arith.truncf %15 : vector<32x8xf32> to vector<32x8xbf16>
    %c1_15 = arith.constant 1 : index
    %c0_16 = arith.constant 0 : index
    %c0_17 = arith.constant 0 : index
    %17 = vector.load %arg3[%c1_15, %c0_16, %c0_17] : memref<16x8x16xbf16, #tpu.memory_space<vmem>>, vector<1x8x16xbf16>
    %18 = vector.shape_cast %17 : vector<1x8x16xbf16> to vector<8x16xbf16>
    %cst_18 = arith.constant dense<0.000000e+00> : vector<32x16xf32>
    %19 = tpu.matmul %16, %18, %cst_18 {dimension_numbers = #tpu.dot_dimension_numbers<[1], [0], [0], [1], [0, 0, 1, 1], [], []>} : vector<32x8xbf16>, vector<8x16xbf16>, vector<32x16xf32> -> vector<32x16xf32>
    %20 = arith.addf %12, %19 : vector<32x16xf32>
    %c2 = arith.constant 2 : index
    %c0_19 = arith.constant 0 : index
    %c0_20 = arith.constant 0 : index
    %21 = vector.load %arg2[%c2, %c0_19, %c0_20] : memref<16x32x128xbf16, #tpu.memory_space<vmem>>, vector<1x32x128xbf16>
    %22 = vector.shape_cast %21 : vector<1x32x128xbf16> to vector<32x128xbf16>
    %cst_21 = arith.constant dense<0.000000e+00> : vector<32x8xf32>
    %23 = tpu.matmul %22, %5, %cst_21 {dimension_numbers = #tpu.dot_dimension_numbers<[1], [0], [0], [1], [0, 0, 1, 1], [], []>} : vector<32x128xbf16>, vector<128x8xbf16>, vector<32x8xf32> -> vector<32x8xf32>
    %24 = arith.truncf %23 : vector<32x8xf32> to vector<32x8xbf16>
    %c2_22 = arith.constant 2 : index
    %c0_23 = arith.constant 0 : index
    %c0_24 = arith.constant 0 : index
    %25 = vector.load %arg3[%c2_22, %c0_23, %c0_24] : memref<16x8x16xbf16, #tpu.memory_space<vmem>>, vector<1x8x16xbf16>
    %26 = vector.shape_cast %25 : vector<1x8x16xbf16> to vector<8x16xbf16>
    %cst_25 = arith.constant dense<0.000000e+00> : vector<32x16xf32>
    %27 = tpu.matmul %24, %26, %cst_25 {dimension_numbers = #tpu.dot_dimension_numbers<[1], [0], [0], [1], [0, 0, 1, 1], [], []>} : vector<32x8xbf16>, vector<8x16xbf16>, vector<32x16xf32> -> vector<32x16xf32>
    %28 = arith.addf %20, %27 : vector<32x16xf32>
    %c3 = arith.constant 3 : index
    %c0_26 = arith.constant 0 : index
    %c0_27 = arith.constant 0 : index
    %29 = vector.load %arg2[%c3, %c0_26, %c0_27] : memref<16x32x128xbf16, #tpu.memory_space<vmem>>, vector<1x32x128xbf16>
    %30 = vector.shape_cast %29 : vector<1x32x128xbf16> to vector<32x128xbf16>
    %cst_28 = arith.constant dense<0.000000e+00> : vector<32x8xf32>
    %31 = tpu.matmul %30, %5, %cst_28 {dimension_numbers = #tpu.dot_dimension_numbers<[1], [0], [0], [1], [0, 0, 1, 1], [], []>} : vector<32x128xbf16>, vector<128x8xbf16>, vector<32x8xf32> -> vector<32x8xf32>
    %32 = arith.truncf %31 : vector<32x8xf32> to vector<32x8xbf16>
    %c3_29 = arith.constant 3 : index
    %c0_30 = arith.constant 0 : index
    %c0_31 = arith.constant 0 : index
    %33 = vector.load %arg3[%c3_29, %c0_30, %c0_31] : memref<16x8x16xbf16, #tpu.memory_space<vmem>>, vector<1x8x16xbf16>
    %34 = vector.shape_cast %33 : vector<1x8x16xbf16> to vector<8x16xbf16>
    %cst_32 = arith.constant dense<0.000000e+00> : vector<32x16xf32>
    %35 = tpu.matmul %32, %34, %cst_32 {dimension_numbers = #tpu.dot_dimension_numbers<[1], [0], [0], [1], [0, 0, 1, 1], [], []>} : vector<32x8xbf16>, vector<8x16xbf16>, vector<32x16xf32> -> vector<32x16xf32>
    %36 = arith.addf %28, %35 : vector<32x16xf32>
    %c4 = arith.constant 4 : index
    %c0_33 = arith.constant 0 : index
    %c0_34 = arith.constant 0 : index
    %37 = vector.load %arg2[%c4, %c0_33, %c0_34] : memref<16x32x128xbf16, #tpu.memory_space<vmem>>, vector<1x32x128xbf16>
    %38 = vector.shape_cast %37 : vector<1x32x128xbf16> to vector<32x128xbf16>
    %cst_35 = arith.constant dense<0.000000e+00> : vector<32x8xf32>
    %39 = tpu.matmul %38, %5, %cst_35 {dimension_numbers = #tpu.dot_dimension_numbers<[1], [0], [0], [1], [0, 0, 1, 1], [], []>} : vector<32x128xbf16>, vector<128x8xbf16>, vector<32x8xf32> -> vector<32x8xf32>
    %40 = arith.truncf %39 : vector<32x8xf32> to vector<32x8xbf16>
    %c4_36 = arith.constant 4 : index
    %c0_37 = arith.constant 0 : index
    %c0_38 = arith.constant 0 : index
    %41 = vector.load %arg3[%c4_36, %c0_37, %c0_38] : memref<16x8x16xbf16, #tpu.memory_space<vmem>>, vector<1x8x16xbf16>
    %42 = vector.shape_cast %41 : vector<1x8x16xbf16> to vector<8x16xbf16>
    %cst_39 = arith.constant dense<0.000000e+00> : vector<32x16xf32>
    %43 = tpu.matmul %40, %42, %cst_39 {dimension_numbers = #tpu.dot_dimension_numbers<[1], [0], [0], [1], [0, 0, 1, 1], [], []>} : vector<32x8xbf16>, vector<8x16xbf16>, vector<32x16xf32> -> vector<32x16xf32>
    %44 = arith.addf %36, %43 : vector<32x16xf32>
    %c5 = arith.constant 5 : index
    %c0_40 = arith.constant 0 : index
    %c0_41 = arith.constant 0 : index
    %45 = vector.load %arg2[%c5, %c0_40, %c0_41] : memref<16x32x128xbf16, #tpu.memory_space<vmem>>, vector<1x32x128xbf16>
    %46 = vector.shape_cast %45 : vector<1x32x128xbf16> to vector<32x128xbf16>
    %cst_42 = arith.constant dense<0.000000e+00> : vector<32x8xf32>
    %47 = tpu.matmul %46, %5, %cst_42 {dimension_numbers = #tpu.dot_dimension_numbers<[1], [0], [0], [1], [0, 0, 1, 1], [], []>} : vector<32x128xbf16>, vector<128x8xbf16>, vector<32x8xf32> -> vector<32x8xf32>
    %48 = arith.truncf %47 : vector<32x8xf32> to vector<32x8xbf16>
    %c5_43 = arith.constant 5 : index
    %c0_44 = arith.constant 0 : index
    %c0_45 = arith.constant 0 : index
    %49 = vector.load %arg3[%c5_43, %c0_44, %c0_45] : memref<16x8x16xbf16, #tpu.memory_space<vmem>>, vector<1x8x16xbf16>
    %50 = vector.shape_cast %49 : vector<1x8x16xbf16> to vector<8x16xbf16>
    %cst_46 = arith.constant dense<0.000000e+00> : vector<32x16xf32>
    %51 = tpu.matmul %48, %50, %cst_46 {dimension_numbers = #tpu.dot_dimension_numbers<[1], [0], [0], [1], [0, 0, 1, 1], [], []>} : vector<32x8xbf16>, vector<8x16xbf16>, vector<32x16xf32> -> vector<32x16xf32>
    %52 = arith.addf %44, %51 : vector<32x16xf32>
    %c6 = arith.constant 6 : index
    %c0_47 = arith.constant 0 : index
    %c0_48 = arith.constant 0 : index
    %53 = vector.load %arg2[%c6, %c0_47, %c0_48] : memref<16x32x128xbf16, #tpu.memory_space<vmem>>, vector<1x32x128xbf16>
    %54 = vector.shape_cast %53 : vector<1x32x128xbf16> to vector<32x128xbf16>
    %cst_49 = arith.constant dense<0.000000e+00> : vector<32x8xf32>
    %55 = tpu.matmul %54, %5, %cst_49 {dimension_numbers = #tpu.dot_dimension_numbers<[1], [0], [0], [1], [0, 0, 1, 1], [], []>} : vector<32x128xbf16>, vector<128x8xbf16>, vector<32x8xf32> -> vector<32x8xf32>
    %56 = arith.truncf %55 : vector<32x8xf32> to vector<32x8xbf16>
    %c6_50 = arith.constant 6 : index
    %c0_51 = arith.constant 0 : index
    %c0_52 = arith.constant 0 : index
    %57 = vector.load %arg3[%c6_50, %c0_51, %c0_52] : memref<16x8x16xbf16, #tpu.memory_space<vmem>>, vector<1x8x16xbf16>
    %58 = vector.shape_cast %57 : vector<1x8x16xbf16> to vector<8x16xbf16>
    %cst_53 = arith.constant dense<0.000000e+00> : vector<32x16xf32>
    %59 = tpu.matmul %56, %58, %cst_53 {dimension_numbers = #tpu.dot_dimension_numbers<[1], [0], [0], [1], [0, 0, 1, 1], [], []>} : vector<32x8xbf16>, vector<8x16xbf16>, vector<32x16xf32> -> vector<32x16xf32>
    %60 = arith.addf %52, %59 : vector<32x16xf32>
    %c7 = arith.constant 7 : index
    %c0_54 = arith.constant 0 : index
    %c0_55 = arith.constant 0 : index
    %61 = vector.load %arg2[%c7, %c0_54, %c0_55] : memref<16x32x128xbf16, #tpu.memory_space<vmem>>, vector<1x32x128xbf16>
    %62 = vector.shape_cast %61 : vector<1x32x128xbf16> to vector<32x128xbf16>
    %cst_56 = arith.constant dense<0.000000e+00> : vector<32x8xf32>
    %63 = tpu.matmul %62, %5, %cst_56 {dimension_numbers = #tpu.dot_dimension_numbers<[1], [0], [0], [1], [0, 0, 1, 1], [], []>} : vector<32x128xbf16>, vector<128x8xbf16>, vector<32x8xf32> -> vector<32x8xf32>
    %64 = arith.truncf %63 : vector<32x8xf32> to vector<32x8xbf16>
    %c7_57 = arith.constant 7 : index
    %c0_58 = arith.constant 0 : index
    %c0_59 = arith.constant 0 : index
    %65 = vector.load %arg3[%c7_57, %c0_58, %c0_59] : memref<16x8x16xbf16, #tpu.memory_space<vmem>>, vector<1x8x16xbf16>
    %66 = vector.shape_cast %65 : vector<1x8x16xbf16> to vector<8x16xbf16>
    %cst_60 = arith.constant dense<0.000000e+00> : vector<32x16xf32>
    %67 = tpu.matmul %64, %66, %cst_60 {dimension_numbers = #tpu.dot_dimension_numbers<[1], [0], [0], [1], [0, 0, 1, 1], [], []>} : vector<32x8xbf16>, vector<8x16xbf16>, vector<32x16xf32> -> vector<32x16xf32>
    %68 = arith.addf %60, %67 : vector<32x16xf32>
    %c8 = arith.constant 8 : index
    %c0_61 = arith.constant 0 : index
    %c0_62 = arith.constant 0 : index
    %69 = vector.load %arg2[%c8, %c0_61, %c0_62] : memref<16x32x128xbf16, #tpu.memory_space<vmem>>, vector<1x32x128xbf16>
    %70 = vector.shape_cast %69 : vector<1x32x128xbf16> to vector<32x128xbf16>
    %cst_63 = arith.constant dense<0.000000e+00> : vector<32x8xf32>
    %71 = tpu.matmul %70, %5, %cst_63 {dimension_numbers = #tpu.dot_dimension_numbers<[1], [0], [0], [1], [0, 0, 1, 1], [], []>} : vector<32x128xbf16>, vector<128x8xbf16>, vector<32x8xf32> -> vector<32x8xf32>
    %72 = arith.truncf %71 : vector<32x8xf32> to vector<32x8xbf16>
    %c8_64 = arith.constant 8 : index
    %c0_65 = arith.constant 0 : index
    %c0_66 = arith.constant 0 : index
    %73 = vector.load %arg3[%c8_64, %c0_65, %c0_66] : memref<16x8x16xbf16, #tpu.memory_space<vmem>>, vector<1x8x16xbf16>
    %74 = vector.shape_cast %73 : vector<1x8x16xbf16> to vector<8x16xbf16>
    %cst_67 = arith.constant dense<0.000000e+00> : vector<32x16xf32>
    %75 = tpu.matmul %72, %74, %cst_67 {dimension_numbers = #tpu.dot_dimension_numbers<[1], [0], [0], [1], [0, 0, 1, 1], [], []>} : vector<32x8xbf16>, vector<8x16xbf16>, vector<32x16xf32> -> vector<32x16xf32>
    %76 = arith.addf %68, %75 : vector<32x16xf32>
    %c9 = arith.constant 9 : index
    %c0_68 = arith.constant 0 : index
    %c0_69 = arith.constant 0 : index
    %77 = vector.load %arg2[%c9, %c0_68, %c0_69] : memref<16x32x128xbf16, #tpu.memory_space<vmem>>, vector<1x32x128xbf16>
    %78 = vector.shape_cast %77 : vector<1x32x128xbf16> to vector<32x128xbf16>
    %cst_70 = arith.constant dense<0.000000e+00> : vector<32x8xf32>
    %79 = tpu.matmul %78, %5, %cst_70 {dimension_numbers = #tpu.dot_dimension_numbers<[1], [0], [0], [1], [0, 0, 1, 1], [], []>} : vector<32x128xbf16>, vector<128x8xbf16>, vector<32x8xf32> -> vector<32x8xf32>
    %80 = arith.truncf %79 : vector<32x8xf32> to vector<32x8xbf16>
    %c9_71 = arith.constant 9 : index
    %c0_72 = arith.constant 0 : index
    %c0_73 = arith.constant 0 : index
    %81 = vector.load %arg3[%c9_71, %c0_72, %c0_73] : memref<16x8x16xbf16, #tpu.memory_space<vmem>>, vector<1x8x16xbf16>
    %82 = vector.shape_cast %81 : vector<1x8x16xbf16> to vector<8x16xbf16>
    %cst_74 = arith.constant dense<0.000000e+00> : vector<32x16xf32>
    %83 = tpu.matmul %80, %82, %cst_74 {dimension_numbers = #tpu.dot_dimension_numbers<[1], [0], [0], [1], [0, 0, 1, 1], [], []>} : vector<32x8xbf16>, vector<8x16xbf16>, vector<32x16xf32> -> vector<32x16xf32>
    %84 = arith.addf %76, %83 : vector<32x16xf32>
    %c10 = arith.constant 10 : index
    %c0_75 = arith.constant 0 : index
    %c0_76 = arith.constant 0 : index
    %85 = vector.load %arg2[%c10, %c0_75, %c0_76] : memref<16x32x128xbf16, #tpu.memory_space<vmem>>, vector<1x32x128xbf16>
    %86 = vector.shape_cast %85 : vector<1x32x128xbf16> to vector<32x128xbf16>
    %cst_77 = arith.constant dense<0.000000e+00> : vector<32x8xf32>
    %87 = tpu.matmul %86, %5, %cst_77 {dimension_numbers = #tpu.dot_dimension_numbers<[1], [0], [0], [1], [0, 0, 1, 1], [], []>} : vector<32x128xbf16>, vector<128x8xbf16>, vector<32x8xf32> -> vector<32x8xf32>
    %88 = arith.truncf %87 : vector<32x8xf32> to vector<32x8xbf16>
    %c10_78 = arith.constant 10 : index
    %c0_79 = arith.constant 0 : index
    %c0_80 = arith.constant 0 : index
    %89 = vector.load %arg3[%c10_78, %c0_79, %c0_80] : memref<16x8x16xbf16, #tpu.memory_space<vmem>>, vector<1x8x16xbf16>
    %90 = vector.shape_cast %89 : vector<1x8x16xbf16> to vector<8x16xbf16>
    %cst_81 = arith.constant dense<0.000000e+00> : vector<32x16xf32>
    %91 = tpu.matmul %88, %90, %cst_81 {dimension_numbers = #tpu.dot_dimension_numbers<[1], [0], [0], [1], [0, 0, 1, 1], [], []>} : vector<32x8xbf16>, vector<8x16xbf16>, vector<32x16xf32> -> vector<32x16xf32>
    %92 = arith.addf %84, %91 : vector<32x16xf32>
    %c11 = arith.constant 11 : index
    %c0_82 = arith.constant 0 : index
    %c0_83 = arith.constant 0 : index
    %93 = vector.load %arg2[%c11, %c0_82, %c0_83] : memref<16x32x128xbf16, #tpu.memory_space<vmem>>, vector<1x32x128xbf16>
    %94 = vector.shape_cast %93 : vector<1x32x128xbf16> to vector<32x128xbf16>
    %cst_84 = arith.constant dense<0.000000e+00> : vector<32x8xf32>
    %95 = tpu.matmul %94, %5, %cst_84 {dimension_numbers = #tpu.dot_dimension_numbers<[1], [0], [0], [1], [0, 0, 1, 1], [], []>} : vector<32x128xbf16>, vector<128x8xbf16>, vector<32x8xf32> -> vector<32x8xf32>
    %96 = arith.truncf %95 : vector<32x8xf32> to vector<32x8xbf16>
    %c11_85 = arith.constant 11 : index
    %c0_86 = arith.constant 0 : index
    %c0_87 = arith.constant 0 : index
    %97 = vector.load %arg3[%c11_85, %c0_86, %c0_87] : memref<16x8x16xbf16, #tpu.memory_space<vmem>>, vector<1x8x16xbf16>
    %98 = vector.shape_cast %97 : vector<1x8x16xbf16> to vector<8x16xbf16>
    %cst_88 = arith.constant dense<0.000000e+00> : vector<32x16xf32>
    %99 = tpu.matmul %96, %98, %cst_88 {dimension_numbers = #tpu.dot_dimension_numbers<[1], [0], [0], [1], [0, 0, 1, 1], [], []>} : vector<32x8xbf16>, vector<8x16xbf16>, vector<32x16xf32> -> vector<32x16xf32>
    %100 = arith.addf %92, %99 : vector<32x16xf32>
    %c12 = arith.constant 12 : index
    %c0_89 = arith.constant 0 : index
    %c0_90 = arith.constant 0 : index
    %101 = vector.load %arg2[%c12, %c0_89, %c0_90] : memref<16x32x128xbf16, #tpu.memory_space<vmem>>, vector<1x32x128xbf16>
    %102 = vector.shape_cast %101 : vector<1x32x128xbf16> to vector<32x128xbf16>
    %cst_91 = arith.constant dense<0.000000e+00> : vector<32x8xf32>
    %103 = tpu.matmul %102, %5, %cst_91 {dimension_numbers = #tpu.dot_dimension_numbers<[1], [0], [0], [1], [0, 0, 1, 1], [], []>} : vector<32x128xbf16>, vector<128x8xbf16>, vector<32x8xf32> -> vector<32x8xf32>
    %104 = arith.truncf %103 : vector<32x8xf32> to vector<32x8xbf16>
    %c12_92 = arith.constant 12 : index
    %c0_93 = arith.constant 0 : index
    %c0_94 = arith.constant 0 : index
    %105 = vector.load %arg3[%c12_92, %c0_93, %c0_94] : memref<16x8x16xbf16, #tpu.memory_space<vmem>>, vector<1x8x16xbf16>
    %106 = vector.shape_cast %105 : vector<1x8x16xbf16> to vector<8x16xbf16>
    %cst_95 = arith.constant dense<0.000000e+00> : vector<32x16xf32>
    %107 = tpu.matmul %104, %106, %cst_95 {dimension_numbers = #tpu.dot_dimension_numbers<[1], [0], [0], [1], [0, 0, 1, 1], [], []>} : vector<32x8xbf16>, vector<8x16xbf16>, vector<32x16xf32> -> vector<32x16xf32>
    %108 = arith.addf %100, %107 : vector<32x16xf32>
    %c13 = arith.constant 13 : index
    %c0_96 = arith.constant 0 : index
    %c0_97 = arith.constant 0 : index
    %109 = vector.load %arg2[%c13, %c0_96, %c0_97] : memref<16x32x128xbf16, #tpu.memory_space<vmem>>, vector<1x32x128xbf16>
    %110 = vector.shape_cast %109 : vector<1x32x128xbf16> to vector<32x128xbf16>
    %cst_98 = arith.constant dense<0.000000e+00> : vector<32x8xf32>
    %111 = tpu.matmul %110, %5, %cst_98 {dimension_numbers = #tpu.dot_dimension_numbers<[1], [0], [0], [1], [0, 0, 1, 1], [], []>} : vector<32x128xbf16>, vector<128x8xbf16>, vector<32x8xf32> -> vector<32x8xf32>
    %112 = arith.truncf %111 : vector<32x8xf32> to vector<32x8xbf16>
    %c13_99 = arith.constant 13 : index
    %c0_100 = arith.constant 0 : index
    %c0_101 = arith.constant 0 : index
    %113 = vector.load %arg3[%c13_99, %c0_100, %c0_101] : memref<16x8x16xbf16, #tpu.memory_space<vmem>>, vector<1x8x16xbf16>
    %114 = vector.shape_cast %113 : vector<1x8x16xbf16> to vector<8x16xbf16>
    %cst_102 = arith.constant dense<0.000000e+00> : vector<32x16xf32>
    %115 = tpu.matmul %112, %114, %cst_102 {dimension_numbers = #tpu.dot_dimension_numbers<[1], [0], [0], [1], [0, 0, 1, 1], [], []>} : vector<32x8xbf16>, vector<8x16xbf16>, vector<32x16xf32> -> vector<32x16xf32>
    %116 = arith.addf %108, %115 : vector<32x16xf32>
    %c14 = arith.constant 14 : index
    %c0_103 = arith.constant 0 : index
    %c0_104 = arith.constant 0 : index
    %117 = vector.load %arg2[%c14, %c0_103, %c0_104] : memref<16x32x128xbf16, #tpu.memory_space<vmem>>, vector<1x32x128xbf16>
    %118 = vector.shape_cast %117 : vector<1x32x128xbf16> to vector<32x128xbf16>
    %cst_105 = arith.constant dense<0.000000e+00> : vector<32x8xf32>
    %119 = tpu.matmul %118, %5, %cst_105 {dimension_numbers = #tpu.dot_dimension_numbers<[1], [0], [0], [1], [0, 0, 1, 1], [], []>} : vector<32x128xbf16>, vector<128x8xbf16>, vector<32x8xf32> -> vector<32x8xf32>
    %120 = arith.truncf %119 : vector<32x8xf32> to vector<32x8xbf16>
    %c14_106 = arith.constant 14 : index
    %c0_107 = arith.constant 0 : index
    %c0_108 = arith.constant 0 : index
    %121 = vector.load %arg3[%c14_106, %c0_107, %c0_108] : memref<16x8x16xbf16, #tpu.memory_space<vmem>>, vector<1x8x16xbf16>
    %122 = vector.shape_cast %121 : vector<1x8x16xbf16> to vector<8x16xbf16>
    %cst_109 = arith.constant dense<0.000000e+00> : vector<32x16xf32>
    %123 = tpu.matmul %120, %122, %cst_109 {dimension_numbers = #tpu.dot_dimension_numbers<[1], [0], [0], [1], [0, 0, 1, 1], [], []>} : vector<32x8xbf16>, vector<8x16xbf16>, vector<32x16xf32> -> vector<32x16xf32>
    %124 = arith.addf %116, %123 : vector<32x16xf32>
    %c15 = arith.constant 15 : index
    %c0_110 = arith.constant 0 : index
    %c0_111 = arith.constant 0 : index
    %125 = vector.load %arg2[%c15, %c0_110, %c0_111] : memref<16x32x128xbf16, #tpu.memory_space<vmem>>, vector<1x32x128xbf16>
    %126 = vector.shape_cast %125 : vector<1x32x128xbf16> to vector<32x128xbf16>
    %cst_112 = arith.constant dense<0.000000e+00> : vector<32x8xf32>
    %127 = tpu.matmul %126, %5, %cst_112 {dimension_numbers = #tpu.dot_dimension_numbers<[1], [0], [0], [1], [0, 0, 1, 1], [], []>} : vector<32x128xbf16>, vector<128x8xbf16>, vector<32x8xf32> -> vector<32x8xf32>
    %128 = arith.truncf %127 : vector<32x8xf32> to vector<32x8xbf16>
    %c15_113 = arith.constant 15 : index
    %c0_114 = arith.constant 0 : index
    %c0_115 = arith.constant 0 : index
    %129 = vector.load %arg3[%c15_113, %c0_114, %c0_115] : memref<16x8x16xbf16, #tpu.memory_space<vmem>>, vector<1x8x16xbf16>
    %130 = vector.shape_cast %129 : vector<1x8x16xbf16> to vector<8x16xbf16>
    %cst_116 = arith.constant dense<0.000000e+00> : vector<32x16xf32>
    %131 = tpu.matmul %128, %130, %cst_116 {dimension_numbers = #tpu.dot_dimension_numbers<[1], [0], [0], [1], [0, 0, 1, 1], [], []>} : vector<32x8xbf16>, vector<8x16xbf16>, vector<32x16xf32> -> vector<32x16xf32>
    %132 = arith.addf %124, %131 : vector<32x16xf32>
    %cst_117 = arith.constant dense<0.000000e+00> : vector<16xf32>
    %133 = vector.multi_reduction <add>, %132, %cst_117 [0] : vector<32x16xf32> to vector<16xf32>
    %134 = vector.shape_cast %133 : vector<16xf32> to vector<1x16xf32>
    %cst_118 = arith.constant 3.125000e-02 : f32
    %135 = vector.broadcast %cst_118 : f32 to vector<1x16xf32>
    %136 = arith.mulf %134, %135 : vector<1x16xf32>
    %137 = arith.mulf %132, %132 : vector<32x16xf32>
    %cst_119 = arith.constant dense<0.000000e+00> : vector<16xf32>
    %138 = vector.multi_reduction <add>, %137, %cst_119 [0] : vector<32x16xf32> to vector<16xf32>
    %139 = vector.shape_cast %138 : vector<16xf32> to vector<1x16xf32>
    %cst_120 = arith.constant 3.125000e-02 : f32
    %140 = vector.broadcast %cst_120 : f32 to vector<1x16xf32>
    %141 = arith.mulf %139, %140 : vector<1x16xf32>
    %142 = arith.mulf %136, %136 : vector<1x16xf32>
    %143 = arith.subf %141, %142 : vector<1x16xf32>
    %cst_121 = arith.constant 0.000000e+00 : f32
    %144 = vector.broadcast %cst_121 : f32 to vector<1x16xf32>
    %145 = arith.maximumf %143, %144 : vector<1x16xf32>
    %146 = vector.broadcast %136 : vector<1x16xf32> to vector<32x16xf32>
    %147 = arith.subf %132, %146 : vector<32x16xf32>
    %cst_122 = arith.constant 9.99999974E-6 : f32
    %148 = vector.broadcast %cst_122 : f32 to vector<1x16xf32>
    %149 = arith.addf %145, %148 : vector<1x16xf32>
    %150 = math.rsqrt %149 : vector<1x16xf32>
    %151 = vector.broadcast %150 : vector<1x16xf32> to vector<32x16xf32>
    %152 = arith.mulf %147, %151 : vector<32x16xf32>
    %c0_123 = arith.constant 0 : index
    %c0_124 = arith.constant 0 : index
    %153 = vector.load %arg4[%c0_123, %c0_124] : memref<1x16xf32, #tpu.memory_space<vmem>>, vector<1x16xf32>
    %154 = vector.broadcast %153 : vector<1x16xf32> to vector<32x16xf32>
    %155 = arith.mulf %152, %154 : vector<32x16xf32>
    %c0_125 = arith.constant 0 : index
    %c0_126 = arith.constant 0 : index
    %156 = vector.load %arg5[%c0_125, %c0_126] : memref<1x16xf32, #tpu.memory_space<vmem>>, vector<1x16xf32>
    %157 = vector.broadcast %156 : vector<1x16xf32> to vector<32x16xf32>
    %158 = arith.addf %155, %157 : vector<32x16xf32>
    %cst_127 = arith.constant 0.000000e+00 : f32
    %159 = vector.broadcast %cst_127 : f32 to vector<32x16xf32>
    %160 = arith.maximumf %158, %159 : vector<32x16xf32>
    %161 = arith.truncf %160 : vector<32x16xf32> to vector<32x16xbf16>
    %c0_128 = arith.constant 0 : index
    %c0_129 = arith.constant 0 : index
    %c0_130 = arith.constant 0 : index
    %162 = vector.load %arg6[%c0_128, %c0_129, %c0_130] : memref<16x8x32xbf16, #tpu.memory_space<vmem>>, vector<1x8x32xbf16>
    %163 = vector.shape_cast %162 : vector<1x8x32xbf16> to vector<8x32xbf16>
    %cst_131 = arith.constant dense<0.000000e+00> : vector<8x16xf32>
    %164 = tpu.matmul %163, %161, %cst_131 {dimension_numbers = #tpu.dot_dimension_numbers<[1], [0], [0], [1], [0, 0, 1, 1], [], []>} : vector<8x32xbf16>, vector<32x16xbf16>, vector<8x16xf32> -> vector<8x16xf32>
    %165 = arith.truncf %164 : vector<8x16xf32> to vector<8x16xbf16>
    %c0_132 = arith.constant 0 : index
    %c0_133 = arith.constant 0 : index
    %c0_134 = arith.constant 0 : index
    %166 = vector.load %arg7[%c0_132, %c0_133, %c0_134] : memref<16x16x32xbf16, #tpu.memory_space<vmem>>, vector<1x16x32xbf16>
    %167 = vector.shape_cast %166 : vector<1x16x32xbf16> to vector<16x32xbf16>
    %cst_135 = arith.constant dense<0.000000e+00> : vector<8x32xf32>
    %168 = tpu.matmul %165, %167, %cst_135 {dimension_numbers = #tpu.dot_dimension_numbers<[1], [0], [0], [1], [0, 0, 1, 1], [], []>} : vector<8x16xbf16>, vector<16x32xbf16>, vector<8x32xf32> -> vector<8x32xf32>
    %c1_136 = arith.constant 1 : index
    %c0_137 = arith.constant 0 : index
    %c0_138 = arith.constant 0 : index
    %169 = vector.load %arg6[%c1_136, %c0_137, %c0_138] : memref<16x8x32xbf16, #tpu.memory_space<vmem>>, vector<1x8x32xbf16>
    %170 = vector.shape_cast %169 : vector<1x8x32xbf16> to vector<8x32xbf16>
    %cst_139 = arith.constant dense<0.000000e+00> : vector<8x16xf32>
    %171 = tpu.matmul %170, %161, %cst_139 {dimension_numbers = #tpu.dot_dimension_numbers<[1], [0], [0], [1], [0, 0, 1, 1], [], []>} : vector<8x32xbf16>, vector<32x16xbf16>, vector<8x16xf32> -> vector<8x16xf32>
    %172 = arith.truncf %171 : vector<8x16xf32> to vector<8x16xbf16>
    %c1_140 = arith.constant 1 : index
    %c0_141 = arith.constant 0 : index
    %c0_142 = arith.constant 0 : index
    %173 = vector.load %arg7[%c1_140, %c0_141, %c0_142] : memref<16x16x32xbf16, #tpu.memory_space<vmem>>, vector<1x16x32xbf16>
    %174 = vector.shape_cast %173 : vector<1x16x32xbf16> to vector<16x32xbf16>
    %cst_143 = arith.constant dense<0.000000e+00> : vector<8x32xf32>
    %175 = tpu.matmul %172, %174, %cst_143 {dimension_numbers = #tpu.dot_dimension_numbers<[1], [0], [0], [1], [0, 0, 1, 1], [], []>} : vector<8x16xbf16>, vector<16x32xbf16>, vector<8x32xf32> -> vector<8x32xf32>
    %176 = arith.addf %168, %175 : vector<8x32xf32>
    %c2_144 = arith.constant 2 : index
    %c0_145 = arith.constant 0 : index
    %c0_146 = arith.constant 0 : index
    %177 = vector.load %arg6[%c2_144, %c0_145, %c0_146] : memref<16x8x32xbf16, #tpu.memory_space<vmem>>, vector<1x8x32xbf16>
    %178 = vector.shape_cast %177 : vector<1x8x32xbf16> to vector<8x32xbf16>
    %cst_147 = arith.constant dense<0.000000e+00> : vector<8x16xf32>
    %179 = tpu.matmul %178, %161, %cst_147 {dimension_numbers = #tpu.dot_dimension_numbers<[1], [0], [0], [1], [0, 0, 1, 1], [], []>} : vector<8x32xbf16>, vector<32x16xbf16>, vector<8x16xf32> -> vector<8x16xf32>
    %180 = arith.truncf %179 : vector<8x16xf32> to vector<8x16xbf16>
    %c2_148 = arith.constant 2 : index
    %c0_149 = arith.constant 0 : index
    %c0_150 = arith.constant 0 : index
    %181 = vector.load %arg7[%c2_148, %c0_149, %c0_150] : memref<16x16x32xbf16, #tpu.memory_space<vmem>>, vector<1x16x32xbf16>
    %182 = vector.shape_cast %181 : vector<1x16x32xbf16> to vector<16x32xbf16>
    %cst_151 = arith.constant dense<0.000000e+00> : vector<8x32xf32>
    %183 = tpu.matmul %180, %182, %cst_151 {dimension_numbers = #tpu.dot_dimension_numbers<[1], [0], [0], [1], [0, 0, 1, 1], [], []>} : vector<8x16xbf16>, vector<16x32xbf16>, vector<8x32xf32> -> vector<8x32xf32>
    %184 = arith.addf %176, %183 : vector<8x32xf32>
    %c3_152 = arith.constant 3 : index
    %c0_153 = arith.constant 0 : index
    %c0_154 = arith.constant 0 : index
    %185 = vector.load %arg6[%c3_152, %c0_153, %c0_154] : memref<16x8x32xbf16, #tpu.memory_space<vmem>>, vector<1x8x32xbf16>
    %186 = vector.shape_cast %185 : vector<1x8x32xbf16> to vector<8x32xbf16>
    %cst_155 = arith.constant dense<0.000000e+00> : vector<8x16xf32>
    %187 = tpu.matmul %186, %161, %cst_155 {dimension_numbers = #tpu.dot_dimension_numbers<[1], [0], [0], [1], [0, 0, 1, 1], [], []>} : vector<8x32xbf16>, vector<32x16xbf16>, vector<8x16xf32> -> vector<8x16xf32>
    %188 = arith.truncf %187 : vector<8x16xf32> to vector<8x16xbf16>
    %c3_156 = arith.constant 3 : index
    %c0_157 = arith.constant 0 : index
    %c0_158 = arith.constant 0 : index
    %189 = vector.load %arg7[%c3_156, %c0_157, %c0_158] : memref<16x16x32xbf16, #tpu.memory_space<vmem>>, vector<1x16x32xbf16>
    %190 = vector.shape_cast %189 : vector<1x16x32xbf16> to vector<16x32xbf16>
    %cst_159 = arith.constant dense<0.000000e+00> : vector<8x32xf32>
    %191 = tpu.matmul %188, %190, %cst_159 {dimension_numbers = #tpu.dot_dimension_numbers<[1], [0], [0], [1], [0, 0, 1, 1], [], []>} : vector<8x16xbf16>, vector<16x32xbf16>, vector<8x32xf32> -> vector<8x32xf32>
    %192 = arith.addf %184, %191 : vector<8x32xf32>
    %c4_160 = arith.constant 4 : index
    %c0_161 = arith.constant 0 : index
    %c0_162 = arith.constant 0 : index
    %193 = vector.load %arg6[%c4_160, %c0_161, %c0_162] : memref<16x8x32xbf16, #tpu.memory_space<vmem>>, vector<1x8x32xbf16>
    %194 = vector.shape_cast %193 : vector<1x8x32xbf16> to vector<8x32xbf16>
    %cst_163 = arith.constant dense<0.000000e+00> : vector<8x16xf32>
    %195 = tpu.matmul %194, %161, %cst_163 {dimension_numbers = #tpu.dot_dimension_numbers<[1], [0], [0], [1], [0, 0, 1, 1], [], []>} : vector<8x32xbf16>, vector<32x16xbf16>, vector<8x16xf32> -> vector<8x16xf32>
    %196 = arith.truncf %195 : vector<8x16xf32> to vector<8x16xbf16>
    %c4_164 = arith.constant 4 : index
    %c0_165 = arith.constant 0 : index
    %c0_166 = arith.constant 0 : index
    %197 = vector.load %arg7[%c4_164, %c0_165, %c0_166] : memref<16x16x32xbf16, #tpu.memory_space<vmem>>, vector<1x16x32xbf16>
    %198 = vector.shape_cast %197 : vector<1x16x32xbf16> to vector<16x32xbf16>
    %cst_167 = arith.constant dense<0.000000e+00> : vector<8x32xf32>
    %199 = tpu.matmul %196, %198, %cst_167 {dimension_numbers = #tpu.dot_dimension_numbers<[1], [0], [0], [1], [0, 0, 1, 1], [], []>} : vector<8x16xbf16>, vector<16x32xbf16>, vector<8x32xf32> -> vector<8x32xf32>
    %200 = arith.addf %192, %199 : vector<8x32xf32>
    %c5_168 = arith.constant 5 : index
    %c0_169 = arith.constant 0 : index
    %c0_170 = arith.constant 0 : index
    %201 = vector.load %arg6[%c5_168, %c0_169, %c0_170] : memref<16x8x32xbf16, #tpu.memory_space<vmem>>, vector<1x8x32xbf16>
    %202 = vector.shape_cast %201 : vector<1x8x32xbf16> to vector<8x32xbf16>
    %cst_171 = arith.constant dense<0.000000e+00> : vector<8x16xf32>
    %203 = tpu.matmul %202, %161, %cst_171 {dimension_numbers = #tpu.dot_dimension_numbers<[1], [0], [0], [1], [0, 0, 1, 1], [], []>} : vector<8x32xbf16>, vector<32x16xbf16>, vector<8x16xf32> -> vector<8x16xf32>
    %204 = arith.truncf %203 : vector<8x16xf32> to vector<8x16xbf16>
    %c5_172 = arith.constant 5 : index
    %c0_173 = arith.constant 0 : index
    %c0_174 = arith.constant 0 : index
    %205 = vector.load %arg7[%c5_172, %c0_173, %c0_174] : memref<16x16x32xbf16, #tpu.memory_space<vmem>>, vector<1x16x32xbf16>
    %206 = vector.shape_cast %205 : vector<1x16x32xbf16> to vector<16x32xbf16>
    %cst_175 = arith.constant dense<0.000000e+00> : vector<8x32xf32>
    %207 = tpu.matmul %204, %206, %cst_175 {dimension_numbers = #tpu.dot_dimension_numbers<[1], [0], [0], [1], [0, 0, 1, 1], [], []>} : vector<8x16xbf16>, vector<16x32xbf16>, vector<8x32xf32> -> vector<8x32xf32>
    %208 = arith.addf %200, %207 : vector<8x32xf32>
    %c6_176 = arith.constant 6 : index
    %c0_177 = arith.constant 0 : index
    %c0_178 = arith.constant 0 : index
    %209 = vector.load %arg6[%c6_176, %c0_177, %c0_178] : memref<16x8x32xbf16, #tpu.memory_space<vmem>>, vector<1x8x32xbf16>
    %210 = vector.shape_cast %209 : vector<1x8x32xbf16> to vector<8x32xbf16>
    %cst_179 = arith.constant dense<0.000000e+00> : vector<8x16xf32>
    %211 = tpu.matmul %210, %161, %cst_179 {dimension_numbers = #tpu.dot_dimension_numbers<[1], [0], [0], [1], [0, 0, 1, 1], [], []>} : vector<8x32xbf16>, vector<32x16xbf16>, vector<8x16xf32> -> vector<8x16xf32>
    %212 = arith.truncf %211 : vector<8x16xf32> to vector<8x16xbf16>
    %c6_180 = arith.constant 6 : index
    %c0_181 = arith.constant 0 : index
    %c0_182 = arith.constant 0 : index
    %213 = vector.load %arg7[%c6_180, %c0_181, %c0_182] : memref<16x16x32xbf16, #tpu.memory_space<vmem>>, vector<1x16x32xbf16>
    %214 = vector.shape_cast %213 : vector<1x16x32xbf16> to vector<16x32xbf16>
    %cst_183 = arith.constant dense<0.000000e+00> : vector<8x32xf32>
    %215 = tpu.matmul %212, %214, %cst_183 {dimension_numbers = #tpu.dot_dimension_numbers<[1], [0], [0], [1], [0, 0, 1, 1], [], []>} : vector<8x16xbf16>, vector<16x32xbf16>, vector<8x32xf32> -> vector<8x32xf32>
    %216 = arith.addf %208, %215 : vector<8x32xf32>
    %c7_184 = arith.constant 7 : index
    %c0_185 = arith.constant 0 : index
    %c0_186 = arith.constant 0 : index
    %217 = vector.load %arg6[%c7_184, %c0_185, %c0_186] : memref<16x8x32xbf16, #tpu.memory_space<vmem>>, vector<1x8x32xbf16>
    %218 = vector.shape_cast %217 : vector<1x8x32xbf16> to vector<8x32xbf16>
    %cst_187 = arith.constant dense<0.000000e+00> : vector<8x16xf32>
    %219 = tpu.matmul %218, %161, %cst_187 {dimension_numbers = #tpu.dot_dimension_numbers<[1], [0], [0], [1], [0, 0, 1, 1], [], []>} : vector<8x32xbf16>, vector<32x16xbf16>, vector<8x16xf32> -> vector<8x16xf32>
    %220 = arith.truncf %219 : vector<8x16xf32> to vector<8x16xbf16>
    %c7_188 = arith.constant 7 : index
    %c0_189 = arith.constant 0 : index
    %c0_190 = arith.constant 0 : index
    %221 = vector.load %arg7[%c7_188, %c0_189, %c0_190] : memref<16x16x32xbf16, #tpu.memory_space<vmem>>, vector<1x16x32xbf16>
    %222 = vector.shape_cast %221 : vector<1x16x32xbf16> to vector<16x32xbf16>
    %cst_191 = arith.constant dense<0.000000e+00> : vector<8x32xf32>
    %223 = tpu.matmul %220, %222, %cst_191 {dimension_numbers = #tpu.dot_dimension_numbers<[1], [0], [0], [1], [0, 0, 1, 1], [], []>} : vector<8x16xbf16>, vector<16x32xbf16>, vector<8x32xf32> -> vector<8x32xf32>
    %224 = arith.addf %216, %223 : vector<8x32xf32>
    %c8_192 = arith.constant 8 : index
    %c0_193 = arith.constant 0 : index
    %c0_194 = arith.constant 0 : index
    %225 = vector.load %arg6[%c8_192, %c0_193, %c0_194] : memref<16x8x32xbf16, #tpu.memory_space<vmem>>, vector<1x8x32xbf16>
    %226 = vector.shape_cast %225 : vector<1x8x32xbf16> to vector<8x32xbf16>
    %cst_195 = arith.constant dense<0.000000e+00> : vector<8x16xf32>
    %227 = tpu.matmul %226, %161, %cst_195 {dimension_numbers = #tpu.dot_dimension_numbers<[1], [0], [0], [1], [0, 0, 1, 1], [], []>} : vector<8x32xbf16>, vector<32x16xbf16>, vector<8x16xf32> -> vector<8x16xf32>
    %228 = arith.truncf %227 : vector<8x16xf32> to vector<8x16xbf16>
    %c8_196 = arith.constant 8 : index
    %c0_197 = arith.constant 0 : index
    %c0_198 = arith.constant 0 : index
    %229 = vector.load %arg7[%c8_196, %c0_197, %c0_198] : memref<16x16x32xbf16, #tpu.memory_space<vmem>>, vector<1x16x32xbf16>
    %230 = vector.shape_cast %229 : vector<1x16x32xbf16> to vector<16x32xbf16>
    %cst_199 = arith.constant dense<0.000000e+00> : vector<8x32xf32>
    %231 = tpu.matmul %228, %230, %cst_199 {dimension_numbers = #tpu.dot_dimension_numbers<[1], [0], [0], [1], [0, 0, 1, 1], [], []>} : vector<8x16xbf16>, vector<16x32xbf16>, vector<8x32xf32> -> vector<8x32xf32>
    %232 = arith.addf %224, %231 : vector<8x32xf32>
    %c9_200 = arith.constant 9 : index
    %c0_201 = arith.constant 0 : index
    %c0_202 = arith.constant 0 : index
    %233 = vector.load %arg6[%c9_200, %c0_201, %c0_202] : memref<16x8x32xbf16, #tpu.memory_space<vmem>>, vector<1x8x32xbf16>
    %234 = vector.shape_cast %233 : vector<1x8x32xbf16> to vector<8x32xbf16>
    %cst_203 = arith.constant dense<0.000000e+00> : vector<8x16xf32>
    %235 = tpu.matmul %234, %161, %cst_203 {dimension_numbers = #tpu.dot_dimension_numbers<[1], [0], [0], [1], [0, 0, 1, 1], [], []>} : vector<8x32xbf16>, vector<32x16xbf16>, vector<8x16xf32> -> vector<8x16xf32>
    %236 = arith.truncf %235 : vector<8x16xf32> to vector<8x16xbf16>
    %c9_204 = arith.constant 9 : index
    %c0_205 = arith.constant 0 : index
    %c0_206 = arith.constant 0 : index
    %237 = vector.load %arg7[%c9_204, %c0_205, %c0_206] : memref<16x16x32xbf16, #tpu.memory_space<vmem>>, vector<1x16x32xbf16>
    %238 = vector.shape_cast %237 : vector<1x16x32xbf16> to vector<16x32xbf16>
    %cst_207 = arith.constant dense<0.000000e+00> : vector<8x32xf32>
    %239 = tpu.matmul %236, %238, %cst_207 {dimension_numbers = #tpu.dot_dimension_numbers<[1], [0], [0], [1], [0, 0, 1, 1], [], []>} : vector<8x16xbf16>, vector<16x32xbf16>, vector<8x32xf32> -> vector<8x32xf32>
    %240 = arith.addf %232, %239 : vector<8x32xf32>
    %c10_208 = arith.constant 10 : index
    %c0_209 = arith.constant 0 : index
    %c0_210 = arith.constant 0 : index
    %241 = vector.load %arg6[%c10_208, %c0_209, %c0_210] : memref<16x8x32xbf16, #tpu.memory_space<vmem>>, vector<1x8x32xbf16>
    %242 = vector.shape_cast %241 : vector<1x8x32xbf16> to vector<8x32xbf16>
    %cst_211 = arith.constant dense<0.000000e+00> : vector<8x16xf32>
    %243 = tpu.matmul %242, %161, %cst_211 {dimension_numbers = #tpu.dot_dimension_numbers<[1], [0], [0], [1], [0, 0, 1, 1], [], []>} : vector<8x32xbf16>, vector<32x16xbf16>, vector<8x16xf32> -> vector<8x16xf32>
    %244 = arith.truncf %243 : vector<8x16xf32> to vector<8x16xbf16>
    %c10_212 = arith.constant 10 : index
    %c0_213 = arith.constant 0 : index
    %c0_214 = arith.constant 0 : index
    %245 = vector.load %arg7[%c10_212, %c0_213, %c0_214] : memref<16x16x32xbf16, #tpu.memory_space<vmem>>, vector<1x16x32xbf16>
    %246 = vector.shape_cast %245 : vector<1x16x32xbf16> to vector<16x32xbf16>
    %cst_215 = arith.constant dense<0.000000e+00> : vector<8x32xf32>
    %247 = tpu.matmul %244, %246, %cst_215 {dimension_numbers = #tpu.dot_dimension_numbers<[1], [0], [0], [1], [0, 0, 1, 1], [], []>} : vector<8x16xbf16>, vector<16x32xbf16>, vector<8x32xf32> -> vector<8x32xf32>
    %248 = arith.addf %240, %247 : vector<8x32xf32>
    %c11_216 = arith.constant 11 : index
    %c0_217 = arith.constant 0 : index
    %c0_218 = arith.constant 0 : index
    %249 = vector.load %arg6[%c11_216, %c0_217, %c0_218] : memref<16x8x32xbf16, #tpu.memory_space<vmem>>, vector<1x8x32xbf16>
    %250 = vector.shape_cast %249 : vector<1x8x32xbf16> to vector<8x32xbf16>
    %cst_219 = arith.constant dense<0.000000e+00> : vector<8x16xf32>
    %251 = tpu.matmul %250, %161, %cst_219 {dimension_numbers = #tpu.dot_dimension_numbers<[1], [0], [0], [1], [0, 0, 1, 1], [], []>} : vector<8x32xbf16>, vector<32x16xbf16>, vector<8x16xf32> -> vector<8x16xf32>
    %252 = arith.truncf %251 : vector<8x16xf32> to vector<8x16xbf16>
    %c11_220 = arith.constant 11 : index
    %c0_221 = arith.constant 0 : index
    %c0_222 = arith.constant 0 : index
    %253 = vector.load %arg7[%c11_220, %c0_221, %c0_222] : memref<16x16x32xbf16, #tpu.memory_space<vmem>>, vector<1x16x32xbf16>
    %254 = vector.shape_cast %253 : vector<1x16x32xbf16> to vector<16x32xbf16>
    %cst_223 = arith.constant dense<0.000000e+00> : vector<8x32xf32>
    %255 = tpu.matmul %252, %254, %cst_223 {dimension_numbers = #tpu.dot_dimension_numbers<[1], [0], [0], [1], [0, 0, 1, 1], [], []>} : vector<8x16xbf16>, vector<16x32xbf16>, vector<8x32xf32> -> vector<8x32xf32>
    %256 = arith.addf %248, %255 : vector<8x32xf32>
    %c12_224 = arith.constant 12 : index
    %c0_225 = arith.constant 0 : index
    %c0_226 = arith.constant 0 : index
    %257 = vector.load %arg6[%c12_224, %c0_225, %c0_226] : memref<16x8x32xbf16, #tpu.memory_space<vmem>>, vector<1x8x32xbf16>
    %258 = vector.shape_cast %257 : vector<1x8x32xbf16> to vector<8x32xbf16>
    %cst_227 = arith.constant dense<0.000000e+00> : vector<8x16xf32>
    %259 = tpu.matmul %258, %161, %cst_227 {dimension_numbers = #tpu.dot_dimension_numbers<[1], [0], [0], [1], [0, 0, 1, 1], [], []>} : vector<8x32xbf16>, vector<32x16xbf16>, vector<8x16xf32> -> vector<8x16xf32>
    %260 = arith.truncf %259 : vector<8x16xf32> to vector<8x16xbf16>
    %c12_228 = arith.constant 12 : index
    %c0_229 = arith.constant 0 : index
    %c0_230 = arith.constant 0 : index
    %261 = vector.load %arg7[%c12_228, %c0_229, %c0_230] : memref<16x16x32xbf16, #tpu.memory_space<vmem>>, vector<1x16x32xbf16>
    %262 = vector.shape_cast %261 : vector<1x16x32xbf16> to vector<16x32xbf16>
    %cst_231 = arith.constant dense<0.000000e+00> : vector<8x32xf32>
    %263 = tpu.matmul %260, %262, %cst_231 {dimension_numbers = #tpu.dot_dimension_numbers<[1], [0], [0], [1], [0, 0, 1, 1], [], []>} : vector<8x16xbf16>, vector<16x32xbf16>, vector<8x32xf32> -> vector<8x32xf32>
    %264 = arith.addf %256, %263 : vector<8x32xf32>
    %c13_232 = arith.constant 13 : index
    %c0_233 = arith.constant 0 : index
    %c0_234 = arith.constant 0 : index
    %265 = vector.load %arg6[%c13_232, %c0_233, %c0_234] : memref<16x8x32xbf16, #tpu.memory_space<vmem>>, vector<1x8x32xbf16>
    %266 = vector.shape_cast %265 : vector<1x8x32xbf16> to vector<8x32xbf16>
    %cst_235 = arith.constant dense<0.000000e+00> : vector<8x16xf32>
    %267 = tpu.matmul %266, %161, %cst_235 {dimension_numbers = #tpu.dot_dimension_numbers<[1], [0], [0], [1], [0, 0, 1, 1], [], []>} : vector<8x32xbf16>, vector<32x16xbf16>, vector<8x16xf32> -> vector<8x16xf32>
    %268 = arith.truncf %267 : vector<8x16xf32> to vector<8x16xbf16>
    %c13_236 = arith.constant 13 : index
    %c0_237 = arith.constant 0 : index
    %c0_238 = arith.constant 0 : index
    %269 = vector.load %arg7[%c13_236, %c0_237, %c0_238] : memref<16x16x32xbf16, #tpu.memory_space<vmem>>, vector<1x16x32xbf16>
    %270 = vector.shape_cast %269 : vector<1x16x32xbf16> to vector<16x32xbf16>
    %cst_239 = arith.constant dense<0.000000e+00> : vector<8x32xf32>
    %271 = tpu.matmul %268, %270, %cst_239 {dimension_numbers = #tpu.dot_dimension_numbers<[1], [0], [0], [1], [0, 0, 1, 1], [], []>} : vector<8x16xbf16>, vector<16x32xbf16>, vector<8x32xf32> -> vector<8x32xf32>
    %272 = arith.addf %264, %271 : vector<8x32xf32>
    %c14_240 = arith.constant 14 : index
    %c0_241 = arith.constant 0 : index
    %c0_242 = arith.constant 0 : index
    %273 = vector.load %arg6[%c14_240, %c0_241, %c0_242] : memref<16x8x32xbf16, #tpu.memory_space<vmem>>, vector<1x8x32xbf16>
    %274 = vector.shape_cast %273 : vector<1x8x32xbf16> to vector<8x32xbf16>
    %cst_243 = arith.constant dense<0.000000e+00> : vector<8x16xf32>
    %275 = tpu.matmul %274, %161, %cst_243 {dimension_numbers = #tpu.dot_dimension_numbers<[1], [0], [0], [1], [0, 0, 1, 1], [], []>} : vector<8x32xbf16>, vector<32x16xbf16>, vector<8x16xf32> -> vector<8x16xf32>
    %276 = arith.truncf %275 : vector<8x16xf32> to vector<8x16xbf16>
    %c14_244 = arith.constant 14 : index
    %c0_245 = arith.constant 0 : index
    %c0_246 = arith.constant 0 : index
    %277 = vector.load %arg7[%c14_244, %c0_245, %c0_246] : memref<16x16x32xbf16, #tpu.memory_space<vmem>>, vector<1x16x32xbf16>
    %278 = vector.shape_cast %277 : vector<1x16x32xbf16> to vector<16x32xbf16>
    %cst_247 = arith.constant dense<0.000000e+00> : vector<8x32xf32>
    %279 = tpu.matmul %276, %278, %cst_247 {dimension_numbers = #tpu.dot_dimension_numbers<[1], [0], [0], [1], [0, 0, 1, 1], [], []>} : vector<8x16xbf16>, vector<16x32xbf16>, vector<8x32xf32> -> vector<8x32xf32>
    %280 = arith.addf %272, %279 : vector<8x32xf32>
    %c15_248 = arith.constant 15 : index
    %c0_249 = arith.constant 0 : index
    %c0_250 = arith.constant 0 : index
    %281 = vector.load %arg6[%c15_248, %c0_249, %c0_250] : memref<16x8x32xbf16, #tpu.memory_space<vmem>>, vector<1x8x32xbf16>
    %282 = vector.shape_cast %281 : vector<1x8x32xbf16> to vector<8x32xbf16>
    %cst_251 = arith.constant dense<0.000000e+00> : vector<8x16xf32>
    %283 = tpu.matmul %282, %161, %cst_251 {dimension_numbers = #tpu.dot_dimension_numbers<[1], [0], [0], [1], [0, 0, 1, 1], [], []>} : vector<8x32xbf16>, vector<32x16xbf16>, vector<8x16xf32> -> vector<8x16xf32>
    %284 = arith.truncf %283 : vector<8x16xf32> to vector<8x16xbf16>
    %c15_252 = arith.constant 15 : index
    %c0_253 = arith.constant 0 : index
    %c0_254 = arith.constant 0 : index
    %285 = vector.load %arg7[%c15_252, %c0_253, %c0_254] : memref<16x16x32xbf16, #tpu.memory_space<vmem>>, vector<1x16x32xbf16>
    %286 = vector.shape_cast %285 : vector<1x16x32xbf16> to vector<16x32xbf16>
    %cst_255 = arith.constant dense<0.000000e+00> : vector<8x32xf32>
    %287 = tpu.matmul %284, %286, %cst_255 {dimension_numbers = #tpu.dot_dimension_numbers<[1], [0], [0], [1], [0, 0, 1, 1], [], []>} : vector<8x16xbf16>, vector<16x32xbf16>, vector<8x32xf32> -> vector<8x32xf32>
    %288 = arith.addf %280, %287 : vector<8x32xf32>
    %cst_256 = arith.constant dense<0.000000e+00> : vector<32xf32>
    %289 = vector.multi_reduction <add>, %288, %cst_256 [0] : vector<8x32xf32> to vector<32xf32>
    %290 = vector.shape_cast %289 : vector<32xf32> to vector<1x32xf32>
    %cst_257 = arith.constant 1.250000e-01 : f32
    %291 = vector.broadcast %cst_257 : f32 to vector<1x32xf32>
    %292 = arith.mulf %290, %291 : vector<1x32xf32>
    %293 = arith.mulf %288, %288 : vector<8x32xf32>
    %cst_258 = arith.constant dense<0.000000e+00> : vector<32xf32>
    %294 = vector.multi_reduction <add>, %293, %cst_258 [0] : vector<8x32xf32> to vector<32xf32>
    %295 = vector.shape_cast %294 : vector<32xf32> to vector<1x32xf32>
    %cst_259 = arith.constant 1.250000e-01 : f32
    %296 = vector.broadcast %cst_259 : f32 to vector<1x32xf32>
    %297 = arith.mulf %295, %296 : vector<1x32xf32>
    %298 = arith.mulf %292, %292 : vector<1x32xf32>
    %299 = arith.subf %297, %298 : vector<1x32xf32>
    %cst_260 = arith.constant 0.000000e+00 : f32
    %300 = vector.broadcast %cst_260 : f32 to vector<1x32xf32>
    %301 = arith.maximumf %299, %300 : vector<1x32xf32>
    %302 = vector.broadcast %292 : vector<1x32xf32> to vector<8x32xf32>
    %303 = arith.subf %288, %302 : vector<8x32xf32>
    %cst_261 = arith.constant 9.99999974E-6 : f32
    %304 = vector.broadcast %cst_261 : f32 to vector<1x32xf32>
    %305 = arith.addf %301, %304 : vector<1x32xf32>
    %306 = math.rsqrt %305 : vector<1x32xf32>
    %307 = vector.broadcast %306 : vector<1x32xf32> to vector<8x32xf32>
    %308 = arith.mulf %303, %307 : vector<8x32xf32>
    %c0_262 = arith.constant 0 : index
    %c0_263 = arith.constant 0 : index
    %309 = vector.load %arg8[%c0_262, %c0_263] : memref<1x32xf32, #tpu.memory_space<vmem>>, vector<1x32xf32>
    %310 = vector.broadcast %309 : vector<1x32xf32> to vector<8x32xf32>
    %311 = arith.mulf %308, %310 : vector<8x32xf32>
    %c0_264 = arith.constant 0 : index
    %c0_265 = arith.constant 0 : index
    %312 = vector.load %arg9[%c0_264, %c0_265] : memref<1x32xf32, #tpu.memory_space<vmem>>, vector<1x32xf32>
    %313 = vector.broadcast %312 : vector<1x32xf32> to vector<8x32xf32>
    %314 = arith.addf %311, %313 : vector<8x32xf32>
    %cst_266 = arith.constant 0.000000e+00 : f32
    %315 = vector.broadcast %cst_266 : f32 to vector<8x32xf32>
    %316 = arith.maximumf %314, %315 : vector<8x32xf32>
    %317 = arith.truncf %316 : vector<8x32xf32> to vector<8x32xbf16>
    %c0_267 = arith.constant 0 : index
    %c0_268 = arith.constant 0 : index
    %c0_269 = arith.constant 0 : index
    %318 = vector.load %arg10[%c0_267, %c0_268, %c0_269] : memref<16x2x8xbf16, #tpu.memory_space<vmem>>, vector<1x2x8xbf16>
    %319 = vector.shape_cast %318 : vector<1x2x8xbf16> to vector<2x8xbf16>
    %cst_270 = arith.constant dense<0.000000e+00> : vector<2x32xf32>
    %320 = tpu.matmul %319, %317, %cst_270 {dimension_numbers = #tpu.dot_dimension_numbers<[1], [0], [0], [1], [0, 0, 1, 1], [], []>} : vector<2x8xbf16>, vector<8x32xbf16>, vector<2x32xf32> -> vector<2x32xf32>
    %321 = arith.truncf %320 : vector<2x32xf32> to vector<2x32xbf16>
    %c0_271 = arith.constant 0 : index
    %c0_272 = arith.constant 0 : index
    %c0_273 = arith.constant 0 : index
    %322 = vector.load %arg11[%c0_271, %c0_272, %c0_273] : memref<16x32x64xbf16, #tpu.memory_space<vmem>>, vector<1x32x64xbf16>
    %323 = vector.shape_cast %322 : vector<1x32x64xbf16> to vector<32x64xbf16>
    %cst_274 = arith.constant dense<0.000000e+00> : vector<2x64xf32>
    %324 = tpu.matmul %321, %323, %cst_274 {dimension_numbers = #tpu.dot_dimension_numbers<[1], [0], [0], [1], [0, 0, 1, 1], [], []>} : vector<2x32xbf16>, vector<32x64xbf16>, vector<2x64xf32> -> vector<2x64xf32>
    %c1_275 = arith.constant 1 : index
    %c0_276 = arith.constant 0 : index
    %c0_277 = arith.constant 0 : index
    %325 = vector.load %arg10[%c1_275, %c0_276, %c0_277] : memref<16x2x8xbf16, #tpu.memory_space<vmem>>, vector<1x2x8xbf16>
    %326 = vector.shape_cast %325 : vector<1x2x8xbf16> to vector<2x8xbf16>
    %cst_278 = arith.constant dense<0.000000e+00> : vector<2x32xf32>
    %327 = tpu.matmul %326, %317, %cst_278 {dimension_numbers = #tpu.dot_dimension_numbers<[1], [0], [0], [1], [0, 0, 1, 1], [], []>} : vector<2x8xbf16>, vector<8x32xbf16>, vector<2x32xf32> -> vector<2x32xf32>
    %328 = arith.truncf %327 : vector<2x32xf32> to vector<2x32xbf16>
    %c1_279 = arith.constant 1 : index
    %c0_280 = arith.constant 0 : index
    %c0_281 = arith.constant 0 : index
    %329 = vector.load %arg11[%c1_279, %c0_280, %c0_281] : memref<16x32x64xbf16, #tpu.memory_space<vmem>>, vector<1x32x64xbf16>
    %330 = vector.shape_cast %329 : vector<1x32x64xbf16> to vector<32x64xbf16>
    %cst_282 = arith.constant dense<0.000000e+00> : vector<2x64xf32>
    %331 = tpu.matmul %328, %330, %cst_282 {dimension_numbers = #tpu.dot_dimension_numbers<[1], [0], [0], [1], [0, 0, 1, 1], [], []>} : vector<2x32xbf16>, vector<32x64xbf16>, vector<2x64xf32> -> vector<2x64xf32>
    %332 = arith.addf %324, %331 : vector<2x64xf32>
    %c2_283 = arith.constant 2 : index
    %c0_284 = arith.constant 0 : index
    %c0_285 = arith.constant 0 : index
    %333 = vector.load %arg10[%c2_283, %c0_284, %c0_285] : memref<16x2x8xbf16, #tpu.memory_space<vmem>>, vector<1x2x8xbf16>
    %334 = vector.shape_cast %333 : vector<1x2x8xbf16> to vector<2x8xbf16>
    %cst_286 = arith.constant dense<0.000000e+00> : vector<2x32xf32>
    %335 = tpu.matmul %334, %317, %cst_286 {dimension_numbers = #tpu.dot_dimension_numbers<[1], [0], [0], [1], [0, 0, 1, 1], [], []>} : vector<2x8xbf16>, vector<8x32xbf16>, vector<2x32xf32> -> vector<2x32xf32>
    %336 = arith.truncf %335 : vector<2x32xf32> to vector<2x32xbf16>
    %c2_287 = arith.constant 2 : index
    %c0_288 = arith.constant 0 : index
    %c0_289 = arith.constant 0 : index
    %337 = vector.load %arg11[%c2_287, %c0_288, %c0_289] : memref<16x32x64xbf16, #tpu.memory_space<vmem>>, vector<1x32x64xbf16>
    %338 = vector.shape_cast %337 : vector<1x32x64xbf16> to vector<32x64xbf16>
    %cst_290 = arith.constant dense<0.000000e+00> : vector<2x64xf32>
    %339 = tpu.matmul %336, %338, %cst_290 {dimension_numbers = #tpu.dot_dimension_numbers<[1], [0], [0], [1], [0, 0, 1, 1], [], []>} : vector<2x32xbf16>, vector<32x64xbf16>, vector<2x64xf32> -> vector<2x64xf32>
    %340 = arith.addf %332, %339 : vector<2x64xf32>
    %c3_291 = arith.constant 3 : index
    %c0_292 = arith.constant 0 : index
    %c0_293 = arith.constant 0 : index
    %341 = vector.load %arg10[%c3_291, %c0_292, %c0_293] : memref<16x2x8xbf16, #tpu.memory_space<vmem>>, vector<1x2x8xbf16>
    %342 = vector.shape_cast %341 : vector<1x2x8xbf16> to vector<2x8xbf16>
    %cst_294 = arith.constant dense<0.000000e+00> : vector<2x32xf32>
    %343 = tpu.matmul %342, %317, %cst_294 {dimension_numbers = #tpu.dot_dimension_numbers<[1], [0], [0], [1], [0, 0, 1, 1], [], []>} : vector<2x8xbf16>, vector<8x32xbf16>, vector<2x32xf32> -> vector<2x32xf32>
    %344 = arith.truncf %343 : vector<2x32xf32> to vector<2x32xbf16>
    %c3_295 = arith.constant 3 : index
    %c0_296 = arith.constant 0 : index
    %c0_297 = arith.constant 0 : index
    %345 = vector.load %arg11[%c3_295, %c0_296, %c0_297] : memref<16x32x64xbf16, #tpu.memory_space<vmem>>, vector<1x32x64xbf16>
    %346 = vector.shape_cast %345 : vector<1x32x64xbf16> to vector<32x64xbf16>
    %cst_298 = arith.constant dense<0.000000e+00> : vector<2x64xf32>
    %347 = tpu.matmul %344, %346, %cst_298 {dimension_numbers = #tpu.dot_dimension_numbers<[1], [0], [0], [1], [0, 0, 1, 1], [], []>} : vector<2x32xbf16>, vector<32x64xbf16>, vector<2x64xf32> -> vector<2x64xf32>
    %348 = arith.addf %340, %347 : vector<2x64xf32>
    %c4_299 = arith.constant 4 : index
    %c0_300 = arith.constant 0 : index
    %c0_301 = arith.constant 0 : index
    %349 = vector.load %arg10[%c4_299, %c0_300, %c0_301] : memref<16x2x8xbf16, #tpu.memory_space<vmem>>, vector<1x2x8xbf16>
    %350 = vector.shape_cast %349 : vector<1x2x8xbf16> to vector<2x8xbf16>
    %cst_302 = arith.constant dense<0.000000e+00> : vector<2x32xf32>
    %351 = tpu.matmul %350, %317, %cst_302 {dimension_numbers = #tpu.dot_dimension_numbers<[1], [0], [0], [1], [0, 0, 1, 1], [], []>} : vector<2x8xbf16>, vector<8x32xbf16>, vector<2x32xf32> -> vector<2x32xf32>
    %352 = arith.truncf %351 : vector<2x32xf32> to vector<2x32xbf16>
    %c4_303 = arith.constant 4 : index
    %c0_304 = arith.constant 0 : index
    %c0_305 = arith.constant 0 : index
    %353 = vector.load %arg11[%c4_303, %c0_304, %c0_305] : memref<16x32x64xbf16, #tpu.memory_space<vmem>>, vector<1x32x64xbf16>
    %354 = vector.shape_cast %353 : vector<1x32x64xbf16> to vector<32x64xbf16>
    %cst_306 = arith.constant dense<0.000000e+00> : vector<2x64xf32>
    %355 = tpu.matmul %352, %354, %cst_306 {dimension_numbers = #tpu.dot_dimension_numbers<[1], [0], [0], [1], [0, 0, 1, 1], [], []>} : vector<2x32xbf16>, vector<32x64xbf16>, vector<2x64xf32> -> vector<2x64xf32>
    %356 = arith.addf %348, %355 : vector<2x64xf32>
    %c5_307 = arith.constant 5 : index
    %c0_308 = arith.constant 0 : index
    %c0_309 = arith.constant 0 : index
    %357 = vector.load %arg10[%c5_307, %c0_308, %c0_309] : memref<16x2x8xbf16, #tpu.memory_space<vmem>>, vector<1x2x8xbf16>
    %358 = vector.shape_cast %357 : vector<1x2x8xbf16> to vector<2x8xbf16>
    %cst_310 = arith.constant dense<0.000000e+00> : vector<2x32xf32>
    %359 = tpu.matmul %358, %317, %cst_310 {dimension_numbers = #tpu.dot_dimension_numbers<[1], [0], [0], [1], [0, 0, 1, 1], [], []>} : vector<2x8xbf16>, vector<8x32xbf16>, vector<2x32xf32> -> vector<2x32xf32>
    %360 = arith.truncf %359 : vector<2x32xf32> to vector<2x32xbf16>
    %c5_311 = arith.constant 5 : index
    %c0_312 = arith.constant 0 : index
    %c0_313 = arith.constant 0 : index
    %361 = vector.load %arg11[%c5_311, %c0_312, %c0_313] : memref<16x32x64xbf16, #tpu.memory_space<vmem>>, vector<1x32x64xbf16>
    %362 = vector.shape_cast %361 : vector<1x32x64xbf16> to vector<32x64xbf16>
    %cst_314 = arith.constant dense<0.000000e+00> : vector<2x64xf32>
    %363 = tpu.matmul %360, %362, %cst_314 {dimension_numbers = #tpu.dot_dimension_numbers<[1], [0], [0], [1], [0, 0, 1, 1], [], []>} : vector<2x32xbf16>, vector<32x64xbf16>, vector<2x64xf32> -> vector<2x64xf32>
    %364 = arith.addf %356, %363 : vector<2x64xf32>
    %c6_315 = arith.constant 6 : index
    %c0_316 = arith.constant 0 : index
    %c0_317 = arith.constant 0 : index
    %365 = vector.load %arg10[%c6_315, %c0_316, %c0_317] : memref<16x2x8xbf16, #tpu.memory_space<vmem>>, vector<1x2x8xbf16>
    %366 = vector.shape_cast %365 : vector<1x2x8xbf16> to vector<2x8xbf16>
    %cst_318 = arith.constant dense<0.000000e+00> : vector<2x32xf32>
    %367 = tpu.matmul %366, %317, %cst_318 {dimension_numbers = #tpu.dot_dimension_numbers<[1], [0], [0], [1], [0, 0, 1, 1], [], []>} : vector<2x8xbf16>, vector<8x32xbf16>, vector<2x32xf32> -> vector<2x32xf32>
    %368 = arith.truncf %367 : vector<2x32xf32> to vector<2x32xbf16>
    %c6_319 = arith.constant 6 : index
    %c0_320 = arith.constant 0 : index
    %c0_321 = arith.constant 0 : index
    %369 = vector.load %arg11[%c6_319, %c0_320, %c0_321] : memref<16x32x64xbf16, #tpu.memory_space<vmem>>, vector<1x32x64xbf16>
    %370 = vector.shape_cast %369 : vector<1x32x64xbf16> to vector<32x64xbf16>
    %cst_322 = arith.constant dense<0.000000e+00> : vector<2x64xf32>
    %371 = tpu.matmul %368, %370, %cst_322 {dimension_numbers = #tpu.dot_dimension_numbers<[1], [0], [0], [1], [0, 0, 1, 1], [], []>} : vector<2x32xbf16>, vector<32x64xbf16>, vector<2x64xf32> -> vector<2x64xf32>
    %372 = arith.addf %364, %371 : vector<2x64xf32>
    %c7_323 = arith.constant 7 : index
    %c0_324 = arith.constant 0 : index
    %c0_325 = arith.constant 0 : index
    %373 = vector.load %arg10[%c7_323, %c0_324, %c0_325] : memref<16x2x8xbf16, #tpu.memory_space<vmem>>, vector<1x2x8xbf16>
    %374 = vector.shape_cast %373 : vector<1x2x8xbf16> to vector<2x8xbf16>
    %cst_326 = arith.constant dense<0.000000e+00> : vector<2x32xf32>
    %375 = tpu.matmul %374, %317, %cst_326 {dimension_numbers = #tpu.dot_dimension_numbers<[1], [0], [0], [1], [0, 0, 1, 1], [], []>} : vector<2x8xbf16>, vector<8x32xbf16>, vector<2x32xf32> -> vector<2x32xf32>
    %376 = arith.truncf %375 : vector<2x32xf32> to vector<2x32xbf16>
    %c7_327 = arith.constant 7 : index
    %c0_328 = arith.constant 0 : index
    %c0_329 = arith.constant 0 : index
    %377 = vector.load %arg11[%c7_327, %c0_328, %c0_329] : memref<16x32x64xbf16, #tpu.memory_space<vmem>>, vector<1x32x64xbf16>
    %378 = vector.shape_cast %377 : vector<1x32x64xbf16> to vector<32x64xbf16>
    %cst_330 = arith.constant dense<0.000000e+00> : vector<2x64xf32>
    %379 = tpu.matmul %376, %378, %cst_330 {dimension_numbers = #tpu.dot_dimension_numbers<[1], [0], [0], [1], [0, 0, 1, 1], [], []>} : vector<2x32xbf16>, vector<32x64xbf16>, vector<2x64xf32> -> vector<2x64xf32>
    %380 = arith.addf %372, %379 : vector<2x64xf32>
    %c8_331 = arith.constant 8 : index
    %c0_332 = arith.constant 0 : index
    %c0_333 = arith.constant 0 : index
    %381 = vector.load %arg10[%c8_331, %c0_332, %c0_333] : memref<16x2x8xbf16, #tpu.memory_space<vmem>>, vector<1x2x8xbf16>
    %382 = vector.shape_cast %381 : vector<1x2x8xbf16> to vector<2x8xbf16>
    %cst_334 = arith.constant dense<0.000000e+00> : vector<2x32xf32>
    %383 = tpu.matmul %382, %317, %cst_334 {dimension_numbers = #tpu.dot_dimension_numbers<[1], [0], [0], [1], [0, 0, 1, 1], [], []>} : vector<2x8xbf16>, vector<8x32xbf16>, vector<2x32xf32> -> vector<2x32xf32>
    %384 = arith.truncf %383 : vector<2x32xf32> to vector<2x32xbf16>
    %c8_335 = arith.constant 8 : index
    %c0_336 = arith.constant 0 : index
    %c0_337 = arith.constant 0 : index
    %385 = vector.load %arg11[%c8_335, %c0_336, %c0_337] : memref<16x32x64xbf16, #tpu.memory_space<vmem>>, vector<1x32x64xbf16>
    %386 = vector.shape_cast %385 : vector<1x32x64xbf16> to vector<32x64xbf16>
    %cst_338 = arith.constant dense<0.000000e+00> : vector<2x64xf32>
    %387 = tpu.matmul %384, %386, %cst_338 {dimension_numbers = #tpu.dot_dimension_numbers<[1], [0], [0], [1], [0, 0, 1, 1], [], []>} : vector<2x32xbf16>, vector<32x64xbf16>, vector<2x64xf32> -> vector<2x64xf32>
    %388 = arith.addf %380, %387 : vector<2x64xf32>
    %c9_339 = arith.constant 9 : index
    %c0_340 = arith.constant 0 : index
    %c0_341 = arith.constant 0 : index
    %389 = vector.load %arg10[%c9_339, %c0_340, %c0_341] : memref<16x2x8xbf16, #tpu.memory_space<vmem>>, vector<1x2x8xbf16>
    %390 = vector.shape_cast %389 : vector<1x2x8xbf16> to vector<2x8xbf16>
    %cst_342 = arith.constant dense<0.000000e+00> : vector<2x32xf32>
    %391 = tpu.matmul %390, %317, %cst_342 {dimension_numbers = #tpu.dot_dimension_numbers<[1], [0], [0], [1], [0, 0, 1, 1], [], []>} : vector<2x8xbf16>, vector<8x32xbf16>, vector<2x32xf32> -> vector<2x32xf32>
    %392 = arith.truncf %391 : vector<2x32xf32> to vector<2x32xbf16>
    %c9_343 = arith.constant 9 : index
    %c0_344 = arith.constant 0 : index
    %c0_345 = arith.constant 0 : index
    %393 = vector.load %arg11[%c9_343, %c0_344, %c0_345] : memref<16x32x64xbf16, #tpu.memory_space<vmem>>, vector<1x32x64xbf16>
    %394 = vector.shape_cast %393 : vector<1x32x64xbf16> to vector<32x64xbf16>
    %cst_346 = arith.constant dense<0.000000e+00> : vector<2x64xf32>
    %395 = tpu.matmul %392, %394, %cst_346 {dimension_numbers = #tpu.dot_dimension_numbers<[1], [0], [0], [1], [0, 0, 1, 1], [], []>} : vector<2x32xbf16>, vector<32x64xbf16>, vector<2x64xf32> -> vector<2x64xf32>
    %396 = arith.addf %388, %395 : vector<2x64xf32>
    %c10_347 = arith.constant 10 : index
    %c0_348 = arith.constant 0 : index
    %c0_349 = arith.constant 0 : index
    %397 = vector.load %arg10[%c10_347, %c0_348, %c0_349] : memref<16x2x8xbf16, #tpu.memory_space<vmem>>, vector<1x2x8xbf16>
    %398 = vector.shape_cast %397 : vector<1x2x8xbf16> to vector<2x8xbf16>
    %cst_350 = arith.constant dense<0.000000e+00> : vector<2x32xf32>
    %399 = tpu.matmul %398, %317, %cst_350 {dimension_numbers = #tpu.dot_dimension_numbers<[1], [0], [0], [1], [0, 0, 1, 1], [], []>} : vector<2x8xbf16>, vector<8x32xbf16>, vector<2x32xf32> -> vector<2x32xf32>
    %400 = arith.truncf %399 : vector<2x32xf32> to vector<2x32xbf16>
    %c10_351 = arith.constant 10 : index
    %c0_352 = arith.constant 0 : index
    %c0_353 = arith.constant 0 : index
    %401 = vector.load %arg11[%c10_351, %c0_352, %c0_353] : memref<16x32x64xbf16, #tpu.memory_space<vmem>>, vector<1x32x64xbf16>
    %402 = vector.shape_cast %401 : vector<1x32x64xbf16> to vector<32x64xbf16>
    %cst_354 = arith.constant dense<0.000000e+00> : vector<2x64xf32>
    %403 = tpu.matmul %400, %402, %cst_354 {dimension_numbers = #tpu.dot_dimension_numbers<[1], [0], [0], [1], [0, 0, 1, 1], [], []>} : vector<2x32xbf16>, vector<32x64xbf16>, vector<2x64xf32> -> vector<2x64xf32>
    %404 = arith.addf %396, %403 : vector<2x64xf32>
    %c11_355 = arith.constant 11 : index
    %c0_356 = arith.constant 0 : index
    %c0_357 = arith.constant 0 : index
    %405 = vector.load %arg10[%c11_355, %c0_356, %c0_357] : memref<16x2x8xbf16, #tpu.memory_space<vmem>>, vector<1x2x8xbf16>
    %406 = vector.shape_cast %405 : vector<1x2x8xbf16> to vector<2x8xbf16>
    %cst_358 = arith.constant dense<0.000000e+00> : vector<2x32xf32>
    %407 = tpu.matmul %406, %317, %cst_358 {dimension_numbers = #tpu.dot_dimension_numbers<[1], [0], [0], [1], [0, 0, 1, 1], [], []>} : vector<2x8xbf16>, vector<8x32xbf16>, vector<2x32xf32> -> vector<2x32xf32>
    %408 = arith.truncf %407 : vector<2x32xf32> to vector<2x32xbf16>
    %c11_359 = arith.constant 11 : index
    %c0_360 = arith.constant 0 : index
    %c0_361 = arith.constant 0 : index
    %409 = vector.load %arg11[%c11_359, %c0_360, %c0_361] : memref<16x32x64xbf16, #tpu.memory_space<vmem>>, vector<1x32x64xbf16>
    %410 = vector.shape_cast %409 : vector<1x32x64xbf16> to vector<32x64xbf16>
    %cst_362 = arith.constant dense<0.000000e+00> : vector<2x64xf32>
    %411 = tpu.matmul %408, %410, %cst_362 {dimension_numbers = #tpu.dot_dimension_numbers<[1], [0], [0], [1], [0, 0, 1, 1], [], []>} : vector<2x32xbf16>, vector<32x64xbf16>, vector<2x64xf32> -> vector<2x64xf32>
    %412 = arith.addf %404, %411 : vector<2x64xf32>
    %c12_363 = arith.constant 12 : index
    %c0_364 = arith.constant 0 : index
    %c0_365 = arith.constant 0 : index
    %413 = vector.load %arg10[%c12_363, %c0_364, %c0_365] : memref<16x2x8xbf16, #tpu.memory_space<vmem>>, vector<1x2x8xbf16>
    %414 = vector.shape_cast %413 : vector<1x2x8xbf16> to vector<2x8xbf16>
    %cst_366 = arith.constant dense<0.000000e+00> : vector<2x32xf32>
    %415 = tpu.matmul %414, %317, %cst_366 {dimension_numbers = #tpu.dot_dimension_numbers<[1], [0], [0], [1], [0, 0, 1, 1], [], []>} : vector<2x8xbf16>, vector<8x32xbf16>, vector<2x32xf32> -> vector<2x32xf32>
    %416 = arith.truncf %415 : vector<2x32xf32> to vector<2x32xbf16>
    %c12_367 = arith.constant 12 : index
    %c0_368 = arith.constant 0 : index
    %c0_369 = arith.constant 0 : index
    %417 = vector.load %arg11[%c12_367, %c0_368, %c0_369] : memref<16x32x64xbf16, #tpu.memory_space<vmem>>, vector<1x32x64xbf16>
    %418 = vector.shape_cast %417 : vector<1x32x64xbf16> to vector<32x64xbf16>
    %cst_370 = arith.constant dense<0.000000e+00> : vector<2x64xf32>
    %419 = tpu.matmul %416, %418, %cst_370 {dimension_numbers = #tpu.dot_dimension_numbers<[1], [0], [0], [1], [0, 0, 1, 1], [], []>} : vector<2x32xbf16>, vector<32x64xbf16>, vector<2x64xf32> -> vector<2x64xf32>
    %420 = arith.addf %412, %419 : vector<2x64xf32>
    %c13_371 = arith.constant 13 : index
    %c0_372 = arith.constant 0 : index
    %c0_373 = arith.constant 0 : index
    %421 = vector.load %arg10[%c13_371, %c0_372, %c0_373] : memref<16x2x8xbf16, #tpu.memory_space<vmem>>, vector<1x2x8xbf16>
    %422 = vector.shape_cast %421 : vector<1x2x8xbf16> to vector<2x8xbf16>
    %cst_374 = arith.constant dense<0.000000e+00> : vector<2x32xf32>
    %423 = tpu.matmul %422, %317, %cst_374 {dimension_numbers = #tpu.dot_dimension_numbers<[1], [0], [0], [1], [0, 0, 1, 1], [], []>} : vector<2x8xbf16>, vector<8x32xbf16>, vector<2x32xf32> -> vector<2x32xf32>
    %424 = arith.truncf %423 : vector<2x32xf32> to vector<2x32xbf16>
    %c13_375 = arith.constant 13 : index
    %c0_376 = arith.constant 0 : index
    %c0_377 = arith.constant 0 : index
    %425 = vector.load %arg11[%c13_375, %c0_376, %c0_377] : memref<16x32x64xbf16, #tpu.memory_space<vmem>>, vector<1x32x64xbf16>
    %426 = vector.shape_cast %425 : vector<1x32x64xbf16> to vector<32x64xbf16>
    %cst_378 = arith.constant dense<0.000000e+00> : vector<2x64xf32>
    %427 = tpu.matmul %424, %426, %cst_378 {dimension_numbers = #tpu.dot_dimension_numbers<[1], [0], [0], [1], [0, 0, 1, 1], [], []>} : vector<2x32xbf16>, vector<32x64xbf16>, vector<2x64xf32> -> vector<2x64xf32>
    %428 = arith.addf %420, %427 : vector<2x64xf32>
    %c14_379 = arith.constant 14 : index
    %c0_380 = arith.constant 0 : index
    %c0_381 = arith.constant 0 : index
    %429 = vector.load %arg10[%c14_379, %c0_380, %c0_381] : memref<16x2x8xbf16, #tpu.memory_space<vmem>>, vector<1x2x8xbf16>
    %430 = vector.shape_cast %429 : vector<1x2x8xbf16> to vector<2x8xbf16>
    %cst_382 = arith.constant dense<0.000000e+00> : vector<2x32xf32>
    %431 = tpu.matmul %430, %317, %cst_382 {dimension_numbers = #tpu.dot_dimension_numbers<[1], [0], [0], [1], [0, 0, 1, 1], [], []>} : vector<2x8xbf16>, vector<8x32xbf16>, vector<2x32xf32> -> vector<2x32xf32>
    %432 = arith.truncf %431 : vector<2x32xf32> to vector<2x32xbf16>
    %c14_383 = arith.constant 14 : index
    %c0_384 = arith.constant 0 : index
    %c0_385 = arith.constant 0 : index
    %433 = vector.load %arg11[%c14_383, %c0_384, %c0_385] : memref<16x32x64xbf16, #tpu.memory_space<vmem>>, vector<1x32x64xbf16>
    %434 = vector.shape_cast %433 : vector<1x32x64xbf16> to vector<32x64xbf16>
    %cst_386 = arith.constant dense<0.000000e+00> : vector<2x64xf32>
    %435 = tpu.matmul %432, %434, %cst_386 {dimension_numbers = #tpu.dot_dimension_numbers<[1], [0], [0], [1], [0, 0, 1, 1], [], []>} : vector<2x32xbf16>, vector<32x64xbf16>, vector<2x64xf32> -> vector<2x64xf32>
    %436 = arith.addf %428, %435 : vector<2x64xf32>
    %c15_387 = arith.constant 15 : index
    %c0_388 = arith.constant 0 : index
    %c0_389 = arith.constant 0 : index
    %437 = vector.load %arg10[%c15_387, %c0_388, %c0_389] : memref<16x2x8xbf16, #tpu.memory_space<vmem>>, vector<1x2x8xbf16>
    %438 = vector.shape_cast %437 : vector<1x2x8xbf16> to vector<2x8xbf16>
    %cst_390 = arith.constant dense<0.000000e+00> : vector<2x32xf32>
    %439 = tpu.matmul %438, %317, %cst_390 {dimension_numbers = #tpu.dot_dimension_numbers<[1], [0], [0], [1], [0, 0, 1, 1], [], []>} : vector<2x8xbf16>, vector<8x32xbf16>, vector<2x32xf32> -> vector<2x32xf32>
    %440 = arith.truncf %439 : vector<2x32xf32> to vector<2x32xbf16>
    %c15_391 = arith.constant 15 : index
    %c0_392 = arith.constant 0 : index
    %c0_393 = arith.constant 0 : index
    %441 = vector.load %arg11[%c15_391, %c0_392, %c0_393] : memref<16x32x64xbf16, #tpu.memory_space<vmem>>, vector<1x32x64xbf16>
    %442 = vector.shape_cast %441 : vector<1x32x64xbf16> to vector<32x64xbf16>
    %cst_394 = arith.constant dense<0.000000e+00> : vector<2x64xf32>
    %443 = tpu.matmul %440, %442, %cst_394 {dimension_numbers = #tpu.dot_dimension_numbers<[1], [0], [0], [1], [0, 0, 1, 1], [], []>} : vector<2x32xbf16>, vector<32x64xbf16>, vector<2x64xf32> -> vector<2x64xf32>
    %444 = arith.addf %436, %443 : vector<2x64xf32>
    %cst_395 = arith.constant dense<0.000000e+00> : vector<64xf32>
    %445 = vector.multi_reduction <add>, %444, %cst_395 [0] : vector<2x64xf32> to vector<64xf32>
    %446 = vector.shape_cast %445 : vector<64xf32> to vector<1x64xf32>
    %cst_396 = arith.constant 5.000000e-01 : f32
    %447 = vector.broadcast %cst_396 : f32 to vector<1x64xf32>
    %448 = arith.mulf %446, %447 : vector<1x64xf32>
    %449 = arith.mulf %444, %444 : vector<2x64xf32>
    %cst_397 = arith.constant dense<0.000000e+00> : vector<64xf32>
    %450 = vector.multi_reduction <add>, %449, %cst_397 [0] : vector<2x64xf32> to vector<64xf32>
    %451 = vector.shape_cast %450 : vector<64xf32> to vector<1x64xf32>
    %cst_398 = arith.constant 5.000000e-01 : f32
    %452 = vector.broadcast %cst_398 : f32 to vector<1x64xf32>
    %453 = arith.mulf %451, %452 : vector<1x64xf32>
    %454 = arith.mulf %448, %448 : vector<1x64xf32>
    %455 = arith.subf %453, %454 : vector<1x64xf32>
    %cst_399 = arith.constant 0.000000e+00 : f32
    %456 = vector.broadcast %cst_399 : f32 to vector<1x64xf32>
    %457 = arith.maximumf %455, %456 : vector<1x64xf32>
    %458 = vector.broadcast %448 : vector<1x64xf32> to vector<2x64xf32>
    %459 = arith.subf %444, %458 : vector<2x64xf32>
    %cst_400 = arith.constant 9.99999974E-6 : f32
    %460 = vector.broadcast %cst_400 : f32 to vector<1x64xf32>
    %461 = arith.addf %457, %460 : vector<1x64xf32>
    %462 = math.rsqrt %461 : vector<1x64xf32>
    %463 = vector.broadcast %462 : vector<1x64xf32> to vector<2x64xf32>
    %464 = arith.mulf %459, %463 : vector<2x64xf32>
    %c0_401 = arith.constant 0 : index
    %c0_402 = arith.constant 0 : index
    %465 = vector.load %arg12[%c0_401, %c0_402] : memref<1x64xf32, #tpu.memory_space<vmem>>, vector<1x64xf32>
    %466 = vector.broadcast %465 : vector<1x64xf32> to vector<2x64xf32>
    %467 = arith.mulf %464, %466 : vector<2x64xf32>
    %c0_403 = arith.constant 0 : index
    %c0_404 = arith.constant 0 : index
    %468 = vector.load %arg13[%c0_403, %c0_404] : memref<1x64xf32, #tpu.memory_space<vmem>>, vector<1x64xf32>
    %469 = vector.broadcast %468 : vector<1x64xf32> to vector<2x64xf32>
    %470 = arith.addf %467, %469 : vector<2x64xf32>
    %cst_405 = arith.constant 0.000000e+00 : f32
    %471 = vector.broadcast %cst_405 : f32 to vector<2x64xf32>
    %472 = arith.maximumf %470, %471 : vector<2x64xf32>
    %473 = arith.truncf %472 : vector<2x64xf32> to vector<2x64xbf16>
    %c0_406 = arith.constant 0 : index
    %c0_407 = arith.constant 0 : index
    %474 = vector.load %arg14[%c0_406, %c0_407] : memref<64x10xbf16, #tpu.memory_space<vmem>>, vector<64x10xbf16>
    %cst_408 = arith.constant dense<0.000000e+00> : vector<2x10xf32>
    %475 = tpu.matmul %473, %474, %cst_408 {dimension_numbers = #tpu.dot_dimension_numbers<[1], [0], [0], [1], [0, 0, 1, 1], [], []>} : vector<2x64xbf16>, vector<64x10xbf16>, vector<2x10xf32> -> vector<2x10xf32>
    %c0_409 = arith.constant 0 : index
    %c0_410 = arith.constant 0 : index
    %476 = vector.load %arg15[%c0_409, %c0_410] : memref<1x10xf32, #tpu.memory_space<vmem>>, vector<1x10xf32>
    %477 = vector.broadcast %476 : vector<1x10xf32> to vector<2x10xf32>
    %478 = arith.addf %475, %477 : vector<2x10xf32>
    %c0_411 = arith.constant 0 : index
    %c0_412 = arith.constant 0 : index
    %479 = vector.load %arg16[%c0_411, %c0_412] : memref<2x10xf32, #tpu.memory_space<vmem>>, vector<2x10xf32>
    tpu.vector_store %arg16[%c0_411, %c0_412], %478 {strides = array<i32>} : memref<2x10xf32, #tpu.memory_space<vmem>>, vector<2x10xf32>,
    return
  }
}

</mosaic_0001>

<bundles_post_ra>
// kernel: encoder_forward.1
= control target key start
LH: loop header
LB: loop body
LE: loop exit
PB: predicated region body
PF: predicated region fallthrough
CT: control target
= control target key end

     0   :  { %s9503_s0 = inlined_call_operand.vmem [shape: bf16[128,16], index: 0, kind: input, shape index: {}]   ;;  %s9504_s1 = inlined_call_operand.vmem [shape: bf16[16,8], index: 1, kind: input, shape index: {}]   ;;  %s9505_s2 = inlined_call_operand.vmem [shape: bf16[16,32,128], index: 2, kind: input, shape index: {}]   ;;  %s9506_s3 = inlined_call_operand.vmem [shape: bf16[16,8,16], index: 3, kind: input, shape index: {}]   ;;  %s9507_s4 = inlined_call_operand.hbm [shape: f32[1,16], index: 4, kind: input, shape index: {}]   ;;  %s9508_s5 = inlined_call_operand.hbm [shape: f32[1,16], index: 5, kind: input, shape index: {}]   ;;  %s9509_s6 = inlined_call_operand.vmem [shape: bf16[16,8,32], index: 6, kind: input, shape index: {}]   ;;  %s9510_s7 = inlined_call_operand.hbm [shape: bf16[16,16,32], index: 7, kind: input, shape index: {}]   ;;  %s9511_s8 = inlined_call_operand.hbm [shape: f32[1,32], index: 8, kind: input, shape index: {}]   ;;  %s9512_s9 = inlined_call_operand.hbm [shape: f32[1,32], index: 9, kind: input, shape index: {}]   ;;  %s9513_s10 = inlined_call_operand.vmem [shape: bf16[16,2,8], index: 10, kind: input, shape index: {}]   ;;  %s9514_s11 = inlined_call_operand.vmem [shape: bf16[16,32,64], index: 11, kind: input, shape index: {}]   ;;  %s9515_s12 = inlined_call_operand.hbm [shape: f32[1,64], index: 12, kind: input, shape index: {}]   ;;  %s9516_s13 = inlined_call_operand.hbm [shape: f32[1,64], index: 13, kind: input, shape index: {}]   ;;  %s9517_s14 = inlined_call_operand.vmem [shape: bf16[64,10], index: 14, kind: input, shape index: {}]   ;;  %s9518_s15 = inlined_call_operand.hbm [shape: f32[1,10], index: 15, kind: input, shape index: {}]   ;;  %s9519_s16 = inlined_call_operand.hbm [shape: f32[2,10], index: 16, kind: output, shape index: {}]  }
   0x1   :  { %9521 = sst [smem:[#allocation23_spill]] %s9503_s0 }
   0x2   :  { %21 = vsyncpa [#allocation3], 0 }
   0x3   :  { %22 = vsyncpa [#allocation6], 0 }
   0x4   :  { %23 = vsyncpa [#allocation9], 0 }
   0x5   :  { %24 = vsyncpa [#allocation12], 0 }
   0x6   :  { %25 = vsyncpa [#allocation15], 0 }
   0x7   :  { %26 = vsyncpa [#allocation4], 0  ;;  %s8182_s21 = smov [#allocation5]   ;;  %s8183_s23 = smov [#allocation8]  }
   0x8   :  { %s51_s22 = sshll.u32 %s8182_s21, 4  ;;  %s75_s24 = sshll.u32 %s8183_s23, 4  ;;  %s52_s22 = int_to_ptr.vmem [resolvable:$true] %s51_s22  ;;  %s76_s24 = int_to_ptr.vmem [resolvable:$true] %s75_s24 }
   0x9   :  { %s7972_s27 = scalar_lea.hbm %s9508_s5, 16 }
   0xa   :  { %p7973_p0 = scmp.ne.s32.totalorder %s9508_s5, %s7972_s27  ;;  %p7976_p1 = scmp.lt.u32.totalorder %s7972_s27, %s9508_s5 }
   0xc   :  { %p7978_p2 = pnand %p7976_p1, %p7973_p0 }
   0xe   :  { %7981 = shalt.err (!%p7978_p2)
}
   0xf   :  { %s7982_s17 = scalar_lea.vmem %s52_s22, 16  ;;  %s7986_s18 = scalar_lea.vmem %s52_s22, 32 }
  0x10   :  { %p7983_p3 = scmp.ne.s32.totalorder %s52_s22, %s7982_s17  ;;  %p7987_p4 = scmp.lt.s32.totalorder %s52_s22, %s52_s22 }
  0x11   :  { %p7988_p5 = scmp.lt.s32.totalorder %s7986_s18, %s7982_s17 }
  0x13   :  { %p7989_p6 = por %p7988_p5, %p7987_p4 }
  0x15   :  { %p7990_p7 = pnand %p7989_p6, %p7983_p3 }
  0x17   :  { %7993 = shalt.err (!%p7990_p7)
}
  0x18   :  { %54 = dma.hbm_to_vmem [thread:$0]  %s9508_s5, 16, %s52_s22, [#allocation6]  }
  0x19   :  { %s7994_s25 = scalar_lea.hbm %s9511_s8, 16 }
  0x1a   :  { %p7995_p8 = scmp.ne.s32.totalorder %s9511_s8, %s7994_s25  ;;  %p7998_p9 = scmp.lt.u32.totalorder %s7994_s25, %s9511_s8 }
  0x1c   :  { %p8000_p10 = pnand %p7998_p9, %p7995_p8 }
  0x1e   :  { %8003 = shalt.err (!%p8000_p10)
}
  0x1f   :  { %s8004_s30 = scalar_lea.vmem %s76_s24, 16  ;;  %s8008_s0 = scalar_lea.vmem %s76_s24, 32 }
  0x20   :  { %p8005_p11 = scmp.ne.s32.totalorder %s76_s24, %s8004_s30  ;;  %p8009_p12 = scmp.lt.s32.totalorder %s76_s24, %s76_s24 }
  0x21   :  { %p8010_p13 = scmp.lt.s32.totalorder %s8008_s0, %s8004_s30 }
  0x23   :  { %p8011_p0 = por %p8010_p13, %p8009_p12 }
  0x25   :  { %p8012_p1 = pnand %p8011_p0, %p8005_p11 }
  0x27   :  { %8015 = shalt.err (!%p8012_p1)
}
  0x28   :  { %78 = dma.hbm_to_vmem [thread:$0]  %s9511_s8, 16, %s76_s24, [#allocation9]  }
  0x29   :  { %s8184_s17 = smov [#allocation11]   ;;  %s8185_s19 = smov [#allocation2]  }
  0x2a   :  { %s99_s18 = sshll.u32 %s8184_s17, 4  ;;  %s41_s20 = sshll.u32 %s8185_s19, 4  ;;  %s100_s18 = int_to_ptr.vmem [resolvable:$true] %s99_s18  ;;  %s42_s20 = int_to_ptr.vmem [resolvable:$true] %s41_s20 }
  0x2b   :  { %s8016_s25 = scalar_lea.hbm %s9515_s12, 16 }
  0x2c   :  { %p8017_p2 = scmp.ne.s32.totalorder %s9515_s12, %s8016_s25  ;;  %p8020_p3 = scmp.lt.u32.totalorder %s8016_s25, %s9515_s12 }
  0x2e   :  { %p8022_p4 = pnand %p8020_p3, %p8017_p2 }
  0x30   :  { %8025 = shalt.err (!%p8022_p4)
}
  0x31   :  { %s8026_s8 = scalar_lea.vmem %s100_s18, 16  ;;  %s8030_s24 = scalar_lea.vmem %s100_s18, 32 }
  0x32   :  { %p8027_p5 = scmp.ne.s32.totalorder %s100_s18, %s8026_s8  ;;  %p8031_p6 = scmp.lt.s32.totalorder %s100_s18, %s100_s18 }
  0x33   :  { %p8032_p7 = scmp.lt.s32.totalorder %s8030_s24, %s8026_s8 }
  0x35   :  { %p8033_p8 = por %p8032_p7, %p8031_p6 }
  0x37   :  { %p8034_p9 = pnand %p8033_p8, %p8027_p5 }
  0x39   :  { %8037 = shalt.err (!%p8034_p9)
}
  0x3a   :  { %102 = dma.hbm_to_vmem [thread:$0]  %s9515_s12, 16, %s100_s18, [#allocation12]  }
  0x3b   :  { %s8038_s17 = scalar_lea.hbm %s9507_s4, 16 }
  0x3c   :  { %p8039_p10 = scmp.ne.s32.totalorder %s9507_s4, %s8038_s17  ;;  %p8042_p11 = scmp.lt.u32.totalorder %s8038_s17, %s9507_s4 }
  0x3e   :  { %p8044_p12 = pnand %p8042_p11, %p8039_p10 }
  0x40   :  { %8047 = shalt.err (!%p8044_p12)
}
  0x41   :  { %s8048_s26 = scalar_lea.vmem %s42_s20, 16  ;;  %s8052_s27 = scalar_lea.vmem %s42_s20, 32 }
  0x42   :  { %p8049_p13 = scmp.ne.s32.totalorder %s42_s20, %s8048_s26  ;;  %p8053_p0 = scmp.lt.s32.totalorder %s42_s20, %s42_s20 }
  0x43   :  { %p8054_p1 = scmp.lt.s32.totalorder %s8052_s27, %s8048_s26 }
  0x45   :  { %p8055_p2 = por %p8054_p1, %p8053_p0 }
  0x47   :  { %p8056_p3 = pnand %p8055_p2, %p8049_p13 }
  0x49   :  { %8059 = shalt.err (!%p8056_p3)
}
  0x4a   :  { %44 = dma.hbm_to_vmem [thread:$0]  %s9507_s4, 16, %s42_s20, [#allocation3]  }
  0x4b   :  { %s8186_s28 = smov [#allocation7]   ;;  %s8060_s30 = scalar_lea.hbm %s9510_s7, 2048 }
  0x4c   :  { %s62_s29 = sshll.u32 %s8186_s28, 4  ;;  %p8061_p4 = scmp.ne.s32.totalorder %s9510_s7, %s8060_s30  ;;  %s63_s29 = int_to_ptr.vmem [resolvable:$true] %s62_s29 }
  0x4d   :  { %p8064_p5 = scmp.lt.u32.totalorder %s8060_s30, %s9510_s7 }
  0x4f   :  { %p8066_p6 = pnand %p8064_p5, %p8061_p4 }
  0x51   :  { %8069 = shalt.err (!%p8066_p6)
}
  0x52   :  { %s8070_s19 = scalar_lea.vmem %s63_s29, 2048  ;;  %p8075_p8 = scmp.lt.s32.totalorder %s63_s29, %s63_s29 }
  0x53   :  { %p8071_p7 = scmp.ne.s32.totalorder %s63_s29, %s8070_s19  ;;  %p8076_p9 = scmp.lt.s32.totalorder %s8070_s19, %s8070_s19 }
  0x55   :  { %p8077_p10 = por %p8076_p9, %p8075_p8 }
  0x57   :  { %p8078_p11 = pnand %p8077_p10, %p8071_p7 }
  0x59   :  { %8081 = shalt.err (!%p8078_p11)
}
  0x5a   :  { %s8187_s4 = smov 64   ;;  %s8188_s20 = smov 4  }
  0x5b   :  { %68 = dma.hbm_to_vmem [thread:$0]  %s9510_s7, 2048, %s63_s29, [#allocation6], %s8187_s4, %s8187_s4, %s8188_s20  }
  0x5c   :  { %s8189_s25 = smov [#allocation10]   ;;  %s8190_s27 = smov [#allocation13]  }
  0x5d   :  { %s85_s26 = sshll.u32 %s8189_s25, 4  ;;  %s109_s12 = sshll.u32 %s8190_s27, 4  ;;  %s86_s26 = int_to_ptr.vmem [resolvable:$true] %s85_s26  ;;  %s110_s12 = int_to_ptr.vmem [resolvable:$true] %s109_s12 }
  0x5e   :  { %s8082_s8 = scalar_lea.hbm %s9512_s9, 16 }
  0x5f   :  { %p8083_p12 = scmp.ne.s32.totalorder %s9512_s9, %s8082_s8  ;;  %p8086_p13 = scmp.lt.u32.totalorder %s8082_s8, %s9512_s9 }
  0x61   :  { %p8088_p0 = pnand %p8086_p13, %p8083_p12 }
  0x63   :  { %8091 = shalt.err (!%p8088_p0)
}
  0x64   :  { %s8092_s7 = scalar_lea.vmem %s86_s26, 16  ;;  %s8096_s29 = scalar_lea.vmem %s86_s26, 32 }
  0x65   :  { %p8093_p1 = scmp.ne.s32.totalorder %s86_s26, %s8092_s7  ;;  %p8097_p2 = scmp.lt.s32.totalorder %s86_s26, %s86_s26 }
  0x66   :  { %p8098_p3 = scmp.lt.s32.totalorder %s8096_s29, %s8092_s7 }
  0x68   :  { %p8099_p4 = por %p8098_p3, %p8097_p2 }
  0x6a   :  { %p8100_p5 = pnand %p8099_p4, %p8093_p1 }
  0x6c   :  { %8103 = shalt.err (!%p8100_p5)
}
  0x6d   :  { %88 = dma.hbm_to_vmem [thread:$0]  %s9512_s9, 16, %s86_s26, [#allocation9]  }
  0x6e   :  { %s8104_s20 = scalar_lea.hbm %s9516_s13, 16 }
  0x6f   :  { %p8105_p6 = scmp.ne.s32.totalorder %s9516_s13, %s8104_s20  ;;  %p8108_p7 = scmp.lt.u32.totalorder %s8104_s20, %s9516_s13 }
  0x71   :  { %p8110_p8 = pnand %p8108_p7, %p8105_p6 }
  0x73   :  { %8113 = shalt.err (!%p8110_p8)
}
  0x74   :  { %s8114_s18 = scalar_lea.vmem %s110_s12, 16  ;;  %s8118_s28 = scalar_lea.vmem %s110_s12, 32 }
  0x75   :  { %p8115_p9 = scmp.ne.s32.totalorder %s110_s12, %s8114_s18  ;;  %p8119_p10 = scmp.lt.s32.totalorder %s110_s12, %s110_s12 }
  0x76   :  { %p8120_p11 = scmp.lt.s32.totalorder %s8118_s28, %s8114_s18 }
  0x78   :  { %p8121_p12 = por %p8120_p11, %p8119_p10 }
  0x7a   :  { %p8122_p13 = pnand %p8121_p12, %p8115_p9 }
  0x7c   :  { %8125 = shalt.err (!%p8122_p13)
}
  0x7d   :  { %112 = dma.hbm_to_vmem [thread:$0]  %s9516_s13, 16, %s110_s12, [#allocation12]  }
  0x7e   :  { %s8191_s8 = smov [#allocation14]   ;;  %s8126_s5 = scalar_lea.hbm %s9518_s15, 16 }
  0x7f   :  { %s121_s24 = sshll.u32 %s8191_s8, 4  ;;  %p8127_p0 = scmp.ne.s32.totalorder %s9518_s15, %s8126_s5  ;;  %s122_s24 = int_to_ptr.vmem [resolvable:$true] %s121_s24 }
  0x80   :  { %p8130_p1 = scmp.lt.u32.totalorder %s8126_s5, %s9518_s15 }
  0x82   :  { %p8132_p2 = pnand %p8130_p1, %p8127_p0 }
  0x84   :  { %8135 = shalt.err (!%p8132_p2)
}
  0x85   :  { %s8136_s19 = scalar_lea.vmem %s122_s24, 16  ;;  %s8140_s13 = scalar_lea.vmem %s122_s24, 32 }
  0x86   :  { %p8137_p3 = scmp.ne.s32.totalorder %s122_s24, %s8136_s19  ;;  %p8141_p4 = scmp.lt.s32.totalorder %s122_s24, %s122_s24 }
  0x87   :  { %p8142_p5 = scmp.lt.s32.totalorder %s8140_s13, %s8136_s19 }
  0x89   :  { %p8143_p6 = por %p8142_p5, %p8141_p4 }
  0x8b   :  { %p8144_p7 = pnand %p8143_p6, %p8137_p3 }
  0x8d   :  { %8147 = shalt.err (!%p8144_p7)
}
  0x8e   :  { %124 = dma.hbm_to_vmem [thread:$0]  %s9518_s15, 16, %s122_s24, [#allocation15]  }
  0x8f   :  { %8170 = dma.done.wait [#allocation3], 16  }
  0x90   :  { %8171 = vsyncadd [#allocation3], 4294967280 }
  0x91   :  { %8172 = dma.done.wait [#allocation6], 2064  }
  0x92   :  { %8173 = vsyncadd [#allocation6], 4294965232 }
  0x93   :  { %8174 = dma.done.wait [#allocation9], 32  }
  0x94   :  { %8175 = vsyncadd [#allocation9], 4294967264 }
  0x95   :  { %8176 = dma.done.wait [#allocation12], 32  }
  0x96   :  { %8177 = vsyncadd [#allocation12], 4294967264 }
  0x97   :  { %8178 = dma.done.wait [#allocation15], 16  }
  0x98   :  { %8179 = vsyncadd [#allocation15], 4294967280  ;;  %v7873_v0 = vld [vmem:[%s9504_s1] sm:$0xff]   ;;  %vm214_vm0 = vcmask 130048   ;;  %s9522_s27 = sld [smem:[#allocation23_spill]]  ;;  %v7882_v9 = vld [vmem:[%s9505_s2 + $0x10] sm:$0xff]  }
  0x99   :  { %6770 = vmatprep.subr.bf16.mxu0 %v7873_v0  ;;  %v7884_v10 = vld [vmem:[%s9505_s2] sm:$0xff]   ;;  %v7883_v51 = vld [vmem:[%s9505_s2 + $0x18] sm:$0xff]   ;;  %v7885_v52 = vld [vmem:[%s9505_s2 + $0x8] sm:$0xff]   ;;  %vm505_vm1 = vcmask 1043456   ;;  %vm498_vm2 = vcmask 64512   ;;  %vm8193_vm3 = vmmov 0  }
  0x9a   :  { %6771 = vmatpush3.bf16.msra.mxu0 %v7873_v0  ;;  %6804 = vmatprep.mubr.bf16.mxu1 %v7884_v10  ;;  %v7886_v53 = vld [vmem:[%s9505_s2 + $0x20] sm:$0xff]   ;;  %v7887_v54 = vld [vmem:[%s9505_s2 + $0x28] sm:$0xff]   ;;  %v7890_v57 = vld [vmem:[%s9505_s2 + $0x50] sm:$0xff]   ;;  %vm2538_vm4 = vcmask 261120   ;;  %vm5871_vm5 = vcmask 517120   ;;  %vm5953_vm6 = vcmask 523264  }
  0x9b   :  { %v7888_v55 = vld [vmem:[%s9505_s2 + $0x40] sm:$0xff]   ;;  %v7889_v56 = vld [vmem:[%s9505_s2 + $0x48] sm:$0xff]   ;;  %v7891_v60 = vld [vmem:[%s9505_s2 + $0x58] sm:$0xff]   ;;  %vm5997_vm7 = vcmask 74752  }
  0x9c   :  { %v6043_v58 = vld [vmem:[%s9506_s3 + $0x4] sm:$0xf]  ;;  %v7892_v61 = vld [vmem:[%s9505_s2 + $0x70] sm:$0xff]   ;;  %v8549_v62 = vld [vmem:[%s9506_s3] sm:$0xf] }
  0x9d   :  { %v507_v59 = vsel %vm505_vm1, %v6043_v58, 0  ;;  %v7893_v63 = vld [vmem:[%s9505_s2 + $0x78] sm:$0xff]   ;;  %v7894_v0 = vld [vmem:[%s9505_s2 + $0x90] sm:$0xff]  }
  0x9e   :  { %v7874_v1 = vld [vmem:[%s9522_s27] sm:$0xff]   ;;  %v7875_v2 = vld [vmem:[%s9522_s27 + $0x8] sm:$0xff]   ;;  %v7876_v3 = vld [vmem:[%s9522_s27 + $0x10] sm:$0xff]  }
  0x9f   :  { %6772 = vmatprep.mubr.msk.bf16.mxu0 %vm214_vm0, %v7874_v1  ;;  %v7877_v4 = vld [vmem:[%s9522_s27 + $0x18] sm:$0xff]   ;;  %v7878_v5 = vld [vmem:[%s9522_s27 + $0x20] sm:$0xff]   ;;  %v7879_v6 = vld [vmem:[%s9522_s27 + $0x28] sm:$0xff]  }
  0xa0   :  { %6773 = vmatmul.mubr.msk.bf16.vlgmr.msra.gmra.mrb[0].mxu0 %vm214_vm0, %v7875_v2  ;;  %v7880_v7 = vld [vmem:[%s9522_s27 + $0x30] sm:$0xff]   ;;  %v7881_v8 = vld [vmem:[%s9522_s27 + $0x38] sm:$0xff]   ;;  %v7896_v2 = vld [vmem:[%s9505_s2 + $0xa0] sm:$0xff]  }
  0xa1   :  { %6776 = vmatprep.mubr.msk.bf16.mxu0 %vm214_vm0, %v7876_v3  ;;  %v7895_v1 = vld [vmem:[%s9505_s2 + $0x98] sm:$0xff]   ;;  %v7897_v3 = vld [vmem:[%s9505_s2 + $0xa8] sm:$0xff]  }
  0xa8   :  { %6777 = vmatmul.mubr.msk.bf16.gmra.mrb[4].mxu0 %vm214_vm0, %v7877_v4  ;;  %v7898_v4 = vld [vmem:[%s9505_s2 + $0xc0] sm:$0xff]  }
  0xa9   :  { %6780 = vmatprep.mubr.msk.bf16.mxu0 %vm214_vm0, %v7878_v5 }
  0xb0   :  { %6781 = vmatmul.mubr.msk.bf16.gmra.mrb[8].mxu0 %vm214_vm0, %v7879_v6 }
  0xb1   :  { %6784 = vmatprep.mubr.msk.bf16.mxu0 %vm214_vm0, %v7880_v7 }
  0xb8   :  { %6785 = vmatmul.mubr.msk.bf16.gmra.mrb[12].mxu0 %vm214_vm0, %v7881_v8 }
  0xb9   :  { %6824 = vmatprep.mubr.bf16.mxu0 %v7882_v9 }
 0x173   :  { %v6774_v11 = vpop.f32.mrb[0].mxu0 }
 0x174   :  { %v273_v12 = vpop.f32.mrb[1].mxu0  ;;  %v338_v14 = vmax.f32 %v6774_v11, 0.0 }
 0x175   :  { %v6775_v13 = vpop.f32.mrb[2].mxu0  ;;  %v336_v17 = vmax.f32 %v273_v12, 0.0 }
 0x176   :  { %v339_v15 = vmax.f32 %v6775_v13, 0.0  ;;  %v276_v16 = vpop.f32.mrb[3].mxu0 }
 0x177   :  { %v337_v18 = vmax.f32 %v276_v16, 0.0 }
 0x178   :  { %v8417_v19 = vpack.c.bf16 %v339_v15, %v338_v14 }
 0x179   :  { %v8419_v20 = vpack.c.bf16 %v337_v18, %v336_v17  ;;  %v565_v17 = vsel %vm505_vm1, %v8549_v62, 0  ;;  %v6054_v18 = vld [vmem:[%s9506_s3 + $0x8] sm:$0xf] }
 0x17b   :  { %v6778_v21 = vpop.f32.mrb[4].mxu0  ;;  %6788 = vmatprep.subr.bf16.mxu1 %v8419_v20  ;;  %6808 = vmatprep.subr.bf16.mxu0 %v8419_v20 }
 0x17c   :  { %v289_v22 = vpop.f32.mrb[5].mxu0  ;;  %6789 = vmatpush3.bf16.msra.mxu1 %v8419_v20  ;;  %6809 = vmatpush3.bf16.msra.mxu0 %v8419_v20  ;;  %v342_v24 = vmax.f32 %v6778_v21, 0.0  ;;  %v7899_v21 = vld [vmem:[%s9505_s2 + $0xc8] sm:$0xff]  }
 0x17d   :  { %v6779_v23 = vpop.f32.mrb[6].mxu0  ;;  %6790 = vmatprep.subr.bf16.mxu1 %v8417_v19  ;;  %6810 = vmatprep.subr.bf16.mxu0 %v8417_v19  ;;  %v340_v27 = vmax.f32 %v289_v22, 0.0  ;;  %v7900_v22 = vld [vmem:[%s9505_s2 + $0xd0] sm:$0xff]  }
 0x17e   :  { %v343_v25 = vmax.f32 %v6779_v23, 0.0  ;;  %v292_v26 = vpop.f32.mrb[7].mxu0  ;;  %v693_v23 = vsel %vm505_vm1, %v6054_v18, 0 }
 0x17f   :  { %v341_v28 = vmax.f32 %v292_v26, 0.0 }
 0x180   :  { %v8427_v29 = vpack.c.bf16 %v343_v25, %v342_v24  ;;  %6791 = vmatpush3.bf16.msra.mxu1 %v8417_v19  ;;  %6811 = vmatpush3.bf16.msra.mxu0 %v8417_v19 }
 0x181   :  { %v8431_v30 = vpack.c.bf16 %v341_v28, %v340_v27 }
 0x183   :  { %v6782_v31 = vpop.f32.mrb[8].mxu0  ;;  %6792 = vmatprep.subr.bf16.mxu1 %v8431_v30  ;;  %6812 = vmatprep.subr.bf16.mxu0 %v8431_v30 }
 0x184   :  { %v305_v32 = vpop.f32.mrb[9].mxu0  ;;  %6793 = vmatpush3.bf16.msra.mxu1 %v8431_v30  ;;  %6813 = vmatpush3.bf16.msra.mxu0 %v8431_v30  ;;  %v346_v34 = vmax.f32 %v6782_v31, 0.0 }
 0x185   :  { %v6783_v33 = vpop.f32.mrb[10].mxu0  ;;  %6794 = vmatprep.subr.bf16.mxu1 %v8427_v29  ;;  %6814 = vmatprep.subr.bf16.mxu0 %v8427_v29  ;;  %v344_v37 = vmax.f32 %v305_v32, 0.0  ;;  %v7902_v32 = vld [vmem:[%s9505_s2 + $0x30] sm:$0xff]  }
 0x186   :  { %v347_v35 = vmax.f32 %v6783_v33, 0.0  ;;  %v308_v36 = vpop.f32.mrb[11].mxu0  ;;  %v7901_v33 = vld [vmem:[%s9505_s2 + $0xd8] sm:$0xff]  }
 0x187   :  { %v345_v38 = vmax.f32 %v308_v36, 0.0 }
 0x188   :  { %v8439_v39 = vpack.c.bf16 %v347_v35, %v346_v34  ;;  %6795 = vmatpush3.bf16.msra.mxu1 %v8427_v29  ;;  %6815 = vmatpush3.bf16.msra.mxu0 %v8427_v29 }
 0x189   :  { %v8443_v40 = vpack.c.bf16 %v345_v38, %v344_v37  ;;  %v7903_v37 = vld [vmem:[%s9505_s2 + $0x38] sm:$0xff]  }
 0x18b   :  { %v6786_v41 = vpop.f32.mrb[12].mxu0  ;;  %6796 = vmatprep.subr.bf16.mxu1 %v8443_v40  ;;  %6816 = vmatprep.subr.bf16.mxu0 %v8443_v40 }
 0x18c   :  { %v321_v42 = vpop.f32.mrb[13].mxu0  ;;  %6797 = vmatpush3.bf16.msra.mxu1 %v8443_v40  ;;  %6817 = vmatpush3.bf16.msra.mxu0 %v8443_v40  ;;  %v350_v44 = vmax.f32 %v6786_v41, 0.0 }
 0x18d   :  { %v6787_v43 = vpop.f32.mrb[14].mxu0  ;;  %6798 = vmatprep.subr.bf16.mxu1 %v8439_v39  ;;  %6818 = vmatprep.subr.bf16.mxu0 %v8439_v39  ;;  %v348_v47 = vmax.f32 %v321_v42, 0.0 }
 0x18e   :  { %v351_v45 = vmax.f32 %v6787_v43, 0.0  ;;  %v324_v46 = vpop.f32.mrb[15].mxu0  ;;  %v6063_v43 = vld [vmem:[%s9506_s3 + $0xc] sm:$0xf] }
 0x18f   :  { %v349_v48 = vmax.f32 %v324_v46, 0.0 }
 0x190   :  { %v8451_v49 = vpack.c.bf16 %v351_v45, %v350_v44  ;;  %6799 = vmatpush3.bf16.msra.mxu1 %v8439_v39  ;;  %6819 = vmatpush3.bf16.msra.mxu0 %v8439_v39  ;;  %v825_v44 = vsel %vm505_vm1, %v6063_v43, 0  ;;  %v6072_v45 = vld [vmem:[%s9506_s3 + $0x10] sm:$0xf] }
 0x191   :  { %v8455_v50 = vpack.c.bf16 %v349_v48, %v348_v47 }
 0x193   :  { %6800 = vmatprep.subr.bf16.mxu1 %v8455_v50  ;;  %6820 = vmatprep.subr.bf16.mxu0 %v8455_v50 }
 0x194   :  { %6801 = vmatpush3.bf16.msra.mxu1 %v8455_v50  ;;  %6821 = vmatpush3.bf16.msra.mxu0 %v8455_v50 }
 0x195   :  { %6802 = vmatprep.subr.bf16.mxu1 %v8451_v49  ;;  %6822 = vmatprep.subr.bf16.mxu0 %v8451_v49 }
 0x198   :  { %6803 = vmatpush3.bf16.msra.mxu1 %v8451_v49  ;;  %6823 = vmatpush3.bf16.msra.mxu0 %v8451_v49 }
 0x199   :  { %6840 = vmatprep.subr.bf16.mxu0 %v8419_v20  ;;  %7844 = vmatprep.subr.msk.bf16.mxu1 %vm505_vm1, %v6043_v58 }
 0x19b   :  { %6825 = vmatmul.mubr.bf16.vlgmr.msra.gmra.mrb[16].mxu0 %v7883_v51  ;;  %6805 = vmatmul.mubr.bf16.vlgmr.msra.gmra.mrb[0].mxu1 %v7885_v52 }
 0x19c   :  { %6841 = vmatpush3.bf16.msra.mxu0 %v8419_v20  ;;  %6856 = vmatprep.mubr.bf16.mxu0 %v7886_v53 }
 0x19d   :  { %6842 = vmatprep.subr.bf16.mxu0 %v8417_v19  ;;  %6829 = vmatpush3.bf16.msra.mxu1 %v507_v59 }
 0x19e   :  { %7845 = vmatprep.subr.msk.bf16.mxu1 %vm505_vm1, %v8549_v62 }
 0x1a0   :  { %6843 = vmatpush3.bf16.msra.mxu0 %v8417_v19 }
 0x1a1   :  { %6844 = vmatprep.subr.bf16.mxu0 %v8431_v30 }
 0x1a4   :  { %6845 = vmatpush3.bf16.msra.mxu0 %v8431_v30 }
 0x1a5   :  { %6846 = vmatprep.subr.bf16.mxu0 %v8427_v29 }
 0x1a8   :  { %6847 = vmatpush3.bf16.msra.mxu0 %v8427_v29 }
 0x1a9   :  { %6848 = vmatprep.subr.bf16.mxu0 %v8443_v40 }
 0x1ac   :  { %6849 = vmatpush3.bf16.msra.mxu0 %v8443_v40 }
 0x1ad   :  { %6850 = vmatprep.subr.bf16.mxu0 %v8439_v39 }
 0x1b0   :  { %6851 = vmatpush3.bf16.msra.mxu0 %v8439_v39 }
 0x1b1   :  { %6852 = vmatprep.subr.bf16.mxu0 %v8455_v50 }
 0x1b4   :  { %6853 = vmatpush3.bf16.msra.mxu0 %v8455_v50 }
 0x1b5   :  { %6854 = vmatprep.subr.bf16.mxu0 %v8451_v49 }
 0x1b8   :  { %6855 = vmatpush3.bf16.msra.mxu0 %v8451_v49 }
 0x1b9   :  { %6892 = vmatprep.subr.bf16.mxu0 %v8419_v20 }
 0x1bb   :  { %6857 = vmatmul.mubr.bf16.vlgmr.msra.gmra.mrb[20].mxu0 %v7887_v54 }
 0x1bc   :  { %6893 = vmatpush3.bf16.msra.mxu0 %v8419_v20  ;;  %6908 = vmatprep.mubr.bf16.mxu0 %v7888_v55 }
 0x1bd   :  { %6894 = vmatprep.subr.bf16.mxu0 %v8417_v19 }
 0x1c0   :  { %6895 = vmatpush3.bf16.msra.mxu0 %v8417_v19 }
 0x1c1   :  { %6896 = vmatprep.subr.bf16.mxu0 %v8431_v30 }
 0x1c4   :  { %6897 = vmatpush3.bf16.msra.mxu0 %v8431_v30 }
 0x1c5   :  { %6898 = vmatprep.subr.bf16.mxu0 %v8427_v29 }
 0x1c8   :  { %6899 = vmatpush3.bf16.msra.mxu0 %v8427_v29 }
 0x1c9   :  { %6900 = vmatprep.subr.bf16.mxu0 %v8443_v40 }
 0x1cc   :  { %6901 = vmatpush3.bf16.msra.mxu0 %v8443_v40 }
 0x1cd   :  { %6902 = vmatprep.subr.bf16.mxu0 %v8439_v39 }
 0x1d0   :  { %6903 = vmatpush3.bf16.msra.mxu0 %v8439_v39 }
 0x1d1   :  { %6904 = vmatprep.subr.bf16.mxu0 %v8455_v50 }
 0x1d4   :  { %6905 = vmatpush3.bf16.msra.mxu0 %v8455_v50 }
 0x1d5   :  { %6906 = vmatprep.subr.bf16.mxu0 %v8451_v49 }
 0x1d8   :  { %6907 = vmatpush3.bf16.msra.mxu0 %v8451_v49 }
 0x1d9   :  { %6918 = vmatprep.subr.bf16.mxu0 %v8419_v20 }
 0x1db   :  { %6909 = vmatmul.mubr.bf16.vlgmr.msra.gmra.mrb[24].mxu0 %v7889_v56 }
 0x1dc   :  { %6919 = vmatpush3.bf16.msra.mxu0 %v8419_v20  ;;  %6934 = vmatprep.mubr.bf16.mxu0 %v7890_v57 }
 0x1dd   :  { %6920 = vmatprep.subr.bf16.mxu0 %v8417_v19 }
 0x1e0   :  { %6921 = vmatpush3.bf16.msra.mxu0 %v8417_v19 }
 0x1e1   :  { %6922 = vmatprep.subr.bf16.mxu0 %v8431_v30 }
 0x1e4   :  { %6923 = vmatpush3.bf16.msra.mxu0 %v8431_v30 }
 0x1e5   :  { %6924 = vmatprep.subr.bf16.mxu0 %v8427_v29 }
 0x1e8   :  { %6925 = vmatpush3.bf16.msra.mxu0 %v8427_v29 }
 0x1e9   :  { %6926 = vmatprep.subr.bf16.mxu0 %v8443_v40 }
 0x1ec   :  { %6927 = vmatpush3.bf16.msra.mxu0 %v8443_v40 }
 0x1ed   :  { %6928 = vmatprep.subr.bf16.mxu0 %v8439_v39 }
 0x1f0   :  { %6929 = vmatpush3.bf16.msra.mxu0 %v8439_v39 }
 0x1f1   :  { %6930 = vmatprep.subr.bf16.mxu0 %v8455_v50 }
 0x1f4   :  { %6931 = vmatpush3.bf16.msra.mxu0 %v8455_v50 }
 0x1f5   :  { %6932 = vmatprep.subr.bf16.mxu0 %v8451_v49 }
 0x1f8   :  { %6933 = vmatpush3.bf16.msra.mxu0 %v8451_v49 }
 0x1f9   :  { %6970 = vmatprep.subr.bf16.mxu0 %v8419_v20 }
 0x1fb   :  { %6935 = vmatmul.mubr.bf16.vlgmr.msra.gmra.mrb[28].mxu0 %v7891_v60  ;;  %v957_v60 = vsel %vm505_vm1, %v6072_v45, 0 }
 0x1fc   :  { %6971 = vmatpush3.bf16.msra.mxu0 %v8419_v20  ;;  %6986 = vmatprep.mubr.bf16.mxu0 %v7892_v61  ;;  %v6081_v61 = vld [vmem:[%s9506_s3 + $0x14] sm:$0xf] }
 0x1fd   :  { %6972 = vmatprep.subr.bf16.mxu0 %v8417_v19  ;;  %v1089_v62 = vsel %vm505_vm1, %v6081_v61, 0 }
 0x200   :  { %6973 = vmatpush3.bf16.msra.mxu0 %v8417_v19 }
 0x201   :  { %6974 = vmatprep.subr.bf16.mxu0 %v8431_v30 }
 0x204   :  { %6975 = vmatpush3.bf16.msra.mxu0 %v8431_v30 }
 0x205   :  { %6976 = vmatprep.subr.bf16.mxu0 %v8427_v29 }
 0x208   :  { %6977 = vmatpush3.bf16.msra.mxu0 %v8427_v29 }
 0x209   :  { %6978 = vmatprep.subr.bf16.mxu0 %v8443_v40 }
 0x20c   :  { %6979 = vmatpush3.bf16.msra.mxu0 %v8443_v40 }
 0x20d   :  { %6980 = vmatprep.subr.bf16.mxu0 %v8439_v39 }
 0x210   :  { %6981 = vmatpush3.bf16.msra.mxu0 %v8439_v39 }
 0x211   :  { %6982 = vmatprep.subr.bf16.mxu0 %v8455_v50 }
 0x214   :  { %6983 = vmatpush3.bf16.msra.mxu0 %v8455_v50 }
 0x215   :  { %6984 = vmatprep.subr.bf16.mxu0 %v8451_v49 }
 0x218   :  { %6985 = vmatpush3.bf16.msra.mxu0 %v8451_v49 }
 0x219   :  { %7022 = vmatprep.subr.bf16.mxu0 %v8419_v20 }
 0x21b   :  { %6987 = vmatmul.mubr.bf16.vlgmr.msra.gmra.mrb[32].mxu0 %v7893_v63  ;;  %v7904_v63 = vld [vmem:[%s9505_s2 + $0x60] sm:$0xff]  }
 0x21c   :  { %7023 = vmatpush3.bf16.msra.mxu0 %v8419_v20  ;;  %7038 = vmatprep.mubr.bf16.mxu0 %v7894_v0  ;;  %v7905_v0 = vld [vmem:[%s9505_s2 + $0x68] sm:$0xff]  }
 0x21d   :  { %7024 = vmatprep.subr.bf16.mxu0 %v8417_v19 }
 0x220   :  { %7025 = vmatpush3.bf16.msra.mxu0 %v8417_v19 }
 0x221   :  { %7026 = vmatprep.subr.bf16.mxu0 %v8431_v30 }
 0x224   :  { %7027 = vmatpush3.bf16.msra.mxu0 %v8431_v30 }
 0x225   :  { %7028 = vmatprep.subr.bf16.mxu0 %v8427_v29 }
 0x228   :  { %7029 = vmatpush3.bf16.msra.mxu0 %v8427_v29 }
 0x229   :  { %7030 = vmatprep.subr.bf16.mxu0 %v8443_v40 }
 0x22c   :  { %7031 = vmatpush3.bf16.msra.mxu0 %v8443_v40 }
 0x22d   :  { %7032 = vmatprep.subr.bf16.mxu0 %v8439_v39 }
 0x230   :  { %7033 = vmatpush3.bf16.msra.mxu0 %v8439_v39 }
 0x231   :  { %7034 = vmatprep.subr.bf16.mxu0 %v8455_v50 }
 0x234   :  { %7035 = vmatpush3.bf16.msra.mxu0 %v8455_v50 }
 0x235   :  { %7036 = vmatprep.subr.bf16.mxu0 %v8451_v49 }
 0x238   :  { %7037 = vmatpush3.bf16.msra.mxu0 %v8451_v49 }
 0x239   :  { %7048 = vmatprep.subr.bf16.mxu0 %v8419_v20 }
 0x23b   :  { %7039 = vmatmul.mubr.bf16.vlgmr.msra.gmra.mrb[36].mxu0 %v7895_v1  ;;  %v6090_v1 = vld [vmem:[%s9506_s3 + $0x18] sm:$0xf] }
 0x23c   :  { %7049 = vmatpush3.bf16.msra.mxu0 %v8419_v20  ;;  %7064 = vmatprep.mubr.bf16.mxu0 %v7896_v2  ;;  %v1221_v2 = vsel %vm505_vm1, %v6090_v1, 0 }
 0x23d   :  { %7050 = vmatprep.subr.bf16.mxu0 %v8417_v19 }
 0x240   :  { %7051 = vmatpush3.bf16.msra.mxu0 %v8417_v19 }
 0x241   :  { %7052 = vmatprep.subr.bf16.mxu0 %v8431_v30 }
 0x244   :  { %7053 = vmatpush3.bf16.msra.mxu0 %v8431_v30 }
 0x245   :  { %7054 = vmatprep.subr.bf16.mxu0 %v8427_v29 }
 0x248   :  { %7055 = vmatpush3.bf16.msra.mxu0 %v8427_v29 }
 0x249   :  { %7056 = vmatprep.subr.bf16.mxu0 %v8443_v40 }
 0x24c   :  { %7057 = vmatpush3.bf16.msra.mxu0 %v8443_v40 }
 0x24d   :  { %7058 = vmatprep.subr.bf16.mxu0 %v8439_v39 }
 0x250   :  { %7059 = vmatpush3.bf16.msra.mxu0 %v8439_v39 }
 0x251   :  { %7060 = vmatprep.subr.bf16.mxu0 %v8455_v50 }
 0x254   :  { %7061 = vmatpush3.bf16.msra.mxu0 %v8455_v50 }
 0x255   :  { %7062 = vmatprep.subr.bf16.mxu0 %v8451_v49 }
 0x258   :  { %7063 = vmatpush3.bf16.msra.mxu0 %v8451_v49 }
 0x259   :  { %7100 = vmatprep.subr.bf16.mxu0 %v8419_v20 }
 0x25b   :  { %7065 = vmatmul.mubr.bf16.vlgmr.msra.gmra.mrb[40].mxu0 %v7897_v3  ;;  %v6099_v3 = vld [vmem:[%s9506_s3 + $0x1c] sm:$0xf] }
 0x25c   :  { %7101 = vmatpush3.bf16.msra.mxu0 %v8419_v20  ;;  %7116 = vmatprep.mubr.bf16.mxu0 %v7898_v4 }
 0x25d   :  { %7102 = vmatprep.subr.bf16.mxu0 %v8417_v19 }
 0x260   :  { %7103 = vmatpush3.bf16.msra.mxu0 %v8417_v19 }
 0x261   :  { %7104 = vmatprep.subr.bf16.mxu0 %v8431_v30 }
 0x264   :  { %7105 = vmatpush3.bf16.msra.mxu0 %v8431_v30 }
 0x265   :  { %7106 = vmatprep.subr.bf16.mxu0 %v8427_v29 }
 0x268   :  { %7107 = vmatpush3.bf16.msra.mxu0 %v8427_v29 }
 0x269   :  { %7108 = vmatprep.subr.bf16.mxu0 %v8443_v40 }
 0x26c   :  { %7109 = vmatpush3.bf16.msra.mxu0 %v8443_v40 }
 0x26d   :  { %7110 = vmatprep.subr.bf16.mxu0 %v8439_v39 }
 0x26e   :  { %v6826_v5 = vpop.f32.mrb[16].mxu0  ;;  %v6806_v6 = vpop.f32.mrb[0].mxu1 }
 0x26f   :  { %v479_v7 = vpop.f32.mrb[17].mxu0  ;;  %v410_v8 = vpop.f32.mrb[1].mxu1 }
 0x270   :  { %v6827_v9 = vpop.f32.mrb[18].mxu0  ;;  %7111 = vmatpush3.bf16.msra.mxu0 %v8439_v39  ;;  %v6807_v10 = vpop.f32.mrb[2].mxu1 }
 0x271   :  { %v495_v11 = vpack.c.bf16 %v6827_v9, %v6826_v5  ;;  %v482_v12 = vpop.f32.mrb[19].mxu0  ;;  %7112 = vmatprep.subr.bf16.mxu0 %v8455_v50  ;;  %v426_v13 = vpack.c.bf16 %v6807_v10, %v6806_v6  ;;  %v413_v14 = vpop.f32.mrb[3].mxu1 }
 0x272   :  { %v494_v15 = vpack.c.bf16 %v482_v12, %v479_v7  ;;  %v425_v16 = vpack.c.bf16 %v413_v14, %v410_v8 }
 0x274   :  { %6830 = vmatprep.mubr.msk.bf16.mxu1 %vm498_vm2, %v494_v15  ;;  %7113 = vmatpush3.bf16.msra.mxu0 %v8455_v50 }
 0x275   :  { %6831 = vmatmul.mubr.msk.bf16.vlgmr.msra.gmra.mrb[4].mxu1 %vm498_vm2, %v495_v11  ;;  %7114 = vmatprep.subr.bf16.mxu0 %v8451_v49 }
 0x276   :  { %6835 = vmatpush3.bf16.msra.mxu1 %v565_v17  ;;  %6836 = vmatprep.mubr.msk.bf16.mxu1 %vm498_vm2, %v425_v16 }
 0x277   :  { %7846 = vmatprep.subr.msk.bf16.mxu1 %vm505_vm1, %v6054_v18 }
 0x278   :  { %7115 = vmatpush3.bf16.msra.mxu0 %v8451_v49 }
 0x279   :  { %7126 = vmatprep.subr.bf16.mxu0 %v8419_v20 }
 0x27b   :  { %7117 = vmatmul.mubr.bf16.vlgmr.msra.gmra.mrb[44].mxu0 %v7899_v21 }
 0x27c   :  { %7127 = vmatpush3.bf16.msra.mxu0 %v8419_v20  ;;  %7142 = vmatprep.mubr.bf16.mxu0 %v7900_v22 }
 0x27d   :  { %7128 = vmatprep.subr.bf16.mxu0 %v8417_v19 }
 0x280   :  { %7129 = vmatpush3.bf16.msra.mxu0 %v8417_v19 }
 0x281   :  { %6837 = vmatmul.mubr.msk.bf16.vlgmr.msra.gmra.mrb[4].mxu1 %vm498_vm2, %v426_v13  ;;  %7130 = vmatprep.subr.bf16.mxu0 %v8431_v30 }
 0x282   :  { %6861 = vmatpush3.bf16.msra.mxu1 %v693_v23 }
 0x283   :  { %6866 = vmatprep.subr.bf16.mxu1 %v8419_v20 }
 0x284   :  { %7131 = vmatpush3.bf16.msra.mxu0 %v8431_v30 }
 0x285   :  { %7132 = vmatprep.subr.bf16.mxu0 %v8427_v29 }
 0x288   :  { %7133 = vmatpush3.bf16.msra.mxu0 %v8427_v29 }
 0x289   :  { %7134 = vmatprep.subr.bf16.mxu0 %v8443_v40 }
 0x28c   :  { %7135 = vmatpush3.bf16.msra.mxu0 %v8443_v40 }
 0x28d   :  { %7136 = vmatprep.subr.bf16.mxu0 %v8439_v39 }
 0x28e   :  { %v6858_v24 = vpop.f32.mrb[20].mxu0 }
 0x28f   :  { %v667_v25 = vpop.f32.mrb[21].mxu0 }
 0x290   :  { %v6859_v26 = vpop.f32.mrb[22].mxu0  ;;  %7137 = vmatpush3.bf16.msra.mxu0 %v8439_v39 }
 0x291   :  { %v683_v27 = vpack.c.bf16 %v6859_v26, %v6858_v24  ;;  %v670_v28 = vpop.f32.mrb[23].mxu0  ;;  %7138 = vmatprep.subr.bf16.mxu0 %v8455_v50  ;;  %v1353_v24 = vsel %vm505_vm1, %v6099_v3, 0  ;;  %v7907_v26 = vld [vmem:[%s9505_s2 + $0x88] sm:$0xff]  }
 0x292   :  { %v682_v31 = vpack.c.bf16 %v670_v28, %v667_v25  ;;  %v7906_v25 = vld [vmem:[%s9505_s2 + $0x80] sm:$0xff]  }
 0x294   :  { %6862 = vmatprep.mubr.msk.bf16.mxu1 %vm498_vm2, %v682_v31  ;;  %7139 = vmatpush3.bf16.msra.mxu0 %v8455_v50  ;;  %v6117_v31 = vld [vmem:[%s9506_s3 + $0x24] sm:$0xf] }
 0x295   :  { %6863 = vmatmul.mubr.msk.bf16.vlgmr.msra.gmra.mrb[4].mxu1 %vm498_vm2, %v683_v27  ;;  %7140 = vmatprep.subr.bf16.mxu0 %v8451_v49  ;;  %v6108_v27 = vld [vmem:[%s9506_s3 + $0x20] sm:$0xf] }
 0x296   :  { %6867 = vmatpush3.bf16.msra.mxu1 %v8419_v20  ;;  %6882 = vmatprep.mubr.bf16.mxu1 %v7902_v32  ;;  %v1485_v28 = vsel %vm505_vm1, %v6108_v27, 0 }
 0x297   :  { %6868 = vmatprep.subr.bf16.mxu1 %v8417_v19 }
 0x298   :  { %7141 = vmatpush3.bf16.msra.mxu0 %v8451_v49 }
 0x299   :  { %7178 = vmatprep.subr.bf16.mxu0 %v8419_v20 }
 0x29a   :  { %6869 = vmatpush3.bf16.msra.mxu1 %v8417_v19 }
 0x29b   :  { %6870 = vmatprep.subr.bf16.mxu1 %v8431_v30  ;;  %7143 = vmatmul.mubr.bf16.vlgmr.msra.gmra.mrb[48].mxu0 %v7901_v33 }
 0x29c   :  { %7179 = vmatpush3.bf16.msra.mxu0 %v8419_v20 }
 0x29d   :  { %7180 = vmatprep.subr.bf16.mxu0 %v8417_v19 }
 0x29e   :  { %6871 = vmatpush3.bf16.msra.mxu1 %v8431_v30 }
 0x29f   :  { %6872 = vmatprep.subr.bf16.mxu1 %v8427_v29 }
 0x2a0   :  { %7181 = vmatpush3.bf16.msra.mxu0 %v8417_v19 }
 0x2a1   :  { %7182 = vmatprep.subr.bf16.mxu0 %v8431_v30 }
 0x2a2   :  { %6873 = vmatpush3.bf16.msra.mxu1 %v8427_v29 }
 0x2a3   :  { %6874 = vmatprep.subr.bf16.mxu1 %v8443_v40 }
 0x2a4   :  { %7183 = vmatpush3.bf16.msra.mxu0 %v8431_v30 }
 0x2a5   :  { %7184 = vmatprep.subr.bf16.mxu0 %v8427_v29 }
 0x2a6   :  { %6875 = vmatpush3.bf16.msra.mxu1 %v8443_v40 }
 0x2a7   :  { %6876 = vmatprep.subr.bf16.mxu1 %v8439_v39 }
 0x2a8   :  { %7185 = vmatpush3.bf16.msra.mxu0 %v8427_v29 }
 0x2a9   :  { %7186 = vmatprep.subr.bf16.mxu0 %v8443_v40 }
 0x2aa   :  { %6877 = vmatpush3.bf16.msra.mxu1 %v8439_v39 }
 0x2ab   :  { %6878 = vmatprep.subr.bf16.mxu1 %v8455_v50 }
 0x2ac   :  { %7187 = vmatpush3.bf16.msra.mxu0 %v8443_v40 }
 0x2ad   :  { %7188 = vmatprep.subr.bf16.mxu0 %v8439_v39 }
 0x2ae   :  { %6879 = vmatpush3.bf16.msra.mxu1 %v8455_v50  ;;  %v6910_v34 = vpop.f32.mrb[24].mxu0 }
 0x2af   :  { %6880 = vmatprep.subr.bf16.mxu1 %v8451_v49  ;;  %v931_v35 = vpop.f32.mrb[25].mxu0 }
 0x2b0   :  { %7189 = vmatpush3.bf16.msra.mxu0 %v8439_v39  ;;  %v6911_v36 = vpop.f32.mrb[26].mxu0 }
 0x2b1   :  { %7190 = vmatprep.subr.bf16.mxu0 %v8455_v50  ;;  %v947_v38 = vpack.c.bf16 %v6911_v36, %v6910_v34  ;;  %v934_v41 = vpop.f32.mrb[27].mxu0 }
 0x2b2   :  { %6881 = vmatpush3.bf16.msra.mxu1 %v8451_v49  ;;  %v946_v42 = vpack.c.bf16 %v934_v41, %v931_v35 }
 0x2b3   :  { %7847 = vmatprep.subr.msk.bf16.mxu1 %vm505_vm1, %v6063_v43 }
 0x2b4   :  { %7191 = vmatpush3.bf16.msra.mxu0 %v8455_v50 }
 0x2b5   :  { %6883 = vmatmul.mubr.bf16.vlgmr.msra.gmra.mrb[8].mxu1 %v7903_v37  ;;  %7192 = vmatprep.subr.bf16.mxu0 %v8451_v49 }
 0x2b6   :  { %6887 = vmatpush3.bf16.msra.mxu1 %v825_v44 }
 0x2b7   :  { %7848 = vmatprep.subr.msk.bf16.mxu1 %vm505_vm1, %v6072_v45 }
 0x2b8   :  { %7193 = vmatpush3.bf16.msra.mxu0 %v8451_v49 }
 0x2ce   :  { %v6936_v46 = vpop.f32.mrb[28].mxu0 }
 0x2cf   :  { %v1063_v47 = vpop.f32.mrb[29].mxu0 }
 0x2d0   :  { %v6937_v48 = vpop.f32.mrb[30].mxu0 }
 0x2d1   :  { %v1079_v51 = vpack.c.bf16 %v6937_v48, %v6936_v46  ;;  %v1066_v52 = vpop.f32.mrb[31].mxu0 }
 0x2d2   :  { %v1078_v53 = vpack.c.bf16 %v1066_v52, %v1063_v47 }
 0x2ee   :  { %v6988_v4 = vpop.f32.mrb[32].mxu0 }
 0x2ef   :  { %v1327_v5 = vpop.f32.mrb[33].mxu0 }
 0x2f0   :  { %v6989_v6 = vpop.f32.mrb[34].mxu0 }
 0x2f1   :  { %v1343_v7 = vpack.c.bf16 %v6989_v6, %v6988_v4  ;;  %v1330_v8 = vpop.f32.mrb[35].mxu0  ;;  %v7912_v4 = vld [vmem:[%s9505_s2 + $0xf0] sm:$0xff]  }
 0x2f2   :  { %v1342_v9 = vpack.c.bf16 %v1330_v8, %v1327_v5  ;;  %v7913_v5 = vld [vmem:[%s9505_s2 + $0xf8] sm:$0xff]   ;;  %7194 = vmatprep.mubr.bf16.mxu0 %v7912_v4 }
 0x2f3   :  { %7195 = vmatmul.mubr.bf16.vlgmr.msra.gmra.mrb[52].mxu0 %v7913_v5 }
 0x30e   :  { %v8762_v10 = vpop.f32.mrb[36].mxu0 }
 0x30f   :  { %v8764_v11 = vpop.f32.mrb[37].mxu0 }
 0x310   :  { %v8766_v12 = vpop.f32.mrb[38].mxu0 }
 0x311   :  { %v1607_v13 = vpack.c.bf16 %v8766_v12, %v8762_v10  ;;  %v8770_v14 = vpop.f32.mrb[39].mxu0 }
 0x312   :  { %v1606_v15 = vpack.c.bf16 %v8770_v14, %v8764_v11 }
 0x32e   :  { %v7066_v32 = vpop.f32.mrb[40].mxu0 }
 0x32f   :  { %v1723_v33 = vpop.f32.mrb[41].mxu0 }
 0x330   :  { %v7067_v34 = vpop.f32.mrb[42].mxu0 }
 0x331   :  { %v1739_v35 = vpack.c.bf16 %v7067_v34, %v7066_v32  ;;  %v1726_v36 = vpop.f32.mrb[43].mxu0 }
 0x332   :  { %v1738_v37 = vpack.c.bf16 %v1726_v36, %v1723_v33 }
 0x388   :  { %v6884_v54 = vpop.f32.mrb[8].mxu1 }
 0x389   :  { %v799_v55 = vpop.f32.mrb[9].mxu1 }
 0x38a   :  { %v6885_v56 = vpop.f32.mrb[10].mxu1 }
 0x38b   :  { %v815_v57 = vpack.c.bf16 %v6885_v56, %v6884_v54  ;;  %v802_v58 = vpop.f32.mrb[11].mxu1  ;;  %v1617_v54 = vsel %vm505_vm1, %v6117_v31, 0 }
 0x38c   :  { %v814_v59 = vpack.c.bf16 %v802_v58, %v799_v55  ;;  %v6126_v55 = vld [vmem:[%s9506_s3 + $0x28] sm:$0xf]  ;;  %v7909_v58 = vld [vmem:[%s9505_s2 + $0xb8] sm:$0xff]  }
 0x38d   :  { %v1749_v56 = vsel %vm505_vm1, %v6126_v55, 0 }
 0x38e   :  { %6888 = vmatprep.mubr.msk.bf16.mxu1 %vm498_vm2, %v814_v59  ;;  %v6135_v59 = vld [vmem:[%s9506_s3 + $0x2c] sm:$0xf] }
 0x38f   :  { %6889 = vmatmul.mubr.msk.bf16.vlgmr.msra.gmra.mrb[4].mxu1 %vm498_vm2, %v815_v57  ;;  %v7908_v57 = vld [vmem:[%s9505_s2 + $0xb0] sm:$0xff]  }
 0x390   :  { %6914 = vmatprep.mubr.msk.bf16.mxu1 %vm498_vm2, %v946_v42  ;;  %6913 = vmatpush3.bf16.msra.mxu1 %v957_v60  ;;  %v1881_v60 = vsel %vm505_vm1, %v6135_v59, 0 }
 0x391   :  { %7849 = vmatprep.subr.msk.bf16.mxu1 %vm505_vm1, %v6081_v61  ;;  %v6144_v61 = vld [vmem:[%s9506_s3 + $0x30] sm:$0xf] }
 0x392   :  { %v2013_v12 = vsel %vm505_vm1, %v6144_v61, 0 }
 0x39b   :  { %6915 = vmatmul.mubr.msk.bf16.vlgmr.msra.gmra.mrb[4].mxu1 %vm498_vm2, %v947_v38  ;;  %v8810_v38 = vpop.f32.mrb[44].mxu0 }
 0x39c   :  { %6939 = vmatpush3.bf16.msra.mxu1 %v1089_v62  ;;  %6940 = vmatprep.mubr.msk.bf16.mxu1 %vm498_vm2, %v1078_v53  ;;  %v8812_v41 = vpop.f32.mrb[45].mxu0 }
 0x39d   :  { %6944 = vmatprep.subr.bf16.mxu1 %v8419_v20  ;;  %v8814_v42 = vpop.f32.mrb[46].mxu0 }
 0x39e   :  { %v2003_v43 = vpack.c.bf16 %v8814_v42, %v8810_v38  ;;  %v8818_v44 = vpop.f32.mrb[47].mxu0 }
 0x39f   :  { %v2002_v45 = vpack.c.bf16 %v8818_v44, %v8812_v41  ;;  %v7144_v62 = vpop.f32.mrb[48].mxu0 }
 0x3a7   :  { %6941 = vmatmul.mubr.msk.bf16.vlgmr.msra.gmra.mrb[4].mxu1 %vm498_vm2, %v1079_v51 }
 0x3a8   :  { %6945 = vmatpush3.bf16.msra.mxu1 %v8419_v20  ;;  %6960 = vmatprep.mubr.bf16.mxu1 %v7904_v63  ;;  %v2119_v63 = vpop.f32.mrb[49].mxu0 }
 0x3a9   :  { %6946 = vmatprep.subr.bf16.mxu1 %v8417_v19 }
 0x3ac   :  { %6947 = vmatpush3.bf16.msra.mxu1 %v8417_v19 }
 0x3ad   :  { %6948 = vmatprep.subr.bf16.mxu1 %v8431_v30 }
 0x3b0   :  { %6949 = vmatpush3.bf16.msra.mxu1 %v8431_v30 }
 0x3b1   :  { %6950 = vmatprep.subr.bf16.mxu1 %v8427_v29 }
 0x3b4   :  { %6951 = vmatpush3.bf16.msra.mxu1 %v8427_v29 }
 0x3b5   :  { %6952 = vmatprep.subr.bf16.mxu1 %v8443_v40 }
 0x3b8   :  { %6953 = vmatpush3.bf16.msra.mxu1 %v8443_v40 }
 0x3b9   :  { %6954 = vmatprep.subr.bf16.mxu1 %v8439_v39 }
 0x3bc   :  { %6955 = vmatpush3.bf16.msra.mxu1 %v8439_v39 }
 0x3bd   :  { %6956 = vmatprep.subr.bf16.mxu1 %v8455_v50 }
 0x3c0   :  { %6957 = vmatpush3.bf16.msra.mxu1 %v8455_v50 }
 0x3c1   :  { %6958 = vmatprep.subr.bf16.mxu1 %v8451_v49 }
 0x3c4   :  { %6959 = vmatpush3.bf16.msra.mxu1 %v8451_v49 }
 0x3c5   :  { %7850 = vmatprep.subr.msk.bf16.mxu1 %vm505_vm1, %v6090_v1 }
 0x3c7   :  { %6961 = vmatmul.mubr.bf16.vlgmr.msra.gmra.mrb[12].mxu1 %v7905_v0  ;;  %v7145_v0 = vpop.f32.mrb[50].mxu0 }
 0x3c8   :  { %6965 = vmatpush3.bf16.msra.mxu1 %v1221_v2  ;;  %v2135_v1 = vpack.c.bf16 %v7145_v0, %v7144_v62  ;;  %v2122_v2 = vpop.f32.mrb[51].mxu0 }
 0x3c9   :  { %7851 = vmatprep.subr.msk.bf16.mxu1 %vm505_vm1, %v6099_v3  ;;  %v2134_v3 = vpack.c.bf16 %v2122_v2, %v2119_v63 }
 0x49a   :  { %v6962_v16 = vpop.f32.mrb[12].mxu1 }
 0x49b   :  { %v1195_v17 = vpop.f32.mrb[13].mxu1 }
 0x49c   :  { %v6963_v18 = vpop.f32.mrb[14].mxu1 }
 0x49d   :  { %v1211_v21 = vpack.c.bf16 %v6963_v18, %v6962_v16  ;;  %v1198_v22 = vpop.f32.mrb[15].mxu1 }
 0x49e   :  { %v1210_v23 = vpack.c.bf16 %v1198_v22, %v1195_v17 }
 0x4a0   :  { %6966 = vmatprep.mubr.msk.bf16.mxu1 %vm498_vm2, %v1210_v23 }
 0x4a1   :  { %6967 = vmatmul.mubr.msk.bf16.vlgmr.msra.gmra.mrb[4].mxu1 %vm498_vm2, %v1211_v21 }
 0x4a2   :  { %6991 = vmatpush3.bf16.msra.mxu1 %v1353_v24  ;;  %6992 = vmatprep.mubr.msk.bf16.mxu1 %vm498_vm2, %v1342_v9 }
 0x4a3   :  { %6996 = vmatprep.subr.bf16.mxu1 %v8419_v20 }
 0x4ad   :  { %6993 = vmatmul.mubr.msk.bf16.vlgmr.msra.gmra.mrb[4].mxu1 %vm498_vm2, %v1343_v7 }
 0x4ae   :  { %6997 = vmatpush3.bf16.msra.mxu1 %v8419_v20  ;;  %7012 = vmatprep.mubr.bf16.mxu1 %v7906_v25 }
 0x4af   :  { %6998 = vmatprep.subr.bf16.mxu1 %v8417_v19 }
 0x4b2   :  { %6999 = vmatpush3.bf16.msra.mxu1 %v8417_v19 }
 0x4b3   :  { %7000 = vmatprep.subr.bf16.mxu1 %v8431_v30 }
 0x4b6   :  { %7001 = vmatpush3.bf16.msra.mxu1 %v8431_v30 }
 0x4b7   :  { %7002 = vmatprep.subr.bf16.mxu1 %v8427_v29 }
 0x4ba   :  { %7003 = vmatpush3.bf16.msra.mxu1 %v8427_v29 }
 0x4bb   :  { %7004 = vmatprep.subr.bf16.mxu1 %v8443_v40 }
 0x4be   :  { %7005 = vmatpush3.bf16.msra.mxu1 %v8443_v40 }
 0x4bf   :  { %7006 = vmatprep.subr.bf16.mxu1 %v8439_v39 }
 0x4c2   :  { %7007 = vmatpush3.bf16.msra.mxu1 %v8439_v39 }
 0x4c3   :  { %7008 = vmatprep.subr.bf16.mxu1 %v8455_v50 }
 0x4c6   :  { %7009 = vmatpush3.bf16.msra.mxu1 %v8455_v50 }
 0x4c7   :  { %7010 = vmatprep.subr.bf16.mxu1 %v8451_v49 }
 0x4ca   :  { %7011 = vmatpush3.bf16.msra.mxu1 %v8451_v49 }
 0x4cb   :  { %7852 = vmatprep.subr.msk.bf16.mxu1 %vm505_vm1, %v6108_v27  ;;  %v8192_v27 = vmov 0.0  }
 0x4cc   :  { %7212 = vmatprep.subr.bf16.mxu0 %v8192_v27  ;;  %7216 = vmatprep.mubr.msk.bf16.mxu0 %vm8193_vm3, %v8192_v27 }
 0x4cd   :  { %7013 = vmatmul.mubr.bf16.vlgmr.msra.gmra.mrb[16].mxu1 %v7907_v26 }
 0x4ce   :  { %7017 = vmatpush3.bf16.msra.mxu1 %v1485_v28 }
 0x4cf   :  { %7853 = vmatprep.subr.msk.bf16.mxu1 %vm505_vm1, %v6117_v31 }
 0x5a0   :  { %v7014_v46 = vpop.f32.mrb[16].mxu1 }
 0x5a1   :  { %v1459_v47 = vpop.f32.mrb[17].mxu1 }
 0x5a2   :  { %v7015_v48 = vpop.f32.mrb[18].mxu1 }
 0x5a3   :  { %v1475_v51 = vpack.c.bf16 %v7015_v48, %v7014_v46  ;;  %v1462_v52 = vpop.f32.mrb[19].mxu1 }
 0x5a4   :  { %v1474_v53 = vpack.c.bf16 %v1462_v52, %v1459_v47 }
 0x5a6   :  { %7018 = vmatprep.mubr.msk.bf16.mxu1 %vm498_vm2, %v1474_v53 }
 0x5a7   :  { %7019 = vmatmul.mubr.msk.bf16.vlgmr.msra.gmra.mrb[4].mxu1 %vm498_vm2, %v1475_v51 }
 0x5a8   :  { %7044 = vmatprep.mubr.msk.bf16.mxu1 %vm498_vm2, %v1606_v15  ;;  %7043 = vmatpush3.bf16.msra.mxu1 %v1617_v54  ;;  %v7910_v15 = vld [vmem:[%s9505_s2 + $0xe0] sm:$0xff]  }
 0x5a9   :  { %7854 = vmatprep.subr.msk.bf16.mxu1 %vm505_vm1, %v6126_v55 }
 0x5b3   :  { %7045 = vmatmul.mubr.msk.bf16.vlgmr.msra.gmra.mrb[4].mxu1 %vm498_vm2, %v1607_v13  ;;  %v6153_v13 = vld [vmem:[%s9506_s3 + $0x34] sm:$0xf] }
 0x5b4   :  { %7069 = vmatpush3.bf16.msra.mxu1 %v1749_v56  ;;  %7070 = vmatprep.mubr.msk.bf16.mxu1 %vm498_vm2, %v1738_v37  ;;  %v2145_v14 = vsel %vm505_vm1, %v6153_v13, 0 }
 0x5b5   :  { %7074 = vmatprep.subr.bf16.mxu1 %v8419_v20 }
 0x5bf   :  { %7071 = vmatmul.mubr.msk.bf16.vlgmr.msra.gmra.mrb[4].mxu1 %vm498_vm2, %v1739_v35 }
 0x5c0   :  { %7075 = vmatpush3.bf16.msra.mxu1 %v8419_v20  ;;  %7090 = vmatprep.mubr.bf16.mxu1 %v7908_v57 }
 0x5c1   :  { %7076 = vmatprep.subr.bf16.mxu1 %v8417_v19 }
 0x5c4   :  { %7077 = vmatpush3.bf16.msra.mxu1 %v8417_v19 }
 0x5c5   :  { %7078 = vmatprep.subr.bf16.mxu1 %v8431_v30 }
 0x5c8   :  { %7079 = vmatpush3.bf16.msra.mxu1 %v8431_v30 }
 0x5c9   :  { %7080 = vmatprep.subr.bf16.mxu1 %v8427_v29 }
 0x5cc   :  { %7081 = vmatpush3.bf16.msra.mxu1 %v8427_v29 }
 0x5cd   :  { %7082 = vmatprep.subr.bf16.mxu1 %v8443_v40 }
 0x5d0   :  { %7083 = vmatpush3.bf16.msra.mxu1 %v8443_v40 }
 0x5d1   :  { %7084 = vmatprep.subr.bf16.mxu1 %v8439_v39 }
 0x5d4   :  { %7085 = vmatpush3.bf16.msra.mxu1 %v8439_v39 }
 0x5d5   :  { %7086 = vmatprep.subr.bf16.mxu1 %v8455_v50 }
 0x5d8   :  { %7087 = vmatpush3.bf16.msra.mxu1 %v8455_v50 }
 0x5d9   :  { %7088 = vmatprep.subr.bf16.mxu1 %v8451_v49 }
 0x5dc   :  { %7089 = vmatpush3.bf16.msra.mxu1 %v8451_v49 }
 0x5dd   :  { %7855 = vmatprep.subr.msk.bf16.mxu1 %vm505_vm1, %v6135_v59 }
 0x5df   :  { %7091 = vmatmul.mubr.bf16.vlgmr.msra.gmra.mrb[20].mxu1 %v7909_v58 }
 0x5e0   :  { %7095 = vmatpush3.bf16.msra.mxu1 %v1881_v60 }
 0x5e1   :  { %7856 = vmatprep.subr.msk.bf16.mxu1 %vm505_vm1, %v6144_v61 }
 0x6b2   :  { %v7092_v6 = vpop.f32.mrb[20].mxu1 }
 0x6b3   :  { %v1855_v7 = vpop.f32.mrb[21].mxu1 }
 0x6b4   :  { %v7093_v8 = vpop.f32.mrb[22].mxu1 }
 0x6b5   :  { %v1871_v9 = vpack.c.bf16 %v7093_v8, %v7092_v6  ;;  %v1858_v10 = vpop.f32.mrb[23].mxu1 }
 0x6b6   :  { %v1870_v11 = vpack.c.bf16 %v1858_v10, %v1855_v7 }
 0x6b8   :  { %7096 = vmatprep.mubr.msk.bf16.mxu1 %vm498_vm2, %v1870_v11 }
 0x6b9   :  { %7097 = vmatmul.mubr.msk.bf16.vlgmr.msra.gmra.mrb[4].mxu1 %vm498_vm2, %v1871_v9 }
 0x6ba   :  { %7122 = vmatprep.mubr.msk.bf16.mxu1 %vm498_vm2, %v2002_v45  ;;  %7121 = vmatpush3.bf16.msra.mxu1 %v2013_v12 }
 0x6bb   :  { %7857 = vmatprep.subr.msk.bf16.mxu1 %vm505_vm1, %v6153_v13 }
 0x6c5   :  { %7123 = vmatmul.mubr.msk.bf16.vlgmr.msra.gmra.mrb[4].mxu1 %vm498_vm2, %v2003_v43 }
 0x6c6   :  { %7147 = vmatpush3.bf16.msra.mxu1 %v2145_v14  ;;  %7148 = vmatprep.mubr.msk.bf16.mxu1 %vm498_vm2, %v2134_v3 }
 0x6c7   :  { %7152 = vmatprep.subr.bf16.mxu1 %v8419_v20 }
 0x6d1   :  { %7149 = vmatmul.mubr.msk.bf16.vlgmr.msra.gmra.mrb[4].mxu1 %vm498_vm2, %v2135_v1 }
 0x6d2   :  { %7153 = vmatpush3.bf16.msra.mxu1 %v8419_v20  ;;  %7168 = vmatprep.mubr.bf16.mxu1 %v7910_v15  ;;  %v6162_v20 = vld [vmem:[%s9506_s3 + $0x38] sm:$0xf]  ;;  %v6174_v15 = vld [vmem:[#allocation2] ss:$0 sm:$0xff] }
 0x6d3   :  { %7154 = vmatprep.subr.bf16.mxu1 %v8417_v19 }
 0x6d6   :  { %7155 = vmatpush3.bf16.msra.mxu1 %v8417_v19  ;;  %v7911_v19 = vld [vmem:[%s9505_s2 + $0xe8] sm:$0xff]  }
 0x6d7   :  { %7156 = vmatprep.subr.bf16.mxu1 %v8431_v30 }
 0x6da   :  { %7157 = vmatpush3.bf16.msra.mxu1 %v8431_v30  ;;  %v7196_v30 = vpop.f32.mrb[52].mxu0 }
 0x6db   :  { %7158 = vmatprep.subr.bf16.mxu1 %v8427_v29 }
 0x6de   :  { %7159 = vmatpush3.bf16.msra.mxu1 %v8427_v29  ;;  %v2277_v29 = vsel %vm505_vm1, %v6162_v20, 0 }
 0x6df   :  { %7160 = vmatprep.subr.bf16.mxu1 %v8443_v40 }
 0x6e2   :  { %7161 = vmatpush3.bf16.msra.mxu1 %v8443_v40  ;;  %v2383_v40 = vpop.f32.mrb[53].mxu0 }
 0x6e3   :  { %7162 = vmatprep.subr.bf16.mxu1 %v8439_v39 }
 0x6e6   :  { %7163 = vmatpush3.bf16.msra.mxu1 %v8439_v39  ;;  %v6171_v39 = vld [vmem:[%s9506_s3 + $0x3c] sm:$0xf] }
 0x6e7   :  { %7164 = vmatprep.subr.bf16.mxu1 %v8455_v50  ;;  %v2409_v26 = vsel %vm505_vm1, %v6171_v39, 0 }
 0x6ea   :  { %7165 = vmatpush3.bf16.msra.mxu1 %v8455_v50  ;;  %v7197_v50 = vpop.f32.mrb[54].mxu0 }
 0x6eb   :  { %7166 = vmatprep.subr.bf16.mxu1 %v8451_v49  ;;  %v2386_v16 = vpop.f32.mrb[55].mxu0 }
 0x6ec   :  { %v2398_v17 = vpack.c.bf16 %v2386_v16, %v2383_v40 }
 0x6ee   :  { %7167 = vmatpush3.bf16.msra.mxu1 %v8451_v49  ;;  %v2399_v49 = vpack.c.bf16 %v7197_v50, %v7196_v30 }
 0x6ef   :  { %7858 = vmatprep.subr.msk.bf16.mxu1 %vm505_vm1, %v6162_v20 }
 0x6f1   :  { %7169 = vmatmul.mubr.bf16.vlgmr.msra.gmra.mrb[24].mxu1 %v7911_v19 }
 0x6f2   :  { %7173 = vmatpush3.bf16.msra.mxu1 %v2277_v29 }
 0x6f3   :  { %7859 = vmatprep.subr.msk.bf16.mxu1 %vm505_vm1, %v6171_v39  ;;  %v6175_v39 = vld [vmem:[#allocation5] ss:$0 sm:$0xff] }
 0x7c4   :  { %v7170_v18 = vpop.f32.mrb[24].mxu1 }
 0x7c5   :  { %v2251_v21 = vpop.f32.mrb[25].mxu1 }
 0x7c6   :  { %v7171_v22 = vpop.f32.mrb[26].mxu1 }
 0x7c7   :  { %v2267_v23 = vpack.c.bf16 %v7171_v22, %v7170_v18  ;;  %v2254_v24 = vpop.f32.mrb[27].mxu1 }
 0x7c8   :  { %v2266_v25 = vpack.c.bf16 %v2254_v24, %v2251_v21 }
 0x7ca   :  { %7174 = vmatprep.mubr.msk.bf16.mxu1 %vm498_vm2, %v2266_v25 }
 0x7cb   :  { %7175 = vmatmul.mubr.msk.bf16.vlgmr.msra.gmra.mrb[4].mxu1 %vm498_vm2, %v2267_v23 }
 0x7cc   :  { %7199 = vmatpush3.bf16.msra.mxu1 %v2409_v26  ;;  %7200 = vmatprep.mubr.msk.bf16.mxu1 %vm498_vm2, %v2398_v17 }
 0x7cd   :  { %7204 = vmatprep.subr.bf16.mxu1 %v8192_v27 }
 0x7d7   :  { %7201 = vmatmul.mubr.msk.bf16.vlgmr.msra.gmra.mrb[4].mxu1 %vm498_vm2, %v2399_v49 }
 0x7d8   :  { %7208 = vmatprep.mubr.msk.bf16.mxu1 %vm8193_vm3, %v8192_v27 }
 0x8aa   :  { %v7202_v28 = vpop.f32.mrb[4].mxu1 }
 0x8ab   :  { %v2445_v31 = vpop.f32.mrb[5].mxu1  ;;  %v2480_v35 = vmul.f32 %v7202_v28, %v7202_v28  ;;  %v2467_v42 = vsel %vm214_vm0, %v7202_v28, 0.0 }
 0x8ac   :  { %v2478_v32 = vmul.f32 %v2445_v31, %v2445_v31  ;;  %v7203_v33 = vpop.f32.mrb[6].mxu1  ;;  %v2464_v36 = vsel %vm214_vm0, %v2445_v31, 0.0 }
 0x8ad   :  { %v2448_v34 = vpop.f32.mrb[7].mxu1  ;;  %v2481_v44 = vmul.f32 %v7203_v33, %v7203_v33  ;;  %v2485_v48 = vsel %vm214_vm0, %v2480_v35, 0.0  ;;  %v2469_v51 = vsel %vm214_vm0, %v7203_v33, 0.0  ;;  %v6187_v35 = vld [vmem:[%s9509_s6 + $0xc] sm:$0xf] }
 0x8ae   :  { %v2465_v37 = vsel %vm214_vm0, %v2448_v34, 0.0  ;;  %v2479_v38 = vmul.f32 %v2448_v34, %v2448_v34  ;;  %v2482_v43 = vsel %vm214_vm0, %v2478_v32, 0.0  ;;  %v6177_v32 = vld [vmem:[%s9509_s6 + $0x4] sm:$0xf] }
 0x8af   :  { %v2466_v41 = vadd.f32 %v2465_v37, %v2464_v36  ;;  %v2487_v54 = vsel %vm214_vm0, %v2481_v44, 0.0  ;;  %v6191_v36 = vld [vmem:[%s9509_s6 + $0x10] sm:$0xf]  ;;  %v6195_v37 = vld [vmem:[%s9509_s6 + $0x14] sm:$0xf] }
 0x8b0   :  { %v2483_v45 = vsel %vm214_vm0, %v2479_v38, 0.0  ;;  %v6199_v38 = vld [vmem:[%s9509_s6 + $0x18] sm:$0xf]  ;;  %v6215_v44 = vld [vmem:[%s9509_s6 + $0x28] sm:$0xf] }
 0x8b1   :  { %v2468_v46 = vadd.f32 %v2467_v42, %v2466_v41  ;;  %v2484_v47 = vadd.f32 %v2483_v45, %v2482_v43  ;;  %v6203_v41 = vld [vmem:[%s9509_s6 + $0x1c] sm:$0xf]  ;;  %v6207_v42 = vld [vmem:[%s9509_s6 + $0x20] sm:$0xf]  ;;  %v6211_v43 = vld [vmem:[%s9509_s6 + $0x24] sm:$0xf] }
 0x8b2   :  { %v6219_v45 = vld [vmem:[%s9509_s6 + $0x2c] sm:$0xf] }
 0x8b3   :  { %v2470_v52 = vadd.f32 %v2469_v51, %v2468_v46  ;;  %v2486_v53 = vadd.f32 %v2485_v48, %v2484_v47  ;;  %v7914_v46 = vld [vmem:[#allocation7 + $0x8] sm:$0xff]   ;;  %v6227_v48 = vld [vmem:[%s9509_s6 + $0x34] sm:$0xf]  ;;  %v6231_v51 = vld [vmem:[%s9509_s6 + $0x38] sm:$0xf] }
 0x8b4   :  { %v6223_v47 = vld [vmem:[%s9509_s6 + $0x30] sm:$0xf] }
 0x8b5   :  { %v2471_v55 = vrot.slane %v2470_v52, 4  ;;  %v2488_v56 = vadd.f32 %v2487_v54, %v2486_v53  ;;  %v7915_v54 = vld [vmem:[#allocation7] sm:$0xff]  }
 0x8b7   :  { %v2472_v57 = vadd.f32 %v2471_v55, %v2470_v52  ;;  %v2489_v58 = vrot.slane %v2488_v56, 4  ;;  %v6235_v52 = vld [vmem:[%s9509_s6 + $0x3c] sm:$0xf] }
 0x8b9   :  { %v2473_v59 = vrot.slane %v2472_v57, 2  ;;  %v2490_v60 = vadd.f32 %v2489_v58, %v2488_v56 }
 0x8bb   :  { %v2474_v61 = vadd.f32 %v2473_v59, %v2472_v57  ;;  %v2491_v62 = vrot.slane %v2490_v60, 2 }
 0x8bd   :  { %v2475_v63 = vrot.slane %v2474_v61, 1  ;;  %v2492_v0 = vadd.f32 %v2491_v62, %v2490_v60 }
 0x8bf   :  { %v2476_v1 = vadd.f32 %v2475_v63, %v2474_v61  ;;  %v2493_v2 = vrot.slane %v2492_v0, 1 }
 0x8c1   :  { %v2477_v3 = vmul.f32 0.03125, %v2476_v1  ;;  %v2494_v4 = vadd.f32 %v2493_v2, %v2492_v0 }
 0x8c3   :  { %v2495_v5 = vmul.f32 0.03125, %v2494_v4  ;;  %v2496_v6 = vmul.f32 %v2477_v3, %v2477_v3  ;;  %v2499_v7 = vsub.f32 %v2445_v31, %v2477_v3  ;;  %v2500_v8 = vsub.f32 %v2448_v34, %v2477_v3  ;;  %v6183_v34 = vld [vmem:[%s9509_s6 + $0x8] sm:$0xf]  ;;  %v7916_v4 = vld [vmem:[#allocation7 + $0x10] sm:$0xff]  }
 0x8c4   :  { %v2501_v9 = vsub.f32 %v7202_v28, %v2477_v3  ;;  %v2502_v10 = vsub.f32 %v7203_v33, %v2477_v3  ;;  %v2537_v33 = vld [vmem:[%s9509_s6] sm:$0xf] }
 0x8c5   :  { %v2497_v11 = vsub.f32 %v2495_v5, %v2496_v6 }
 0x8c7   :  { %v2498_v12 = vmax.f32 %v2497_v11, 0.0 }
 0x8c9   :  { %v2503_v13 = vadd.f32 1e-05, %v2498_v12 }
 0x8cb   :  { %7966 = vrsqrt.f32 %v2503_v13 }
 0x8d5   :  { %v7967_v14 = vpop.eup %7966 }
 0x8d6   :  { %v2505_v19 = vmul.f32 %v7967_v14, %v2499_v7  ;;  %v2506_v20 = vmul.f32 %v7967_v14, %v2500_v8  ;;  %v2507_v29 = vmul.f32 %v7967_v14, %v2501_v9  ;;  %v2508_v30 = vmul.f32 %v7967_v14, %v2502_v10  ;;  %v7917_v10 = vld [vmem:[#allocation7 + $0x18] sm:$0xff]  }
 0x8d8   :  { %v2516_v40 = vmul.f32 %v6174_v15, %v2505_v19  ;;  %v2517_v50 = vmul.f32 %v6174_v15, %v2506_v20  ;;  %v2518_v49 = vmul.f32 %v6174_v15, %v2507_v29  ;;  %v2519_v16 = vmul.f32 %v6174_v15, %v2508_v30 }
 0x8da   :  { %v2527_v17 = vadd.f32 %v6175_v39, %v2516_v40  ;;  %v2528_v18 = vadd.f32 %v6175_v39, %v2517_v50  ;;  %v2529_v21 = vadd.f32 %v6175_v39, %v2518_v49  ;;  %v2530_v22 = vadd.f32 %v6175_v39, %v2519_v16  ;;  %v7918_v39 = vld [vmem:[#allocation7 + $0x20] sm:$0xff]  }
 0x8dc   :  { %v2531_v23 = vmax.f32 %v2527_v17, 0.0  ;;  %v2532_v24 = vmax.f32 %v2528_v18, 0.0  ;;  %v2533_v25 = vmax.f32 %v2529_v21, 0.0  ;;  %v2534_v26 = vmax.f32 %v2530_v22, 0.0  ;;  %v7919_v18 = vld [vmem:[#allocation7 + $0x28] sm:$0xff]  }
 0x8de   :  { %v8942_v28 = vpack.c.bf16 %v2532_v24, %v2531_v23  ;;  %v8944_v31 = vpack.c.bf16 %v2534_v26, %v2533_v25 }
 0x8e0   :  { %7205 = vmatpush3.bf16.msra.mxu1 %v8942_v28  ;;  %7213 = vmatpush3.bf16.msra.mxu0 %v8942_v28 }
 0x8e1   :  { %7206 = vmatprep.subr.bf16.mxu1 %v8192_v27  ;;  %7214 = vmatprep.subr.bf16.mxu0 %v8192_v27 }
 0x8e4   :  { %7207 = vmatpush3.bf16.msra.mxu1 %v8944_v31  ;;  %7215 = vmatpush3.bf16.msra.mxu0 %v8944_v31 }
 0x8e5   :  { %7232 = vmatprep.subr.bf16.mxu0 %v8192_v27  ;;  %7220 = vmatprep.subr.bf16.mxu1 %v8192_v27 }
 0x8e7   :  { %7217 = vmatmul.mubr.msk.bf16.vlgmr.msra.gmra.mrb[56].mxu0 %vm2538_vm4, %v6177_v32  ;;  %7209 = vmatmul.mubr.msk.bf16.vlgmr.msra.gmra.mrb[28].mxu1 %vm2538_vm4, %v2537_v33  ;;  %v7920_v33 = vld [vmem:[#allocation7 + $0x30] sm:$0xff]  }
 0x8e8   :  { %7233 = vmatpush3.bf16.msra.mxu0 %v8942_v28  ;;  %7236 = vmatprep.mubr.msk.bf16.mxu0 %vm8193_vm3, %v8192_v27 }
 0x8e9   :  { %7234 = vmatprep.subr.bf16.mxu0 %v8192_v27  ;;  %7222 = vmatprep.mubr.msk.bf16.mxu1 %vm8193_vm3, %v8192_v27 }
 0x8ea   :  { %7221 = vmatpush3.bf16.msra.mxu1 %v7914_v46 }
 0x8eb   :  { %7226 = vmatprep.subr.bf16.mxu1 %v8192_v27 }
 0x8ec   :  { %7235 = vmatpush3.bf16.msra.mxu0 %v8944_v31 }
 0x8ed   :  { %7246 = vmatprep.subr.bf16.mxu0 %v8192_v27 }
 0x8ef   :  { %7237 = vmatmul.mubr.msk.bf16.vlgmr.msra.gmra.mrb[60].mxu0 %vm2538_vm4, %v6183_v34 }
 0x8f0   :  { %7247 = vmatpush3.bf16.msra.mxu0 %v8942_v28  ;;  %7250 = vmatprep.mubr.msk.bf16.mxu0 %vm8193_vm3, %v8192_v27 }
 0x8f1   :  { %7248 = vmatprep.subr.bf16.mxu0 %v8192_v27 }
 0x8f4   :  { %7249 = vmatpush3.bf16.msra.mxu0 %v8944_v31 }
 0x8f5   :  { %7260 = vmatprep.subr.bf16.mxu0 %v8192_v27 }
 0x8f7   :  { %7251 = vmatmul.mubr.msk.bf16.vlgmr.msra.gmra.mrb[64].mxu0 %vm2538_vm4, %v6187_v35 }
 0x8f8   :  { %7261 = vmatpush3.bf16.msra.mxu0 %v8942_v28  ;;  %7264 = vmatprep.mubr.msk.bf16.mxu0 %vm8193_vm3, %v8192_v27 }
 0x8f9   :  { %7262 = vmatprep.subr.bf16.mxu0 %v8192_v27 }
 0x8fc   :  { %7263 = vmatpush3.bf16.msra.mxu0 %v8944_v31 }
 0x8fd   :  { %7274 = vmatprep.subr.bf16.mxu0 %v8192_v27 }
 0x8ff   :  { %7265 = vmatmul.mubr.msk.bf16.vlgmr.msra.gmra.mrb[68].mxu0 %vm2538_vm4, %v6191_v36 }
 0x900   :  { %7275 = vmatpush3.bf16.msra.mxu0 %v8942_v28  ;;  %7278 = vmatprep.mubr.msk.bf16.mxu0 %vm8193_vm3, %v8192_v27 }
 0x901   :  { %7276 = vmatprep.subr.bf16.mxu0 %v8192_v27 }
 0x904   :  { %7277 = vmatpush3.bf16.msra.mxu0 %v8944_v31 }
 0x905   :  { %7288 = vmatprep.subr.bf16.mxu0 %v8192_v27 }
 0x907   :  { %7279 = vmatmul.mubr.msk.bf16.vlgmr.msra.gmra.mrb[72].mxu0 %vm2538_vm4, %v6195_v37 }
 0x908   :  { %7289 = vmatpush3.bf16.msra.mxu0 %v8942_v28  ;;  %7292 = vmatprep.mubr.msk.bf16.mxu0 %vm8193_vm3, %v8192_v27 }
 0x909   :  { %7290 = vmatprep.subr.bf16.mxu0 %v8192_v27 }
 0x90c   :  { %7291 = vmatpush3.bf16.msra.mxu0 %v8944_v31 }
 0x90d   :  { %7302 = vmatprep.subr.bf16.mxu0 %v8192_v27 }
 0x90f   :  { %7293 = vmatmul.mubr.msk.bf16.vlgmr.msra.gmra.mrb[76].mxu0 %vm2538_vm4, %v6199_v38 }
 0x910   :  { %7303 = vmatpush3.bf16.msra.mxu0 %v8942_v28  ;;  %7306 = vmatprep.mubr.msk.bf16.mxu0 %vm8193_vm3, %v8192_v27 }
 0x911   :  { %7304 = vmatprep.subr.bf16.mxu0 %v8192_v27 }
 0x914   :  { %7305 = vmatpush3.bf16.msra.mxu0 %v8944_v31 }
 0x915   :  { %7316 = vmatprep.subr.bf16.mxu0 %v8192_v27 }
 0x917   :  { %7307 = vmatmul.mubr.msk.bf16.vlgmr.msra.gmra.mrb[80].mxu0 %vm2538_vm4, %v6203_v41  ;;  %v7921_v41 = vld [vmem:[#allocation7 + $0x38] sm:$0xff]  }
 0x918   :  { %7317 = vmatpush3.bf16.msra.mxu0 %v8942_v28  ;;  %7320 = vmatprep.mubr.msk.bf16.mxu0 %vm8193_vm3, %v8192_v27 }
 0x919   :  { %7318 = vmatprep.subr.bf16.mxu0 %v8192_v27 }
 0x91c   :  { %7319 = vmatpush3.bf16.msra.mxu0 %v8944_v31 }
 0x91d   :  { %7330 = vmatprep.subr.bf16.mxu0 %v8192_v27 }
 0x91f   :  { %7321 = vmatmul.mubr.msk.bf16.vlgmr.msra.gmra.mrb[84].mxu0 %vm2538_vm4, %v6207_v42 }
 0x920   :  { %7331 = vmatpush3.bf16.msra.mxu0 %v8942_v28  ;;  %7334 = vmatprep.mubr.msk.bf16.mxu0 %vm8193_vm3, %v8192_v27 }
 0x921   :  { %7332 = vmatprep.subr.bf16.mxu0 %v8192_v27 }
 0x924   :  { %7333 = vmatpush3.bf16.msra.mxu0 %v8944_v31 }
 0x925   :  { %7344 = vmatprep.subr.bf16.mxu0 %v8192_v27 }
 0x927   :  { %7335 = vmatmul.mubr.msk.bf16.vlgmr.msra.gmra.mrb[88].mxu0 %vm2538_vm4, %v6211_v43 }
 0x928   :  { %7345 = vmatpush3.bf16.msra.mxu0 %v8942_v28  ;;  %7348 = vmatprep.mubr.msk.bf16.mxu0 %vm8193_vm3, %v8192_v27 }
 0x929   :  { %7346 = vmatprep.subr.bf16.mxu0 %v8192_v27 }
 0x92c   :  { %7347 = vmatpush3.bf16.msra.mxu0 %v8944_v31 }
 0x92d   :  { %7358 = vmatprep.subr.bf16.mxu0 %v8192_v27 }
 0x92f   :  { %7349 = vmatmul.mubr.msk.bf16.vlgmr.msra.gmra.mrb[92].mxu0 %vm2538_vm4, %v6215_v44 }
 0x930   :  { %7359 = vmatpush3.bf16.msra.mxu0 %v8942_v28  ;;  %7362 = vmatprep.mubr.msk.bf16.mxu0 %vm8193_vm3, %v8192_v27 }
 0x931   :  { %7360 = vmatprep.subr.bf16.mxu0 %v8192_v27 }
 0x934   :  { %7361 = vmatpush3.bf16.msra.mxu0 %v8944_v31 }
 0x935   :  { %7372 = vmatprep.subr.bf16.mxu0 %v8192_v27 }
 0x937   :  { %7363 = vmatmul.mubr.msk.bf16.vlgmr.msra.gmra.mrb[96].mxu0 %vm2538_vm4, %v6219_v45 }
 0x938   :  { %7373 = vmatpush3.bf16.msra.mxu0 %v8942_v28  ;;  %7376 = vmatprep.mubr.msk.bf16.mxu0 %vm8193_vm3, %v8192_v27 }
 0x939   :  { %7374 = vmatprep.subr.bf16.mxu0 %v8192_v27 }
 0x93c   :  { %7375 = vmatpush3.bf16.msra.mxu0 %v8944_v31 }
 0x93d   :  { %7386 = vmatprep.subr.bf16.mxu0 %v8192_v27 }
 0x93f   :  { %7377 = vmatmul.mubr.msk.bf16.vlgmr.msra.gmra.mrb[100].mxu0 %vm2538_vm4, %v6223_v47 }
 0x940   :  { %7387 = vmatpush3.bf16.msra.mxu0 %v8942_v28  ;;  %7390 = vmatprep.mubr.msk.bf16.mxu0 %vm8193_vm3, %v8192_v27 }
 0x941   :  { %7388 = vmatprep.subr.bf16.mxu0 %v8192_v27 }
 0x944   :  { %7389 = vmatpush3.bf16.msra.mxu0 %v8944_v31 }
 0x945   :  { %7400 = vmatprep.subr.bf16.mxu0 %v8192_v27 }
 0x947   :  { %7391 = vmatmul.mubr.msk.bf16.vlgmr.msra.gmra.mrb[104].mxu0 %vm2538_vm4, %v6227_v48 }
 0x948   :  { %7401 = vmatpush3.bf16.msra.mxu0 %v8942_v28  ;;  %7404 = vmatprep.mubr.msk.bf16.mxu0 %vm8193_vm3, %v8192_v27 }
 0x949   :  { %7402 = vmatprep.subr.bf16.mxu0 %v8192_v27 }
 0x94c   :  { %7403 = vmatpush3.bf16.msra.mxu0 %v8944_v31 }
 0x94d   :  { %7414 = vmatprep.subr.bf16.mxu0 %v8192_v27 }
 0x94f   :  { %7405 = vmatmul.mubr.msk.bf16.vlgmr.msra.gmra.mrb[108].mxu0 %vm2538_vm4, %v6231_v51 }
 0x950   :  { %7415 = vmatpush3.bf16.msra.mxu0 %v8942_v28  ;;  %7418 = vmatprep.mubr.msk.bf16.mxu0 %vm8193_vm3, %v8192_v27 }
 0x951   :  { %7416 = vmatprep.subr.bf16.mxu0 %v8192_v27 }
 0x954   :  { %7417 = vmatpush3.bf16.msra.mxu0 %v8944_v31 }
 0x955   :  { %7428 = vmatprep.subr.bf16.mxu0 %v8192_v27 }
 0x957   :  { %7419 = vmatmul.mubr.msk.bf16.vlgmr.msra.gmra.mrb[112].mxu0 %vm2538_vm4, %v6235_v52 }
 0x958   :  { %7430 = vmatprep.mubr.msk.bf16.mxu0 %vm8193_vm3, %v8192_v27 }
 0x9ba   :  { %v2624_v53 = vpop.f32.mrb[56].mxu0  ;;  %v2576_v55 = vpop.f32.mrb[28].mxu1 }
 0x9bb   :  { %v2630_v56 = vpack.c.bf16 %v2624_v53, %v2624_v53  ;;  %v7218_v57 = vpop.f32.mrb[57].mxu0  ;;  %v7210_v58 = vpop.f32.mrb[29].mxu1  ;;  %v2582_v2 = vpack.c.bf16 %v2576_v55, %v2576_v55  ;;  %v7922_v53 = vld [vmem:[#allocation7 + $0x40] sm:$0xff]  }
 0x9bc   :  { %v2627_v59 = vpop.f32.mrb[58].mxu0  ;;  %v2579_v60 = vpop.f32.mrb[30].mxu1 }
 0x9bd   :  { %v7219_v61 = vpop.f32.mrb[59].mxu0  ;;  %7223 = vmatmul.mubr.msk.bf16.vlgmr.msra.gmra.mrb[32].mxu1 %vm214_vm0, %v2630_v56  ;;  %v7211_v62 = vpop.f32.mrb[31].mxu1  ;;  %v7923_v59 = vld [vmem:[#allocation7 + $0x48] sm:$0xff]  }
 0x9be   :  { %7227 = vmatpush3.bf16.msra.mxu1 %v7915_v54  ;;  %7228 = vmatprep.mubr.msk.bf16.mxu1 %vm8193_vm3, %v8192_v27 }
 0x9bf   :  { %7240 = vmatprep.subr.bf16.mxu1 %v8192_v27 }
 0x9c2   :  { %v2771_v63 = vpop.f32.mrb[60].mxu0 }
 0x9c3   :  { %v7238_v0 = vpop.f32.mrb[61].mxu0  ;;  %v2777_v9 = vpack.c.bf16 %v2771_v63, %v2771_v63 }
 0x9c4   :  { %v2774_v1 = vpop.f32.mrb[62].mxu0 }
 0x9c5   :  { %v7239_v3 = vpop.f32.mrb[63].mxu0 }
 0x9c9   :  { %7229 = vmatmul.mubr.msk.bf16.vlgmr.msra.gmra.mrb[32].mxu1 %vm214_vm0, %v2582_v2 }
 0x9ca   :  { %7241 = vmatpush3.bf16.msra.mxu1 %v7916_v4  ;;  %7242 = vmatprep.mubr.msk.bf16.mxu1 %vm8193_vm3, %v8192_v27  ;;  %v2870_v5 = vpop.f32.mrb[64].mxu0 }
 0x9cb   :  { %7254 = vmatprep.subr.bf16.mxu1 %v8192_v27  ;;  %v7252_v6 = vpop.f32.mrb[65].mxu0  ;;  %v2876_v29 = vpack.c.bf16 %v2870_v5, %v2870_v5  ;;  %v7924_v5 = vld [vmem:[#allocation7 + $0x50] sm:$0xff]  }
 0x9cc   :  { %v2873_v7 = vpop.f32.mrb[66].mxu0 }
 0x9cd   :  { %v7253_v8 = vpop.f32.mrb[67].mxu0 }
 0x9d2   :  { %v2969_v11 = vpop.f32.mrb[68].mxu0 }
 0x9d3   :  { %v7266_v12 = vpop.f32.mrb[69].mxu0  ;;  %v2975_v17 = vpack.c.bf16 %v2969_v11, %v2969_v11  ;;  %v7925_v11 = vld [vmem:[#allocation7 + $0x58] sm:$0xff]  }
 0x9d4   :  { %v2972_v13 = vpop.f32.mrb[70].mxu0 }
 0x9d5   :  { %7243 = vmatmul.mubr.msk.bf16.vlgmr.msra.gmra.mrb[32].mxu1 %vm214_vm0, %v2777_v9  ;;  %v7267_v14 = vpop.f32.mrb[71].mxu0  ;;  %v7926_v13 = vld [vmem:[#allocation7 + $0x60] sm:$0xff]  }
 0x9d6   :  { %7255 = vmatpush3.bf16.msra.mxu1 %v7917_v10  ;;  %7256 = vmatprep.mubr.msk.bf16.mxu1 %vm8193_vm3, %v8192_v27 }
 0x9d7   :  { %7268 = vmatprep.subr.bf16.mxu1 %v8192_v27 }
 0x9da   :  { %v3068_v15 = vpop.f32.mrb[72].mxu0 }
 0x9db   :  { %v7280_v19 = vpop.f32.mrb[73].mxu0  ;;  %v3074_v31 = vpack.c.bf16 %v3068_v15, %v3068_v15  ;;  %v7927_v15 = vld [vmem:[#allocation7 + $0x68] sm:$0xff]  }
 0x9dc   :  { %v3071_v20 = vpop.f32.mrb[74].mxu0 }
 0x9dd   :  { %v7281_v30 = vpop.f32.mrb[75].mxu0  ;;  %v7928_v20 = vld [vmem:[#allocation7 + $0x70] sm:$0xff]  }
 0x9de   :  { %v7929_v30 = vld [vmem:[#allocation7 + $0x78] sm:$0xff]  }
 0x9e1   :  { %7257 = vmatmul.mubr.msk.bf16.vlgmr.msra.gmra.mrb[32].mxu1 %vm214_vm0, %v2876_v29 }
 0x9e2   :  { %7269 = vmatpush3.bf16.msra.mxu1 %v7918_v39  ;;  %7270 = vmatprep.mubr.msk.bf16.mxu1 %vm8193_vm3, %v8192_v27  ;;  %v3167_v40 = vpop.f32.mrb[76].mxu0 }
 0x9e3   :  { %7282 = vmatprep.subr.bf16.mxu1 %v8192_v27  ;;  %v7294_v50 = vpop.f32.mrb[77].mxu0  ;;  %v3173_v38 = vpack.c.bf16 %v3167_v40, %v3167_v40 }
 0x9e4   :  { %v3170_v49 = vpop.f32.mrb[78].mxu0 }
 0x9e5   :  { %v7295_v16 = vpop.f32.mrb[79].mxu0 }
 0x9ea   :  { %v3266_v21 = vpop.f32.mrb[80].mxu0 }
 0x9eb   :  { %v7308_v22 = vpop.f32.mrb[81].mxu0  ;;  %v3272_v51 = vpack.c.bf16 %v3266_v21, %v3266_v21 }
 0x9ec   :  { %v3269_v23 = vpop.f32.mrb[82].mxu0 }
 0x9ed   :  { %7271 = vmatmul.mubr.msk.bf16.vlgmr.msra.gmra.mrb[32].mxu1 %vm214_vm0, %v2975_v17  ;;  %v7309_v24 = vpop.f32.mrb[83].mxu0 }
 0x9ee   :  { %7283 = vmatpush3.bf16.msra.mxu1 %v7919_v18  ;;  %7284 = vmatprep.mubr.msk.bf16.mxu1 %vm8193_vm3, %v8192_v27 }
 0x9ef   :  { %7296 = vmatprep.subr.bf16.mxu1 %v8192_v27 }
 0x9f2   :  { %v3365_v25 = vpop.f32.mrb[84].mxu0 }
 0x9f3   :  { %v7322_v26 = vpop.f32.mrb[85].mxu0  ;;  %v3371_v58 = vpack.c.bf16 %v3365_v25, %v3365_v25 }
 0x9f4   :  { %v3368_v28 = vpop.f32.mrb[86].mxu0 }
 0x9f5   :  { %v7323_v32 = vpop.f32.mrb[87].mxu0 }
 0x9f9   :  { %7285 = vmatmul.mubr.msk.bf16.vlgmr.msra.gmra.mrb[32].mxu1 %vm214_vm0, %v3074_v31 }
 0x9fa   :  { %7297 = vmatpush3.bf16.msra.mxu1 %v7920_v33  ;;  %7298 = vmatprep.mubr.msk.bf16.mxu1 %vm8193_vm3, %v8192_v27  ;;  %v3464_v34 = vpop.f32.mrb[88].mxu0 }
 0x9fb   :  { %7310 = vmatprep.subr.bf16.mxu1 %v8192_v27  ;;  %v7336_v35 = vpop.f32.mrb[89].mxu0  ;;  %v3470_v3 = vpack.c.bf16 %v3464_v34, %v3464_v34 }
 0x9fc   :  { %v3467_v36 = vpop.f32.mrb[90].mxu0 }
 0x9fd   :  { %v7337_v37 = vpop.f32.mrb[91].mxu0 }
 0xa02   :  { %v3563_v42 = vpop.f32.mrb[92].mxu0 }
 0xa03   :  { %v7350_v43 = vpop.f32.mrb[93].mxu0  ;;  %v3569_v10 = vpack.c.bf16 %v3563_v42, %v3563_v42 }
 0xa04   :  { %v3566_v44 = vpop.f32.mrb[94].mxu0 }
 0xa05   :  { %7299 = vmatmul.mubr.msk.bf16.vlgmr.msra.gmra.mrb[32].mxu1 %vm214_vm0, %v3173_v38  ;;  %v7351_v45 = vpop.f32.mrb[95].mxu0 }
 0xa06   :  { %7311 = vmatpush3.bf16.msra.mxu1 %v7921_v41  ;;  %7312 = vmatprep.mubr.msk.bf16.mxu1 %vm8193_vm3, %v8192_v27 }
 0xa07   :  { %7324 = vmatprep.subr.bf16.mxu1 %v8192_v27 }
 0xa0a   :  { %v3662_v46 = vpop.f32.mrb[96].mxu0 }
 0xa0b   :  { %v7364_v47 = vpop.f32.mrb[97].mxu0  ;;  %v3668_v12 = vpack.c.bf16 %v3662_v46, %v3662_v46 }
 0xa0c   :  { %v3665_v48 = vpop.f32.mrb[98].mxu0  ;;  %v6239_v47 = vld [vmem:[#allocation8] ss:$0 sm:$0xff] }
 0xa0d   :  { %v7365_v52 = vpop.f32.mrb[99].mxu0 }
 0xa11   :  { %7313 = vmatmul.mubr.msk.bf16.vlgmr.msra.gmra.mrb[32].mxu1 %vm214_vm0, %v3272_v51  ;;  %v6240_v51 = vld [vmem:[#allocation10] ss:$0 sm:$0xff] }
 0xa12   :  { %7325 = vmatpush3.bf16.msra.mxu1 %v7922_v53  ;;  %7326 = vmatprep.mubr.msk.bf16.mxu1 %vm8193_vm3, %v8192_v27  ;;  %v3761_v54 = vpop.f32.mrb[100].mxu0 }
 0xa13   :  { %7338 = vmatprep.subr.bf16.mxu1 %v8192_v27  ;;  %v7378_v55 = vpop.f32.mrb[101].mxu0  ;;  %v3767_v14 = vpack.c.bf16 %v3761_v54, %v3761_v54 }
 0xa14   :  { %v3764_v56 = vpop.f32.mrb[102].mxu0 }
 0xa15   :  { %v7379_v57 = vpop.f32.mrb[103].mxu0 }
 0xa16   :  { %v4160_v57 = vld [vmem:[%s9513_s10] sm:$0x1] }
 0xa1a   :  { %v3860_v60 = vpop.f32.mrb[104].mxu0 }
 0xa1b   :  { %v7392_v61 = vpop.f32.mrb[105].mxu0  ;;  %v3866_v19 = vpack.c.bf16 %v3860_v60, %v3860_v60  ;;  %v6263_v60 = vld [vmem:[%s9513_s10 + $0x3] sm:$0x1] }
 0xa1c   :  { %v3863_v62 = vpop.f32.mrb[106].mxu0  ;;  %v6272_v61 = vld [vmem:[%s9513_s10 + $0x4] sm:$0x1] }
 0xa1d   :  { %7327 = vmatmul.mubr.msk.bf16.vlgmr.msra.gmra.mrb[32].mxu1 %vm214_vm0, %v3371_v58  ;;  %v7393_v63 = vpop.f32.mrb[107].mxu0  ;;  %v6242_v58 = vld [vmem:[%s9513_s10 + $0x1] sm:$0x1]  ;;  %v6281_v62 = vld [vmem:[%s9513_s10 + $0x5] sm:$0x1] }
 0xa1e   :  { %7339 = vmatpush3.bf16.msra.mxu1 %v7923_v59  ;;  %7340 = vmatprep.mubr.msk.bf16.mxu1 %vm8193_vm3, %v8192_v27  ;;  %v6254_v59 = vld [vmem:[%s9513_s10 + $0x2] sm:$0x1]  ;;  %v6290_v63 = vld [vmem:[%s9513_s10 + $0x6] sm:$0x1] }
 0xa1f   :  { %7352 = vmatprep.subr.bf16.mxu1 %v8192_v27 }
 0xa22   :  { %v3959_v0 = vpop.f32.mrb[108].mxu0 }
 0xa23   :  { %v7406_v1 = vpop.f32.mrb[109].mxu0  ;;  %v3965_v29 = vpack.c.bf16 %v3959_v0, %v3959_v0  ;;  %v6299_v0 = vld [vmem:[%s9513_s10 + $0x7] sm:$0x1] }
 0xa24   :  { %v3962_v2 = vpop.f32.mrb[110].mxu0  ;;  %v6308_v1 = vld [vmem:[%s9513_s10 + $0x8] sm:$0x1] }
 0xa25   :  { %v7407_v4 = vpop.f32.mrb[111].mxu0  ;;  %v6317_v2 = vld [vmem:[%s9513_s10 + $0x9] sm:$0x1] }
 0xa26   :  { %v6335_v4 = vld [vmem:[%s9513_s10 + $0xb] sm:$0x1] }
 0xa29   :  { %7341 = vmatmul.mubr.msk.bf16.vlgmr.msra.gmra.mrb[32].mxu1 %vm214_vm0, %v3470_v3  ;;  %v6326_v3 = vld [vmem:[%s9513_s10 + $0xa] sm:$0x1] }
 0xa2a   :  { %7353 = vmatpush3.bf16.msra.mxu1 %v7924_v5  ;;  %7354 = vmatprep.mubr.msk.bf16.mxu1 %vm8193_vm3, %v8192_v27  ;;  %v4058_v6 = vpop.f32.mrb[112].mxu0  ;;  %v7930_v5 = vld [vmem:[%s9514_s11 + $0x10] sm:$0xff]  }
 0xa2b   :  { %7366 = vmatprep.subr.bf16.mxu1 %v8192_v27  ;;  %v7420_v7 = vpop.f32.mrb[113].mxu0  ;;  %v4064_v39 = vpack.c.bf16 %v4058_v6, %v4058_v6  ;;  %v7931_v6 = vld [vmem:[%s9514_s11 + $0x18] sm:$0xff]  }
 0xa2c   :  { %v4061_v8 = vpop.f32.mrb[114].mxu0  ;;  %v6344_v7 = vld [vmem:[%s9513_s10 + $0xc] sm:$0x1] }
 0xa2d   :  { %v7421_v9 = vpop.f32.mrb[115].mxu0  ;;  %v6353_v8 = vld [vmem:[%s9513_s10 + $0xd] sm:$0x1] }
 0xa2e   :  { %v6362_v9 = vld [vmem:[%s9513_s10 + $0xe] sm:$0x1] }
 0xa35   :  { %7355 = vmatmul.mubr.msk.bf16.vlgmr.msra.gmra.mrb[32].mxu1 %vm214_vm0, %v3569_v10  ;;  %v6371_v10 = vld [vmem:[%s9513_s10 + $0xf] sm:$0x1] }
 0xa36   :  { %7367 = vmatpush3.bf16.msra.mxu1 %v7925_v11  ;;  %7368 = vmatprep.mubr.msk.bf16.mxu1 %vm8193_vm3, %v8192_v27 }
 0xa37   :  { %7380 = vmatprep.subr.bf16.mxu1 %v8192_v27 }
 0xa41   :  { %7369 = vmatmul.mubr.msk.bf16.vlgmr.msra.gmra.mrb[32].mxu1 %vm214_vm0, %v3668_v12 }
 0xa42   :  { %7381 = vmatpush3.bf16.msra.mxu1 %v7926_v13  ;;  %7382 = vmatprep.mubr.msk.bf16.mxu1 %vm8193_vm3, %v8192_v27 }
 0xa43   :  { %7394 = vmatprep.subr.bf16.mxu1 %v8192_v27 }
 0xa4d   :  { %7383 = vmatmul.mubr.msk.bf16.vlgmr.msra.gmra.mrb[32].mxu1 %vm214_vm0, %v3767_v14 }
 0xa4e   :  { %7395 = vmatpush3.bf16.msra.mxu1 %v7927_v15  ;;  %7396 = vmatprep.mubr.msk.bf16.mxu1 %vm8193_vm3, %v8192_v27 }
 0xa4f   :  { %7408 = vmatprep.subr.bf16.mxu1 %v8192_v27 }
 0xa59   :  { %7397 = vmatmul.mubr.msk.bf16.vlgmr.msra.gmra.mrb[32].mxu1 %vm214_vm0, %v3866_v19  ;;  %v7932_v19 = vld [vmem:[%s9514_s11] sm:$0xff]  }
 0xa5a   :  { %7409 = vmatpush3.bf16.msra.mxu1 %v7928_v20  ;;  %7410 = vmatprep.mubr.msk.bf16.mxu1 %vm8193_vm3, %v8192_v27 }
 0xa5b   :  { %7422 = vmatprep.subr.bf16.mxu1 %v8192_v27 }
 0xa65   :  { %7411 = vmatmul.mubr.msk.bf16.vlgmr.msra.gmra.mrb[32].mxu1 %vm214_vm0, %v3965_v29 }
 0xa66   :  { %7423 = vmatpush3.bf16.msra.mxu1 %v7929_v30  ;;  %7424 = vmatprep.mubr.msk.bf16.mxu1 %vm8193_vm3, %v8192_v27 }
 0xa67   :  { %7440 = vmatprep.subr.bf16.mxu1 %v8192_v27 }
 0xa71   :  { %7425 = vmatmul.mubr.msk.bf16.vlgmr.msra.gmra.mrb[32].mxu1 %vm214_vm0, %v4064_v39 }
 0xa72   :  { %7444 = vmatprep.mubr.msk.bf16.mxu1 %vm8193_vm3, %v8192_v27  ;;  %7441 = vmatpush3.bf16.msra.mxu1 %v7930_v5 }
 0xa73   :  { %7442 = vmatprep.subr.bf16.mxu1 %v8192_v27 }
 0xa76   :  { %7443 = vmatpush3.bf16.msra.mxu1 %v7931_v6 }
 0xa77   :  { %7448 = vmatprep.subr.bf16.mxu1 %v8192_v27 }
 0xb44   :  { %v4111_v40 = vpop.f32.mrb[32].mxu1 }
 0xb45   :  { %v4118_v50 = vsel %vm2538_vm4, %v4111_v40, 0.0  ;;  %v4126_v49 = vmul.f32 %v4111_v40, %v4111_v40  ;;  %v7426_v16 = vpop.f32.mrb[33].mxu1 }
 0xb46   :  { %v4119_v17 = vrot.slane %v4118_v50, 4  ;;  %v4114_v18 = vpop.f32.mrb[34].mxu1 }
 0xb47   :  { %v4127_v21 = vsel %vm2538_vm4, %v4126_v49, 0.0  ;;  %v7427_v22 = vpop.f32.mrb[35].mxu1  ;;  %v7934_v18 = vld [vmem:[%s9514_s11 + $0x20] sm:$0xff]  }
 0xb48   :  { %v4120_v23 = vadd.f32 %v4119_v17, %v4118_v50  ;;  %v4128_v24 = vrot.slane %v4127_v21, 4  ;;  %v7935_v22 = vld [vmem:[%s9514_s11 + $0x28] sm:$0xff]  }
 0xb4a   :  { %v4121_v25 = vrot.slane %v4120_v23, 2  ;;  %v4129_v26 = vadd.f32 %v4128_v24, %v4127_v21 }
 0xb4c   :  { %v4122_v28 = vadd.f32 %v4121_v25, %v4120_v23  ;;  %v4130_v31 = vrot.slane %v4129_v26, 2 }
 0xb4e   :  { %v4123_v32 = vrot.slane %v4122_v28, 1  ;;  %v4131_v33 = vadd.f32 %v4130_v31, %v4129_v26  ;;  %v7936_v31 = vld [vmem:[%s9514_s11 + $0x30] sm:$0xff]  }
 0xb50   :  { %v4124_v34 = vadd.f32 %v4123_v32, %v4122_v28  ;;  %v4132_v35 = vrot.slane %v4131_v33, 1 }
 0xb52   :  { %v4125_v36 = vmul.f32 0.125, %v4124_v34  ;;  %v4133_v37 = vadd.f32 %v4132_v35, %v4131_v33 }
 0xb54   :  { %v4134_v38 = vmul.f32 0.125, %v4133_v37  ;;  %v4135_v41 = vmul.f32 %v4125_v36, %v4125_v36  ;;  %v4138_v45 = vsub.f32 %v4111_v40, %v4125_v36  ;;  %v7933_v40 = vld [vmem:[%s9514_s11 + $0x8] sm:$0xff]   ;;  %v7937_v36 = vld [vmem:[%s9514_s11 + $0x38] sm:$0xff]  }
 0xb56   :  { %v4136_v42 = vsub.f32 %v4134_v38, %v4135_v41 }
 0xb58   :  { %v4137_v43 = vmax.f32 %v4136_v42, 0.0 }
 0xb5a   :  { %v4139_v44 = vadd.f32 1e-05, %v4137_v43 }
 0xb5c   :  { %7968 = vrsqrt.f32 %v4139_v44  ;;  %v7938_v44 = vld [vmem:[%s9514_s11 + $0x40] sm:$0xff]  }
 0xb66   :  { %v7969_v46 = vpop.eup %7968 }
 0xb67   :  { %v4141_v48 = vmul.f32 %v7969_v46, %v4138_v45  ;;  %v7939_v45 = vld [vmem:[%s9514_s11 + $0x48] sm:$0xff]  }
 0xb69   :  { %v4149_v52 = vmul.f32 %v6239_v47, %v4141_v48 }
 0xb6b   :  { %v4157_v53 = vadd.f32 %v6240_v51, %v4149_v52 }
 0xb6d   :  { %v4158_v54 = vmax.f32 %v4157_v53, 0.0  ;;  %v7940_v53 = vld [vmem:[%s9514_s11 + $0x50] sm:$0xff]  }
 0xb6f   :  { %v4159_v55 = vpack.c.bf16 %v4158_v54, %v4158_v54 }
 0xb71   :  { %v9173_v56 = vsel %vm505_vm1, %v4159_v55, 0 }
 0xb72   :  { %7429 = vmatpush3.bf16.msra.mxu0 %v9173_v56 }
 0xb73   :  { %7434 = vmatprep.subr.bf16.mxu0 %v8192_v27 }
 0xb75   :  { %7431 = vmatmul.mubr.msk.bf16.vlgmr.msra.gmra.mrb[116].mxu0 %vm498_vm2, %v4160_v57 }
 0xb76   :  { %7435 = vmatpush3.bf16.msra.mxu0 %v9173_v56  ;;  %7436 = vmatprep.mubr.msk.bf16.mxu0 %vm8193_vm3, %v8192_v27 }
 0xb77   :  { %7456 = vmatprep.subr.bf16.mxu0 %v8192_v27 }
 0xb7d   :  { %7437 = vmatmul.mubr.msk.bf16.vlgmr.msra.gmra.mrb[120].mxu0 %vm498_vm2, %v6242_v58  ;;  %v7941_v58 = vld [vmem:[%s9514_s11 + $0x58] sm:$0xff]  }
 0xb7e   :  { %7457 = vmatpush3.bf16.msra.mxu0 %v9173_v56  ;;  %7458 = vmatprep.mubr.msk.bf16.mxu0 %vm8193_vm3, %v8192_v27 }
 0xb7f   :  { %7470 = vmatprep.subr.bf16.mxu0 %v8192_v27 }
 0xb85   :  { %7459 = vmatmul.mubr.msk.bf16.vlgmr.msra.gmra.mrb[124].mxu0 %vm498_vm2, %v6254_v59 }
 0xb86   :  { %7471 = vmatpush3.bf16.msra.mxu0 %v9173_v56  ;;  %7472 = vmatprep.mubr.msk.bf16.mxu0 %vm8193_vm3, %v8192_v27 }
 0xb87   :  { %7484 = vmatprep.subr.bf16.mxu0 %v8192_v27 }
 0xb8d   :  { %7473 = vmatmul.mubr.msk.bf16.vlgmr.msra.gmra.mrb[128].mxu0 %vm498_vm2, %v6263_v60 }
 0xb8e   :  { %7485 = vmatpush3.bf16.msra.mxu0 %v9173_v56  ;;  %7486 = vmatprep.mubr.msk.bf16.mxu0 %vm8193_vm3, %v8192_v27 }
 0xb8f   :  { %7498 = vmatprep.subr.bf16.mxu0 %v8192_v27 }
 0xb95   :  { %7487 = vmatmul.mubr.msk.bf16.vlgmr.msra.gmra.mrb[132].mxu0 %vm498_vm2, %v6272_v61 }
 0xb96   :  { %7499 = vmatpush3.bf16.msra.mxu0 %v9173_v56  ;;  %7500 = vmatprep.mubr.msk.bf16.mxu0 %vm8193_vm3, %v8192_v27 }
 0xb97   :  { %7512 = vmatprep.subr.bf16.mxu0 %v8192_v27 }
 0xb9d   :  { %7501 = vmatmul.mubr.msk.bf16.vlgmr.msra.gmra.mrb[136].mxu0 %vm498_vm2, %v6281_v62 }
 0xb9e   :  { %7513 = vmatpush3.bf16.msra.mxu0 %v9173_v56  ;;  %7514 = vmatprep.mubr.msk.bf16.mxu0 %vm8193_vm3, %v8192_v27 }
 0xb9f   :  { %7526 = vmatprep.subr.bf16.mxu0 %v8192_v27 }
 0xba5   :  { %7515 = vmatmul.mubr.msk.bf16.vlgmr.msra.gmra.mrb[140].mxu0 %vm498_vm2, %v6290_v63 }
 0xba6   :  { %7527 = vmatpush3.bf16.msra.mxu0 %v9173_v56  ;;  %7528 = vmatprep.mubr.msk.bf16.mxu0 %vm8193_vm3, %v8192_v27 }
 0xba7   :  { %7540 = vmatprep.subr.bf16.mxu0 %v8192_v27 }
 0xbad   :  { %7529 = vmatmul.mubr.msk.bf16.vlgmr.msra.gmra.mrb[144].mxu0 %vm498_vm2, %v6299_v0  ;;  %v7942_v0 = vld [vmem:[%s9514_s11 + $0x60] sm:$0xff]  }
 0xbae   :  { %7541 = vmatpush3.bf16.msra.mxu0 %v9173_v56  ;;  %7542 = vmatprep.mubr.msk.bf16.mxu0 %vm8193_vm3, %v8192_v27 }
 0xbaf   :  { %7554 = vmatprep.subr.bf16.mxu0 %v8192_v27 }
 0xbb5   :  { %7543 = vmatmul.mubr.msk.bf16.vlgmr.msra.gmra.mrb[148].mxu0 %vm498_vm2, %v6308_v1  ;;  %v7943_v1 = vld [vmem:[%s9514_s11 + $0x68] sm:$0xff]  }
 0xbb6   :  { %7555 = vmatpush3.bf16.msra.mxu0 %v9173_v56  ;;  %7556 = vmatprep.mubr.msk.bf16.mxu0 %vm8193_vm3, %v8192_v27 }
 0xbb7   :  { %7568 = vmatprep.subr.bf16.mxu0 %v8192_v27 }
 0xbbd   :  { %7557 = vmatmul.mubr.msk.bf16.vlgmr.msra.gmra.mrb[152].mxu0 %vm498_vm2, %v6317_v2 }
 0xbbe   :  { %7569 = vmatpush3.bf16.msra.mxu0 %v9173_v56  ;;  %7570 = vmatprep.mubr.msk.bf16.mxu0 %vm8193_vm3, %v8192_v27 }
 0xbbf   :  { %7582 = vmatprep.subr.bf16.mxu0 %v8192_v27 }
 0xbc5   :  { %7571 = vmatmul.mubr.msk.bf16.vlgmr.msra.gmra.mrb[156].mxu0 %vm498_vm2, %v6326_v3 }
 0xbc6   :  { %7583 = vmatpush3.bf16.msra.mxu0 %v9173_v56  ;;  %7584 = vmatprep.mubr.msk.bf16.mxu0 %vm8193_vm3, %v8192_v27 }
 0xbc7   :  { %7596 = vmatprep.subr.bf16.mxu0 %v8192_v27 }
 0xbcd   :  { %7585 = vmatmul.mubr.msk.bf16.vlgmr.msra.gmra.mrb[160].mxu0 %vm498_vm2, %v6335_v4 }
 0xbce   :  { %7597 = vmatpush3.bf16.msra.mxu0 %v9173_v56  ;;  %7598 = vmatprep.mubr.msk.bf16.mxu0 %vm8193_vm3, %v8192_v27 }
 0xbcf   :  { %7610 = vmatprep.subr.bf16.mxu0 %v8192_v27 }
 0xbd5   :  { %7599 = vmatmul.mubr.msk.bf16.vlgmr.msra.gmra.mrb[164].mxu0 %vm498_vm2, %v6344_v7  ;;  %v7944_v7 = vld [vmem:[%s9514_s11 + $0x70] sm:$0xff]  }
 0xbd6   :  { %7611 = vmatpush3.bf16.msra.mxu0 %v9173_v56  ;;  %7612 = vmatprep.mubr.msk.bf16.mxu0 %vm8193_vm3, %v8192_v27 }
 0xbd7   :  { %7624 = vmatprep.subr.bf16.mxu0 %v8192_v27 }
 0xbdd   :  { %7613 = vmatmul.mubr.msk.bf16.vlgmr.msra.gmra.mrb[168].mxu0 %vm498_vm2, %v6353_v8 }
 0xbde   :  { %7625 = vmatpush3.bf16.msra.mxu0 %v9173_v56  ;;  %7626 = vmatprep.mubr.msk.bf16.mxu0 %vm8193_vm3, %v8192_v27 }
 0xbdf   :  { %7638 = vmatprep.subr.bf16.mxu0 %v8192_v27 }
 0xbe5   :  { %7627 = vmatmul.mubr.msk.bf16.vlgmr.msra.gmra.mrb[172].mxu0 %vm498_vm2, %v6362_v9 }
 0xbe6   :  { %7639 = vmatpush3.bf16.msra.mxu0 %v9173_v56  ;;  %7640 = vmatprep.mubr.msk.bf16.mxu0 %vm8193_vm3, %v8192_v27 }
 0xbe7   :  { %7652 = vmatprep.subr.bf16.mxu0 %v8192_v27 }
 0xbed   :  { %7641 = vmatmul.mubr.msk.bf16.vlgmr.msra.gmra.mrb[176].mxu0 %vm498_vm2, %v6371_v10 }
 0xbee   :  { %7660 = vmatprep.mubr.msk.bf16.mxu0 %vm8193_vm3, %v8192_v27 }
 0xc48   :  { %v4201_v11 = vpop.f32.mrb[116].mxu0 }
 0xc49   :  { %v7432_v12 = vpop.f32.mrb[117].mxu0  ;;  %v4207_v21 = vpack.c.bf16 %v4201_v11, %v4201_v11 }
 0xc4a   :  { %v4204_v13 = vpop.f32.mrb[118].mxu0  ;;  %v7945_v12 = vld [vmem:[%s9514_s11 + $0x78] sm:$0xff]  }
 0xc4b   :  { %v7433_v14 = vpop.f32.mrb[119].mxu0 }
 0xc50   :  { %v4251_v15 = vpop.f32.mrb[120].mxu0 }
 0xc51   :  { %v4257_v20 = vpack.c.bf16 %v4251_v15, %v4251_v15  ;;  %v7438_v29 = vpop.f32.mrb[121].mxu0 }
 0xc52   :  { %v4254_v30 = vpop.f32.mrb[122].mxu0  ;;  %v7946_v29 = vld [vmem:[%s9514_s11 + $0x80] sm:$0xff]  }
 0xc53   :  { %7445 = vmatmul.mubr.msk.bf16.vlgmr.msra.gmra.mrb[36].mxu1 %vm2538_vm4, %v4257_v20  ;;  %v7439_v39 = vpop.f32.mrb[123].mxu0  ;;  %v7947_v30 = vld [vmem:[%s9514_s11 + $0x88] sm:$0xff]  }
 0xc54   :  { %7449 = vmatpush3.bf16.msra.mxu1 %v7932_v19  ;;  %7452 = vmatprep.mubr.msk.bf16.mxu1 %vm8193_vm3, %v8192_v27 }
 0xc55   :  { %7450 = vmatprep.subr.bf16.mxu1 %v8192_v27 }
 0xc58   :  { %7451 = vmatpush3.bf16.msra.mxu1 %v7933_v40  ;;  %v4412_v50 = vpop.f32.mrb[124].mxu0 }
 0xc59   :  { %7462 = vmatprep.subr.bf16.mxu1 %v8192_v27  ;;  %v7460_v49 = vpop.f32.mrb[125].mxu0  ;;  %v4418_v28 = vpack.c.bf16 %v4412_v50, %v4412_v50 }
 0xc5a   :  { %v4415_v16 = vpop.f32.mrb[126].mxu0 }
 0xc5b   :  { %v7461_v17 = vpop.f32.mrb[127].mxu0 }
 0xc5c   :  { %v7948_v17 = vld [vmem:[%s9514_s11 + $0x90] sm:$0xff]  }
 0xc5f   :  { %7453 = vmatmul.mubr.msk.bf16.vlgmr.msra.gmra.mrb[36].mxu1 %vm2538_vm4, %v4207_v21 }
 0xc60   :  { %7463 = vmatpush3.bf16.msra.mxu1 %v7934_v18  ;;  %7466 = vmatprep.mubr.msk.bf16.mxu1 %vm8193_vm3, %v8192_v27  ;;  %v4519_v23 = vpop.f32.mrb[128].mxu0 }
 0xc61   :  { %7464 = vmatprep.subr.bf16.mxu1 %v8192_v27  ;;  %v7474_v24 = vpop.f32.mrb[129].mxu0  ;;  %v4525_v42 = vpack.c.bf16 %v4519_v23, %v4519_v23 }
 0xc62   :  { %v4522_v25 = vpop.f32.mrb[130].mxu0  ;;  %v7949_v24 = vld [vmem:[%s9514_s11 + $0x98] sm:$0xff]  }
 0xc63   :  { %v7475_v26 = vpop.f32.mrb[131].mxu0 }
 0xc64   :  { %7465 = vmatpush3.bf16.msra.mxu1 %v7935_v22 }
 0xc65   :  { %7476 = vmatprep.subr.bf16.mxu1 %v8192_v27 }
 0xc68   :  { %v4626_v32 = vpop.f32.mrb[132].mxu0 }
 0xc69   :  { %v7488_v33 = vpop.f32.mrb[133].mxu0  ;;  %v4632_v52 = vpack.c.bf16 %v4626_v32, %v4626_v32 }
 0xc6a   :  { %v4629_v34 = vpop.f32.mrb[134].mxu0  ;;  %v7950_v33 = vld [vmem:[%s9514_s11 + $0xa0] sm:$0xff]  }
 0xc6b   :  { %7467 = vmatmul.mubr.msk.bf16.vlgmr.msra.gmra.mrb[36].mxu1 %vm2538_vm4, %v4418_v28  ;;  %v7489_v35 = vpop.f32.mrb[135].mxu0  ;;  %v7951_v34 = vld [vmem:[%s9514_s11 + $0xa8] sm:$0xff]  }
 0xc6c   :  { %7477 = vmatpush3.bf16.msra.mxu1 %v7936_v31  ;;  %7480 = vmatprep.mubr.msk.bf16.mxu1 %vm8193_vm3, %v8192_v27 }
 0xc6d   :  { %7478 = vmatprep.subr.bf16.mxu1 %v8192_v27 }
 0xc70   :  { %7479 = vmatpush3.bf16.msra.mxu1 %v7937_v36  ;;  %v4733_v37 = vpop.f32.mrb[136].mxu0 }
 0xc71   :  { %7490 = vmatprep.subr.bf16.mxu1 %v8192_v27  ;;  %v7502_v38 = vpop.f32.mrb[137].mxu0  ;;  %v4739_v62 = vpack.c.bf16 %v4733_v37, %v4733_v37 }
 0xc72   :  { %v4736_v41 = vpop.f32.mrb[138].mxu0 }
 0xc73   :  { %v7503_v43 = vpop.f32.mrb[139].mxu0 }
 0xc74   :  { %v7953_v43 = vld [vmem:[%s9514_s11 + $0xb8] sm:$0xff]  }
 0xc77   :  { %7481 = vmatmul.mubr.msk.bf16.vlgmr.msra.gmra.mrb[36].mxu1 %vm2538_vm4, %v4525_v42  ;;  %v7952_v42 = vld [vmem:[%s9514_s11 + $0xb0] sm:$0xff]  }
 0xc78   :  { %7491 = vmatpush3.bf16.msra.mxu1 %v7938_v44  ;;  %7494 = vmatprep.mubr.msk.bf16.mxu1 %vm8193_vm3, %v8192_v27  ;;  %v4840_v46 = vpop.f32.mrb[140].mxu0 }
 0xc79   :  { %7492 = vmatprep.subr.bf16.mxu1 %v8192_v27  ;;  %v7516_v47 = vpop.f32.mrb[141].mxu0  ;;  %v4846_v6 = vpack.c.bf16 %v4840_v46, %v4840_v46  ;;  %v7955_v46 = vld [vmem:[%s9514_s11 + $0xc8] sm:$0xff]  }
 0xc7a   :  { %v4843_v48 = vpop.f32.mrb[142].mxu0 }
 0xc7b   :  { %v7517_v51 = vpop.f32.mrb[143].mxu0  ;;  %v7956_v48 = vld [vmem:[%s9514_s11 + $0xd0] sm:$0xff]  }
 0xc7c   :  { %7493 = vmatpush3.bf16.msra.mxu1 %v7939_v45  ;;  %v7954_v45 = vld [vmem:[%s9514_s11 + $0xc0] sm:$0xff]   ;;  %v7957_v51 = vld [vmem:[%s9514_s11 + $0xd8] sm:$0xff]  }
 0xc7d   :  { %7504 = vmatprep.subr.bf16.mxu1 %v8192_v27 }
 0xc80   :  { %v4947_v54 = vpop.f32.mrb[144].mxu0 }
 0xc81   :  { %v7530_v55 = vpop.f32.mrb[145].mxu0  ;;  %v4953_v19 = vpack.c.bf16 %v4947_v54, %v4947_v54  ;;  %v7959_v54 = vld [vmem:[%s9514_s11 + $0xe8] sm:$0xff]  }
 0xc82   :  { %v4950_v56 = vpop.f32.mrb[146].mxu0 }
 0xc83   :  { %7495 = vmatmul.mubr.msk.bf16.vlgmr.msra.gmra.mrb[36].mxu1 %vm2538_vm4, %v4632_v52  ;;  %v7531_v57 = vpop.f32.mrb[147].mxu0  ;;  %v7960_v56 = vld [vmem:[%s9514_s11 + $0xf0] sm:$0xff]  }
 0xc84   :  { %7505 = vmatpush3.bf16.msra.mxu1 %v7940_v53  ;;  %7508 = vmatprep.mubr.msk.bf16.mxu1 %vm8193_vm3, %v8192_v27  ;;  %v7958_v53 = vld [vmem:[%s9514_s11 + $0xe0] sm:$0xff]   ;;  %v7961_v57 = vld [vmem:[%s9514_s11 + $0xf8] sm:$0xff]  }
 0xc85   :  { %7506 = vmatprep.subr.bf16.mxu1 %v8192_v27 }
 0xc88   :  { %7507 = vmatpush3.bf16.msra.mxu1 %v7941_v58  ;;  %v5054_v59 = vpop.f32.mrb[148].mxu0 }
 0xc89   :  { %7518 = vmatprep.subr.bf16.mxu1 %v8192_v27  ;;  %v7544_v60 = vpop.f32.mrb[149].mxu0  ;;  %v5060_v16 = vpack.c.bf16 %v5054_v59, %v5054_v59  ;;  %v7962_v59 = vld [vmem:[%s9517_s14] sm:$0xff]  }
 0xc8a   :  { %v5057_v61 = vpop.f32.mrb[150].mxu0  ;;  %7653 = vmatpush3.bf16.msra.mxu0 %v7962_v59  ;;  %v7963_v60 = vld [vmem:[%s9517_s14 + $0x8] sm:$0xff]  }
 0xc8b   :  { %v7545_v63 = vpop.f32.mrb[151].mxu0  ;;  %7654 = vmatprep.subr.bf16.mxu0 %v8192_v27  ;;  %v7964_v61 = vld [vmem:[%s9517_s14 + $0x10] sm:$0xff]  }
 0xc8e   :  { %7655 = vmatpush3.bf16.msra.mxu0 %v7963_v60 }
 0xc8f   :  { %7509 = vmatmul.mubr.msk.bf16.vlgmr.msra.gmra.mrb[36].mxu1 %vm2538_vm4, %v4739_v62  ;;  %7656 = vmatprep.subr.bf16.mxu0 %v8192_v27  ;;  %v7965_v62 = vld [vmem:[%s9517_s14 + $0x18] sm:$0xff]   ;;  %s8194_s14 = smov [#allocation16]  }
 0xc90   :  { %7519 = vmatpush3.bf16.msra.mxu1 %v7942_v0  ;;  %7522 = vmatprep.mubr.msk.bf16.mxu1 %vm8193_vm3, %v8192_v27  ;;  %v5161_v2 = vpop.f32.mrb[152].mxu0  ;;  %s6005_s29 = sshll.u32 %s8194_s14, 4  ;;  %s6006_s29 = int_to_ptr.vmem [resolvable:$true] %s6005_s29 }
 0xc91   :  { %7520 = vmatprep.subr.bf16.mxu1 %v8192_v27  ;;  %v7558_v3 = vpop.f32.mrb[153].mxu0  ;;  %v5167_v31 = vpack.c.bf16 %v5161_v2, %v5161_v2  ;;  %s8148_s22 = scalar_lea.vmem %s6006_s29, 32  ;;  %p8153_p9 = scmp.lt.s32.totalorder %s6006_s29, %s6006_s29 }
 0xc92   :  { %v5164_v4 = vpop.f32.mrb[154].mxu0  ;;  %7657 = vmatpush3.bf16.msra.mxu0 %v7964_v61  ;;  %p8149_p8 = scmp.ne.s32.totalorder %s6006_s29, %s8148_s22  ;;  %p8154_p10 = scmp.lt.s32.totalorder %s8148_s22, %s8148_s22 }
 0xc93   :  { %v7559_v5 = vpop.f32.mrb[155].mxu0  ;;  %7658 = vmatprep.subr.bf16.mxu0 %v8192_v27 }
 0xc94   :  { %7521 = vmatpush3.bf16.msra.mxu1 %v7943_v1  ;;  %p8155_p11 = por %p8154_p10, %p8153_p9 }
 0xc95   :  { %7532 = vmatprep.subr.bf16.mxu1 %v8192_v27 }
 0xc96   :  { %7659 = vmatpush3.bf16.msra.mxu0 %v7965_v62  ;;  %p8156_p12 = pnand %p8155_p11, %p8149_p8 }
 0xc98   :  { %v5268_v8 = vpop.f32.mrb[156].mxu0 }
 0xc99   :  { %v7572_v9 = vpop.f32.mrb[157].mxu0  ;;  %v5274_v41 = vpack.c.bf16 %v5268_v8, %v5268_v8 }
 0xc9a   :  { %v5271_v10 = vpop.f32.mrb[158].mxu0 }
 0xc9b   :  { %7523 = vmatmul.mubr.msk.bf16.vlgmr.msra.gmra.mrb[36].mxu1 %vm2538_vm4, %v4846_v6  ;;  %v7573_v11 = vpop.f32.mrb[159].mxu0 }
 0xc9c   :  { %7533 = vmatpush3.bf16.msra.mxu1 %v7944_v7  ;;  %7536 = vmatprep.mubr.msk.bf16.mxu1 %vm8193_vm3, %v8192_v27 }
 0xc9d   :  { %7534 = vmatprep.subr.bf16.mxu1 %v8192_v27 }
 0xca0   :  { %7535 = vmatpush3.bf16.msra.mxu1 %v7945_v12  ;;  %v5375_v13 = vpop.f32.mrb[160].mxu0 }
 0xca1   :  { %7546 = vmatprep.subr.bf16.mxu1 %v8192_v27  ;;  %v7586_v14 = vpop.f32.mrb[161].mxu0  ;;  %v5381_v44 = vpack.c.bf16 %v5375_v13, %v5375_v13 }
 0xca2   :  { %v5378_v15 = vpop.f32.mrb[162].mxu0 }
 0xca3   :  { %v7587_v20 = vpop.f32.mrb[163].mxu0 }
 0xca7   :  { %7537 = vmatmul.mubr.msk.bf16.vlgmr.msra.gmra.mrb[36].mxu1 %vm2538_vm4, %v4953_v19 }
 0xca8   :  { %7547 = vmatpush3.bf16.msra.mxu1 %v7946_v29  ;;  %7550 = vmatprep.mubr.msk.bf16.mxu1 %vm8193_vm3, %v8192_v27  ;;  %v5482_v39 = vpop.f32.mrb[164].mxu0 }
 0xca9   :  { %7548 = vmatprep.subr.bf16.mxu1 %v8192_v27  ;;  %v7600_v40 = vpop.f32.mrb[165].mxu0  ;;  %v5488_v47 = vpack.c.bf16 %v5482_v39, %v5482_v39 }
 0xcaa   :  { %v5485_v50 = vpop.f32.mrb[166].mxu0 }
 0xcab   :  { %v7601_v49 = vpop.f32.mrb[167].mxu0 }
 0xcac   :  { %7549 = vmatpush3.bf16.msra.mxu1 %v7947_v30 }
 0xcad   :  { %7560 = vmatprep.subr.bf16.mxu1 %v8192_v27 }
 0xcb0   :  { %v5589_v18 = vpop.f32.mrb[168].mxu0 }
 0xcb1   :  { %v7614_v21 = vpop.f32.mrb[169].mxu0  ;;  %v5595_v52 = vpack.c.bf16 %v5589_v18, %v5589_v18 }
 0xcb2   :  { %v5592_v22 = vpop.f32.mrb[170].mxu0  ;;  %v6381_v21 = vld [vmem:[#allocation13] ss:$0 sm:$0xff] }
 0xcb3   :  { %7551 = vmatmul.mubr.msk.bf16.vlgmr.msra.gmra.mrb[36].mxu1 %vm2538_vm4, %v5060_v16  ;;  %v7615_v23 = vpop.f32.mrb[171].mxu0 }
 0xcb4   :  { %7561 = vmatpush3.bf16.msra.mxu1 %v7948_v17  ;;  %7564 = vmatprep.mubr.msk.bf16.mxu1 %vm8193_vm3, %v8192_v27  ;;  %v6380_v17 = vld [vmem:[#allocation11] ss:$0 sm:$0xff] }
 0xcb5   :  { %7562 = vmatprep.subr.bf16.mxu1 %v8192_v27 }
 0xcb8   :  { %7563 = vmatpush3.bf16.msra.mxu1 %v7949_v24  ;;  %v5696_v25 = vpop.f32.mrb[172].mxu0 }
 0xcb9   :  { %7574 = vmatprep.subr.bf16.mxu1 %v8192_v27  ;;  %v7628_v26 = vpop.f32.mrb[173].mxu0  ;;  %v5702_v55 = vpack.c.bf16 %v5696_v25, %v5696_v25 }
 0xcba   :  { %v5699_v28 = vpop.f32.mrb[174].mxu0  ;;  %v6382_v26 = vld [vmem:[#allocation14] ss:$0 sm:$0xff] }
 0xcbb   :  { %v7629_v32 = vpop.f32.mrb[175].mxu0 }
 0xcbf   :  { %7565 = vmatmul.mubr.msk.bf16.vlgmr.msra.gmra.mrb[36].mxu1 %vm2538_vm4, %v5167_v31 }
 0xcc0   :  { %7575 = vmatpush3.bf16.msra.mxu1 %v7950_v33  ;;  %7578 = vmatprep.mubr.msk.bf16.mxu1 %vm8193_vm3, %v8192_v27  ;;  %v5803_v35 = vpop.f32.mrb[176].mxu0 }
 0xcc1   :  { %7576 = vmatprep.subr.bf16.mxu1 %v8192_v27  ;;  %v7642_v36 = vpop.f32.mrb[177].mxu0  ;;  %v5809_v58 = vpack.c.bf16 %v5803_v35, %v5803_v35 }
 0xcc2   :  { %v5806_v37 = vpop.f32.mrb[178].mxu0 }
 0xcc3   :  { %v7643_v38 = vpop.f32.mrb[179].mxu0 }
 0xcc4   :  { %7577 = vmatpush3.bf16.msra.mxu1 %v7951_v34 }
 0xcc5   :  { %7588 = vmatprep.subr.bf16.mxu1 %v8192_v27 }
 0xccb   :  { %7579 = vmatmul.mubr.msk.bf16.vlgmr.msra.gmra.mrb[36].mxu1 %vm2538_vm4, %v5274_v41 }
 0xccc   :  { %7589 = vmatpush3.bf16.msra.mxu1 %v7952_v42  ;;  %7592 = vmatprep.mubr.msk.bf16.mxu1 %vm8193_vm3, %v8192_v27 }
 0xccd   :  { %7590 = vmatprep.subr.bf16.mxu1 %v8192_v27 }
 0xcd0   :  { %7591 = vmatpush3.bf16.msra.mxu1 %v7953_v43 }
 0xcd1   :  { %7602 = vmatprep.subr.bf16.mxu1 %v8192_v27 }
 0xcd7   :  { %7593 = vmatmul.mubr.msk.bf16.vlgmr.msra.gmra.mrb[36].mxu1 %vm2538_vm4, %v5381_v44 }
 0xcd8   :  { %7603 = vmatpush3.bf16.msra.mxu1 %v7954_v45  ;;  %7606 = vmatprep.mubr.msk.bf16.mxu1 %vm8193_vm3, %v8192_v27 }
 0xcd9   :  { %7604 = vmatprep.subr.bf16.mxu1 %v8192_v27 }
 0xcdc   :  { %7605 = vmatpush3.bf16.msra.mxu1 %v7955_v46 }
 0xcdd   :  { %7616 = vmatprep.subr.bf16.mxu1 %v8192_v27 }
 0xce3   :  { %7607 = vmatmul.mubr.msk.bf16.vlgmr.msra.gmra.mrb[36].mxu1 %vm2538_vm4, %v5488_v47 }
 0xce4   :  { %7617 = vmatpush3.bf16.msra.mxu1 %v7956_v48  ;;  %7620 = vmatprep.mubr.msk.bf16.mxu1 %vm8193_vm3, %v8192_v27 }
 0xce5   :  { %7618 = vmatprep.subr.bf16.mxu1 %v8192_v27 }
 0xce8   :  { %7619 = vmatpush3.bf16.msra.mxu1 %v7957_v51 }
 0xce9   :  { %7630 = vmatprep.subr.bf16.mxu1 %v8192_v27 }
 0xcef   :  { %7621 = vmatmul.mubr.msk.bf16.vlgmr.msra.gmra.mrb[36].mxu1 %vm2538_vm4, %v5595_v52 }
 0xcf0   :  { %7631 = vmatpush3.bf16.msra.mxu1 %v7958_v53  ;;  %7634 = vmatprep.mubr.msk.bf16.mxu1 %vm8193_vm3, %v8192_v27 }
 0xcf1   :  { %7632 = vmatprep.subr.bf16.mxu1 %v8192_v27 }
 0xcf4   :  { %7633 = vmatpush3.bf16.msra.mxu1 %v7959_v54 }
 0xcf5   :  { %7644 = vmatprep.subr.bf16.mxu1 %v8192_v27 }
 0xcfb   :  { %7635 = vmatmul.mubr.msk.bf16.vlgmr.msra.gmra.mrb[36].mxu1 %vm2538_vm4, %v5702_v55 }
 0xcfc   :  { %7645 = vmatpush3.bf16.msra.mxu1 %v7960_v56  ;;  %7648 = vmatprep.mubr.msk.bf16.mxu1 %vm8193_vm3, %v8192_v27 }
 0xcfd   :  { %7646 = vmatprep.subr.bf16.mxu1 %v8192_v27 }
 0xd00   :  { %7647 = vmatpush3.bf16.msra.mxu1 %v7961_v57 }
 0xd07   :  { %7649 = vmatmul.mubr.msk.bf16.vlgmr.msra.gmra.mrb[36].mxu1 %vm2538_vm4, %v5809_v58 }
 0xdda   :  { %v5864_v63 = vpop.f32.mrb[36].mxu1 }
 0xddb   :  { %v5872_v0 = vsel %vm5871_vm5, %v5864_v63, 0.0  ;;  %v5880_v1 = vmul.f32 %v5864_v63, %v5864_v63  ;;  %v7650_v2 = vpop.f32.mrb[37].mxu1 }
 0xddc   :  { %v5873_v3 = vrot.slane %v5872_v0, 4  ;;  %v5867_v4 = vpop.f32.mrb[38].mxu1 }
 0xddd   :  { %v5881_v5 = vsel %vm5871_vm5, %v5880_v1, 0.0  ;;  %v7651_v6 = vpop.f32.mrb[39].mxu1 }
 0xdde   :  { %v5874_v7 = vadd.f32 %v5873_v3, %v5872_v0  ;;  %v5882_v8 = vrot.slane %v5881_v5, 4 }
 0xde0   :  { %v5875_v9 = vrot.slane %v5874_v7, 2  ;;  %v5883_v10 = vadd.f32 %v5882_v8, %v5881_v5 }
 0xde2   :  { %v5876_v11 = vadd.f32 %v5875_v9, %v5874_v7  ;;  %v5884_v27 = vrot.slane %v5883_v10, 2 }
 0xde4   :  { %v5877_v12 = vrot.slane %v5876_v11, 1  ;;  %v5885_v13 = vadd.f32 %v5884_v27, %v5883_v10 }
 0xde6   :  { %v5878_v14 = vadd.f32 %v5877_v12, %v5876_v11  ;;  %v5886_v15 = vrot.slane %v5885_v13, 1 }
 0xde8   :  { %v5879_v19 = vmul.f32 0.5, %v5878_v14  ;;  %v5887_v20 = vadd.f32 %v5886_v15, %v5885_v13 }
 0xdea   :  { %v5888_v29 = vmul.f32 0.5, %v5887_v20  ;;  %v5889_v30 = vmul.f32 %v5879_v19, %v5879_v19  ;;  %v5892_v49 = vsub.f32 %v5864_v63, %v5879_v19 }
 0xdec   :  { %v5890_v39 = vsub.f32 %v5888_v29, %v5889_v30 }
 0xdee   :  { %v5891_v40 = vmax.f32 %v5890_v39, 0.0 }
 0xdf0   :  { %v5893_v50 = vadd.f32 1e-05, %v5891_v40 }
 0xdf2   :  { %7970 = vrsqrt.f32 %v5893_v50 }
 0xdfc   :  { %v7971_v16 = vpop.eup %7970 }
 0xdfd   :  { %v5895_v18 = vmul.f32 %v7971_v16, %v5892_v49 }
 0xdff   :  { %v5903_v22 = vmul.f32 %v6380_v17, %v5895_v18 }
 0xe01   :  { %v5911_v23 = vadd.f32 %v6381_v21, %v5903_v22 }
 0xe03   :  { %v5912_v24 = vmax.f32 %v5911_v23, 0.0 }
 0xe05   :  { %v5913_v25 = vpack.c.bf16 %v5912_v24, %v5912_v24 }
 0xe07   :  { %7661 = vmatmul.mubr.msk.bf16.vlgmr.msra.gmra.mrb[180].mxu0 %vm5953_vm6, %v5913_v25 }
 0xeda   :  { %v5991_v28 = vpop.f32.mrb[180].mxu0 }
 0xedb   :  { %v5992_v31 = vadd.f32 %v6382_v26, %v5991_v28  ;;  %v7662_v32 = vpop.f32.mrb[181].mxu0 }
 0xedc   :  { %v5994_v33 = vpop.f32.mrb[182].mxu0 }
 0xedd   :  { %v7663_v34 = vpop.f32.mrb[183].mxu0  ;;  %5998 = vst.msk [vmem:[#allocation16] sm:$0x3] %vm5997_vm7, %v5992_v31 }
 0xede   :  { %8159 = shalt.err (!%p8156_p12)
}
 0xedf   :  { %s8160_s17 = scalar_lea.hbm %s9519_s16, 32 }
 0xee0   :  { %p8161_p13 = scmp.ne.s32.totalorder %s9519_s16, %s8160_s17  ;;  %p8164_p0 = scmp.lt.u32.totalorder %s8160_s17, %s9519_s16 }
 0xee2   :  { %p8166_p1 = pnand %p8164_p0, %p8161_p13 }
 0xee4   :  { %8169 = shalt.err (!%p8166_p1)
}
 0xee5   :  { %6008 = dma.vmem_to_hbm [thread:$0]  %s6006_s29, 32, %s9519_s16, [#allocation4]  }
 0xee6   :  { %8180 = dma.done.wait [#allocation4], 32  }
 0xee7   :  { %8181 = vsyncadd [#allocation4], 4294967264 }
 0xee8   :  { %6012 = vsyncpa [#allocation3], 1 }
 0xee9   :  { %6013 = vsyncpa [#allocation6], 1 }
 0xeea   :  { %6014 = vsyncpa [#allocation9], 1 }
 0xeeb   :  { %6015 = vsyncpa [#allocation12], 1 }
 0xeec   :  { %6016 = vsyncpa [#allocation15], 1 }
 0xeed   :  { %6017 = vsyncpa [#allocation4], 1 }

</bundles_post_ra>
